<compile_context>
chip_gen: v7x
topology: tpu7x:2x2x1
jax: 0.10.0
libtpu: 0.0.40
codegen_flags: <defaults>
</compile_context>

<pallas_src>
import functools

import jax
import jax.numpy as jnp
from jax.experimental import pallas as pl
from jax.experimental.pallas import tpu as pltpu


def _round_up(x, m):
    return (x + m - 1) // m * m


def _fold_bn(gamma, beta, mean, var, eps=1e-5):
    scale = gamma / jnp.sqrt(var + eps)
    bias = beta - mean * scale
    return scale, bias


# ---------------------------------------------------------------------------
# Fused bottleneck kernel: one (n, d) output plane per grid step.
# Ring buffer y1_ref[slot] holds conv1+bn1+relu of input plane p at
# slot = p mod 3 (plane -1 / plane D are zero).
# ---------------------------------------------------------------------------
def _bottleneck_kernel(xres_ref, xnext_ref,                 # x[n, d], x[n, min(d+1, D-1)]
                       w1_ref, w2_ref, w3_ref,              # bf16: (C0,Pp), (3,3,3,Pp,Pp), (Pp,C0)
                       s1_ref, b1_ref, s2_ref, b2_ref, s3_ref, b3_ref,   # f32
                       o_ref,                               # (1,1,H,W,C0)
                       y1_ref,                              # VMEM (3, H+2, W+2, Pp) bf16
                       *, D, H, W, C0, Pp, HT):
    d = pl.program_id(1)

    def conv1_into_slot(x_ref, slot, mask):
        # conv1 (1x1x1) + bn1 + relu for one depth plane, written into the
        # ring slot's interior (halo border stays zero).
        v = x_ref[...].reshape(H * W, C0).astype(jnp.bfloat16)
        z = jnp.dot(v, w1_ref[...], preferred_element_type=jnp.float32)
        z = jnp.maximum(z * s1_ref[...] + b1_ref[...], 0.0) * mask
        y1_ref[pl.ds(slot, 1), pl.ds(1, H), pl.ds(1, W), :] = (
            z.reshape(1, H, W, Pp).astype(y1_ref.dtype))

    # ---- stage 1: ring-buffered conv1 -------------------------------------
    @pl.when(d == 0)
    def _():
        # Zero the whole scratch once per depth sequence: establishes the
        # H/W pad=1 halo and the plane -1 (slot 2) zeros.  Prime plane 0.
        y1_ref[...] = jnp.zeros_like(y1_ref)
        conv1_into_slot(xres_ref, 0, 1.0)

    # Every step computes conv1 only for the newly needed plane d+1
    # (zero-masked when d+1 is out of range).
    dp1 = d + 1
    conv1_into_slot(xnext_ref, dp1 % 3, (dp1 < D).astype(jnp.float32))

    # ---- stages 2+3: conv2 (3x3x3) + bn2 + relu, conv3 + bn3 + residual ----
    # Processed HT output rows at a time so the f32 accumulator stays small.
    for h0 in range(0, H, HT):
        hc = min(HT, H - h0)
        acc = jnp.zeros((hc * W, Pp), jnp.float32)
        for kd in range(3):
            slot = (d + kd + 2) % 3          # == (d - 1 + kd) mod 3
            for kh in range(3):
                for kw in range(3):
                    patch = y1_ref[pl.ds(slot, 1), pl.ds(h0 + kh, hc),
                                   pl.ds(kw, W), :]
                    acc = acc + jnp.dot(patch.reshape(hc * W, Pp),
                                        w2_ref[kd, kh, kw],
                                        preferred_element_type=jnp.float32)
        y2 = jnp.maximum(acc * s2_ref[...] + b2_ref[...], 0.0)        # f32
        y3 = jnp.dot(y2.astype(jnp.bfloat16), w3_ref[...],
                     preferred_element_type=jnp.float32)
        res = xres_ref[:, :, pl.ds(h0, hc), :, :].reshape(hc * W, C0)
        out = jnp.maximum(y3 * s3_ref[...] + b3_ref[...]
                          + res.astype(jnp.float32), 0.0)
        o_ref[:, :, pl.ds(h0, hc), :, :] = (
            out.reshape(1, 1, hc, W, C0).astype(o_ref.dtype))


# ---------------------------------------------------------------------------
# Wrapper
# ---------------------------------------------------------------------------
def bottleneck_forward(x, params):
    """x: (N, D, H, W, Cin) with Cin == planes * 4 (stride=1, downsample=None)."""
    N, D, H, W, C0 = x.shape
    P = params["w1"].shape[1]
    assert params["w3"].shape[1] == C0, \
        "downsample=None requires inplanes == planes * expansion"

    # Lane-dense internal channel width (zero-padding is numerically exact).
    Pp = max(128, _round_up(P, 128))

    s1, b1 = _fold_bn(*params["bn1"])
    s2, b2 = _fold_bn(*params["bn2"])
    s3, b3 = _fold_bn(*params["bn3"])

    bf16 = jnp.bfloat16
    w1p = jnp.pad(params["w1"], ((0, 0), (0, Pp - P))).astype(bf16)          # (C0, Pp)
    w2p = jnp.pad(params["w2"],
                  ((0, 0), (0, 0), (0, 0),
                   (0, Pp - P), (0, Pp - P))).astype(bf16)                   # (3,3,3,Pp,Pp)
    w3p = jnp.pad(params["w3"], ((0, Pp - P), (0, 0))).astype(bf16)          # (Pp, C0)
    s1p = jnp.pad(s1, (0, Pp - P)).reshape(1, Pp)
    b1p = jnp.pad(b1, (0, Pp - P)).reshape(1, Pp)
    s2p = jnp.pad(s2, (0, Pp - P)).reshape(1, Pp)
    b2p = jnp.pad(b2, (0, Pp - P)).reshape(1, Pp)
    s3r = s3.reshape(1, C0)
    b3r = b3.reshape(1, C0)

    # Row chunk so the conv2 f32 accumulator stays <= ~128 KiB (register file
    # is 256 KiB; a bigger live accumulator guarantees spill churn).
    HT = H
    while HT > 1 and HT * W * Pp * 4 > (128 * 1024):
        HT = max(1, HT // 2)

    kernel = functools.partial(_bottleneck_kernel,
                               D=D, H=H, W=W, C0=C0, Pp=Pp, HT=HT)

    x_block = (1, 1, H, W, C0)
    const2 = lambda n, d: (0, 0)

    return pl.pallas_call(
        kernel,
        out_shape=jax.ShapeDtypeStruct((N, D, H, W, C0), x.dtype),
        grid=(N, D),
        in_specs=[
            # residual plane d (also primes the ring at d == 0)
            pl.BlockSpec(x_block, lambda n, d: (n, d, 0, 0, 0)),
            # new plane d+1 (clamped; zero-masked in-kernel when OOB)
            pl.BlockSpec(x_block, lambda n, d: (n, jnp.minimum(d + 1, D - 1), 0, 0, 0)),
            pl.BlockSpec((C0, Pp), const2),
            pl.BlockSpec((3, 3, 3, Pp, Pp), lambda n, d: (0, 0, 0, 0, 0)),
            pl.BlockSpec((Pp, C0), const2),
            pl.BlockSpec((1, Pp), const2),
            pl.BlockSpec((1, Pp), const2),
            pl.BlockSpec((1, Pp), const2),
            pl.BlockSpec((1, Pp), const2),
            pl.BlockSpec((1, C0), const2),
            pl.BlockSpec((1, C0), const2),
        ],
        out_specs=pl.BlockSpec(x_block, lambda n, d: (n, d, 0, 0, 0)),
        scratch_shapes=[pltpu.VMEM((3, H + 2, W + 2, Pp), jnp.bfloat16)],
        compiler_params=pltpu.CompilerParams(
            # d must be sequential ("arbitrary") for the conv1 ring buffer;
            # n stays "parallel" so v7x's 2 TensorCores both get work (N >= 2).
            dimension_semantics=("parallel", "arbitrary"),
            vmem_limit_bytes=48 * 1024 * 1024),
    )(x, x, w1p, w2p, w3p, s1p, b1p, s2p, b2p, s3r, b3r)


# ---------------------------------------------------------------------------
# Pure-JAX reference (f32) for correctness check
# ---------------------------------------------------------------------------
def bottleneck_reference(x, params):
    def bn(y, gamma, beta, mean, var, eps=1e-5):
        return (y - mean) / jnp.sqrt(var + eps) * gamma + beta

    dn = ("NDHWC", "DHWIO", "NDHWC")
    w1 = params["w1"].reshape(1, 1, 1, *params["w1"].shape)
    w3 = params["w3"].reshape(1, 1, 1, *params["w3"].shape)
    y = jax.lax.conv_general_dilated(x, w1, (1, 1, 1), "VALID", dimension_numbers=dn)
    y = jnp.maximum(bn(y, *params["bn1"]), 0.0)
    y = jax.lax.conv_general_dilated(y, params["w2"], (1, 1, 1), "SAME",
                                     dimension_numbers=dn)
    y = jnp.maximum(bn(y, *params["bn2"]), 0.0)
    y = jax.lax.conv_general_dilated(y, w3, (1, 1, 1), "VALID", dimension_numbers=dn)
    y = bn(y, *params["bn3"]) + x
    return jnp.maximum(y, 0.0)


# ---------------------------------------------------------------------------
# Main
# ---------------------------------------------------------------------------
if __name__ == "__main__":
    key = jax.random.PRNGKey(0)
    ks = jax.random.split(key, 16)

    # Small shapes consistent with the module: Bottleneck(inplanes=128, planes=32),
    # inplanes = planes * 4 so downsample=None is valid; 128 output channels keep
    # the HBM store lane-dense.  Input layout NDHWC (PyTorch NCDHW transposed).
    N, D, H, W = 2, 4, 8, 8
    inplanes, planes = 128, 32
    expansion = 4

    def bn_params(k, c):
        k1, k2, k3, k4 = jax.random.split(k, 4)
        gamma = 1.0 + 0.1 * jax.random.normal(k1, (c,), jnp.float32)
        beta = 0.1 * jax.random.normal(k2, (c,), jnp.float32)
        mean = 0.05 * jax.random.normal(k3, (c,), jnp.float32)
        var = 0.5 + jax.random.uniform(k4, (c,), jnp.float32)
        return (gamma, beta, mean, var)

    params = {
        "w1": 0.1 * jax.random.normal(ks[0], (inplanes, planes), jnp.float32),
        "w2": 0.1 * jax.random.normal(ks[1], (3, 3, 3, planes, planes), jnp.float32),
        "w3": 0.1 * jax.random.normal(ks[2], (planes, planes * expansion), jnp.float32),
        "bn1": bn_params(ks[3], planes),
        "bn2": bn_params(ks[4], planes),
        "bn3": bn_params(ks[5], planes * expansion),
    }

    x = jax.random.normal(ks[6], (N, D, H, W, inplanes), jnp.float32)

    out = bottleneck_forward(x, params)
    out = jax.block_until_ready(out)

    ref = bottleneck_reference(x, params)
    assert out.shape == (N, D, H, W, planes * expansion)
    # bf16 MXU path -> relaxed tolerance (scaled to the output magnitude).
    err = float(jnp.max(jnp.abs(out - ref)))
    scale = float(jnp.max(jnp.abs(ref))) + 1e-6
    assert err <= 0.06 * scale, (err, scale)

    print("KERNEL_OK")
</pallas_src>

<mosaic_0001>
module attributes {stable_mosaic.version = 11 : i64} {
  func.func @_bottleneck_kernel(%arg0: i32, %arg1: i32, %arg2: memref<1x1x8x8x128xf32, #tpu.memory_space<vmem>>, %arg3: memref<1x1x8x8x128xf32, #tpu.memory_space<vmem>>, %arg4: memref<128x128xbf16, #tpu.memory_space<vmem>>, %arg5: memref<3x3x3x128x128xbf16, #tpu.memory_space<vmem>>, %arg6: memref<128x128xbf16, #tpu.memory_space<vmem>>, %arg7: memref<1x128xf32, #tpu.memory_space<vmem>>, %arg8: memref<1x128xf32, #tpu.memory_space<vmem>>, %arg9: memref<1x128xf32, #tpu.memory_space<vmem>>, %arg10: memref<1x128xf32, #tpu.memory_space<vmem>>, %arg11: memref<1x128xf32, #tpu.memory_space<vmem>>, %arg12: memref<1x128xf32, #tpu.memory_space<vmem>>, %arg13: memref<1x1x8x8x128xf32, #tpu.memory_space<vmem>>, %arg14: memref<3x10x10x128xbf16, #tpu.memory_space<vmem>>) attributes {dimension_semantics = [#tpu.dimension_semantics<parallel>, #tpu.dimension_semantics<arbitrary>], iteration_bounds = array<i64: 2, 4>, scalar_prefetch = 0 : i64, scratch_operands = 1 : i64, tpu.core_type = #tpu.core_type<tc>, window_params = [{transform_indices = @transform_0, window_bounds = array<i64: 1, 1, 8, 8, 128>}, {transform_indices = @transform_1, window_bounds = array<i64: 1, 1, 8, 8, 128>}, {pipeline_mode = #tpu.pipeline_mode<synchronous>, transform_indices = @transform_2, window_bounds = array<i64: 128, 128>}, {pipeline_mode = #tpu.pipeline_mode<synchronous>, transform_indices = @transform_3, window_bounds = array<i64: 3, 3, 3, 128, 128>}, {pipeline_mode = #tpu.pipeline_mode<synchronous>, transform_indices = @transform_4, window_bounds = array<i64: 128, 128>}, {pipeline_mode = #tpu.pipeline_mode<synchronous>, transform_indices = @transform_5, window_bounds = array<i64: 1, 128>}, {pipeline_mode = #tpu.pipeline_mode<synchronous>, transform_indices = @transform_6, window_bounds = array<i64: 1, 128>}, {pipeline_mode = #tpu.pipeline_mode<synchronous>, transform_indices = @transform_7, window_bounds = array<i64: 1, 128>}, {pipeline_mode = #tpu.pipeline_mode<synchronous>, transform_indices = @transform_8, window_bounds = array<i64: 1, 128>}, {pipeline_mode = #tpu.pipeline_mode<synchronous>, transform_indices = @transform_9, window_bounds = array<i64: 1, 128>}, {pipeline_mode = #tpu.pipeline_mode<synchronous>, transform_indices = @transform_10, window_bounds = array<i64: 1, 128>}, {transform_indices = @transform_11, window_bounds = array<i64: 1, 1, 8, 8, 128>}]} {
    %c0_i32 = arith.constant 0 : i32
    %0 = arith.cmpi eq, %arg1, %c0_i32 : i32
    %1 = arith.extui %0 : i1 to i32
    %c0_i32_0 = arith.constant 0 : i32
    %2 = arith.cmpi ne, %1, %c0_i32_0 : i32
    scf.if %2 {
      %cst_308 = arith.constant 0.000000e+00 : bf16
      %286 = vector.broadcast %cst_308 : bf16 to vector<3x10x10x128xbf16>
      %c0_309 = arith.constant 0 : index
      %c0_310 = arith.constant 0 : index
      %c0_311 = arith.constant 0 : index
      %c0_312 = arith.constant 0 : index
      %287 = vector.load %arg14[%c0_309, %c0_310, %c0_311, %c0_312] : memref<3x10x10x128xbf16, #tpu.memory_space<vmem>>, vector<3x10x10x128xbf16>
      tpu.vector_store %arg14[%c0_309, %c0_310, %c0_311, %c0_312], %286 {strides = array<i32>} : memref<3x10x10x128xbf16, #tpu.memory_space<vmem>>, vector<3x10x10x128xbf16>,
      %c0_313 = arith.constant 0 : index
      %c0_314 = arith.constant 0 : index
      %c0_315 = arith.constant 0 : index
      %c0_316 = arith.constant 0 : index
      %c0_317 = arith.constant 0 : index
      %288 = vector.load %arg2[%c0_313, %c0_314, %c0_315, %c0_316, %c0_317] : memref<1x1x8x8x128xf32, #tpu.memory_space<vmem>>, vector<1x1x8x8x128xf32>
      %289 = vector.shape_cast %288 : vector<1x1x8x8x128xf32> to vector<64x128xf32>
      %290 = arith.truncf %289 : vector<64x128xf32> to vector<64x128xbf16>
      %c0_318 = arith.constant 0 : index
      %c0_319 = arith.constant 0 : index
      %291 = vector.load %arg4[%c0_318, %c0_319] : memref<128x128xbf16, #tpu.memory_space<vmem>>, vector<128x128xbf16>
      %cst_320 = arith.constant dense<0.000000e+00> : vector<64x128xf32>
      %292 = tpu.matmul %290, %291, %cst_320 {dimension_numbers = #tpu.dot_dimension_numbers<[1], [0], [0], [1], [0, 0, 1, 1], [], []>} : vector<64x128xbf16>, vector<128x128xbf16>, vector<64x128xf32> -> vector<64x128xf32>
      %c0_321 = arith.constant 0 : index
      %c0_322 = arith.constant 0 : index
      %293 = vector.load %arg7[%c0_321, %c0_322] : memref<1x128xf32, #tpu.memory_space<vmem>>, vector<1x128xf32>
      %294 = vector.broadcast %293 : vector<1x128xf32> to vector<64x128xf32>
      %295 = arith.mulf %292, %294 : vector<64x128xf32>
      %c0_323 = arith.constant 0 : index
      %c0_324 = arith.constant 0 : index
      %296 = vector.load %arg8[%c0_323, %c0_324] : memref<1x128xf32, #tpu.memory_space<vmem>>, vector<1x128xf32>
      %297 = vector.broadcast %296 : vector<1x128xf32> to vector<64x128xf32>
      %298 = arith.addf %295, %297 : vector<64x128xf32>
      %cst_325 = arith.constant 0.000000e+00 : f32
      %299 = vector.broadcast %cst_325 : f32 to vector<64x128xf32>
      %300 = arith.maximumf %298, %299 : vector<64x128xf32>
      %cst_326 = arith.constant 1.000000e+00 : f32
      %301 = vector.broadcast %cst_326 : f32 to vector<64x128xf32>
      %302 = arith.mulf %300, %301 : vector<64x128xf32>
      %303 = vector.shape_cast %302 : vector<64x128xf32> to vector<1x8x8x128xf32>
      %304 = arith.truncf %303 : vector<1x8x8x128xf32> to vector<1x8x8x128xbf16>
      %c0_327 = arith.constant 0 : index
      %c1_328 = arith.constant 1 : index
      %c1_329 = arith.constant 1 : index
      %c0_330 = arith.constant 0 : index
      %305 = vector.load %arg14[%c0_327, %c1_328, %c1_329, %c0_330] : memref<3x10x10x128xbf16, #tpu.memory_space<vmem>>, vector<1x8x8x128xbf16>
      tpu.vector_store %arg14[%c0_327, %c1_328, %c1_329, %c0_330], %304 {strides = array<i32>} : memref<3x10x10x128xbf16, #tpu.memory_space<vmem>>, vector<1x8x8x128xbf16>,
    } else {
    }
    %c1_i32 = arith.constant 1 : i32
    %3 = arith.addi %arg1, %c1_i32 : i32
    %c3_i32 = arith.constant 3 : i32
    %c0_i32_1 = arith.constant 0 : i32
    %4 = arith.cmpi eq, %c3_i32, %c0_i32_1 : i32
    %c1_i32_2 = arith.constant 1 : i32
    %5 = arith.select %4, %c1_i32_2, %c3_i32 : i32
    %6 = arith.remsi %3, %5 : i32
    %c0_i32_3 = arith.constant 0 : i32
    %7 = arith.cmpi ne, %6, %c0_i32_3 : i32
    %c0_i32_4 = arith.constant 0 : i32
    %8 = arith.cmpi slt, %6, %c0_i32_4 : i32
    %c0_i32_5 = arith.constant 0 : i32
    %9 = arith.cmpi slt, %5, %c0_i32_5 : i32
    %10 = arith.xori %8, %9 : i1
    %11 = arith.andi %10, %7 : i1
    %12 = arith.addi %6, %5 : i32
    %13 = arith.select %11, %12, %6 : i32
    %c4_i32 = arith.constant 4 : i32
    %14 = arith.cmpi slt, %3, %c4_i32 : i32
    %15 = arith.extui %14 : i1 to i32
    %16 = arith.sitofp %15 : i32 to f32
    %c0 = arith.constant 0 : index
    %c0_6 = arith.constant 0 : index
    %c0_7 = arith.constant 0 : index
    %c0_8 = arith.constant 0 : index
    %c0_9 = arith.constant 0 : index
    %17 = vector.load %arg3[%c0, %c0_6, %c0_7, %c0_8, %c0_9] : memref<1x1x8x8x128xf32, #tpu.memory_space<vmem>>, vector<1x1x8x8x128xf32>
    %18 = vector.shape_cast %17 : vector<1x1x8x8x128xf32> to vector<64x128xf32>
    %19 = arith.truncf %18 : vector<64x128xf32> to vector<64x128xbf16>
    %c0_10 = arith.constant 0 : index
    %c0_11 = arith.constant 0 : index
    %20 = vector.load %arg4[%c0_10, %c0_11] : memref<128x128xbf16, #tpu.memory_space<vmem>>, vector<128x128xbf16>
    %cst = arith.constant dense<0.000000e+00> : vector<64x128xf32>
    %21 = tpu.matmul %19, %20, %cst {dimension_numbers = #tpu.dot_dimension_numbers<[1], [0], [0], [1], [0, 0, 1, 1], [], []>} : vector<64x128xbf16>, vector<128x128xbf16>, vector<64x128xf32> -> vector<64x128xf32>
    %c0_12 = arith.constant 0 : index
    %c0_13 = arith.constant 0 : index
    %22 = vector.load %arg7[%c0_12, %c0_13] : memref<1x128xf32, #tpu.memory_space<vmem>>, vector<1x128xf32>
    %23 = vector.broadcast %22 : vector<1x128xf32> to vector<64x128xf32>
    %24 = arith.mulf %21, %23 : vector<64x128xf32>
    %c0_14 = arith.constant 0 : index
    %c0_15 = arith.constant 0 : index
    %25 = vector.load %arg8[%c0_14, %c0_15] : memref<1x128xf32, #tpu.memory_space<vmem>>, vector<1x128xf32>
    %26 = vector.broadcast %25 : vector<1x128xf32> to vector<64x128xf32>
    %27 = arith.addf %24, %26 : vector<64x128xf32>
    %cst_16 = arith.constant 0.000000e+00 : f32
    %28 = vector.broadcast %cst_16 : f32 to vector<64x128xf32>
    %29 = arith.maximumf %27, %28 : vector<64x128xf32>
    %30 = vector.broadcast %16 : f32 to vector<64x128xf32>
    %31 = arith.mulf %29, %30 : vector<64x128xf32>
    %32 = vector.shape_cast %31 : vector<64x128xf32> to vector<1x8x8x128xf32>
    %33 = arith.truncf %32 : vector<1x8x8x128xf32> to vector<1x8x8x128xbf16>
    %34 = arith.index_cast %13 : i32 to index
    %c1 = arith.constant 1 : index
    %c1_17 = arith.constant 1 : index
    %c0_18 = arith.constant 0 : index
    %35 = vector.load %arg14[%34, %c1, %c1_17, %c0_18] : memref<3x10x10x128xbf16, #tpu.memory_space<vmem>>, vector<1x8x8x128xbf16>
    tpu.vector_store %arg14[%34, %c1, %c1_17, %c0_18], %33 {strides = array<i32>} : memref<3x10x10x128xbf16, #tpu.memory_space<vmem>>, vector<1x8x8x128xbf16>,
    %cst_19 = arith.constant 0.000000e+00 : f32
    %36 = vector.broadcast %cst_19 : f32 to vector<64x128xf32>
    %c0_i32_20 = arith.constant 0 : i32
    %37 = arith.addi %arg1, %c0_i32_20 : i32
    %c2_i32 = arith.constant 2 : i32
    %38 = arith.addi %37, %c2_i32 : i32
    %c3_i32_21 = arith.constant 3 : i32
    %c0_i32_22 = arith.constant 0 : i32
    %39 = arith.cmpi eq, %c3_i32_21, %c0_i32_22 : i32
    %c1_i32_23 = arith.constant 1 : i32
    %40 = arith.select %39, %c1_i32_23, %c3_i32_21 : i32
    %41 = arith.remsi %38, %40 : i32
    %c0_i32_24 = arith.constant 0 : i32
    %42 = arith.cmpi ne, %41, %c0_i32_24 : i32
    %c0_i32_25 = arith.constant 0 : i32
    %43 = arith.cmpi slt, %41, %c0_i32_25 : i32
    %c0_i32_26 = arith.constant 0 : i32
    %44 = arith.cmpi slt, %40, %c0_i32_26 : i32
    %45 = arith.xori %43, %44 : i1
    %46 = arith.andi %45, %42 : i1
    %47 = arith.addi %41, %40 : i32
    %48 = arith.select %46, %47, %41 : i32
    %49 = arith.index_cast %48 : i32 to index
    %c0_27 = arith.constant 0 : index
    %c0_28 = arith.constant 0 : index
    %c0_29 = arith.constant 0 : index
    %50 = vector.load %arg14[%49, %c0_27, %c0_28, %c0_29] : memref<3x10x10x128xbf16, #tpu.memory_space<vmem>>, vector<1x8x8x128xbf16>
    %51 = vector.shape_cast %50 : vector<1x8x8x128xbf16> to vector<64x128xbf16>
    %c0_30 = arith.constant 0 : index
    %c0_31 = arith.constant 0 : index
    %c0_32 = arith.constant 0 : index
    %c0_33 = arith.constant 0 : index
    %c0_34 = arith.constant 0 : index
    %52 = vector.load %arg5[%c0_30, %c0_31, %c0_32, %c0_33, %c0_34] : memref<3x3x3x128x128xbf16, #tpu.memory_space<vmem>>, vector<1x1x1x128x128xbf16>
    %53 = vector.shape_cast %52 : vector<1x1x1x128x128xbf16> to vector<128x128xbf16>
    %cst_35 = arith.constant dense<0.000000e+00> : vector<64x128xf32>
    %54 = tpu.matmul %51, %53, %cst_35 {dimension_numbers = #tpu.dot_dimension_numbers<[1], [0], [0], [1], [0, 0, 1, 1], [], []>} : vector<64x128xbf16>, vector<128x128xbf16>, vector<64x128xf32> -> vector<64x128xf32>
    %55 = arith.addf %36, %54 : vector<64x128xf32>
    %56 = arith.index_cast %48 : i32 to index
    %c0_36 = arith.constant 0 : index
    %c1_37 = arith.constant 1 : index
    %c0_38 = arith.constant 0 : index
    %57 = vector.load %arg14[%56, %c0_36, %c1_37, %c0_38] : memref<3x10x10x128xbf16, #tpu.memory_space<vmem>>, vector<1x8x8x128xbf16>
    %58 = vector.shape_cast %57 : vector<1x8x8x128xbf16> to vector<64x128xbf16>
    %c0_39 = arith.constant 0 : index
    %c0_40 = arith.constant 0 : index
    %c1_41 = arith.constant 1 : index
    %c0_42 = arith.constant 0 : index
    %c0_43 = arith.constant 0 : index
    %59 = vector.load %arg5[%c0_39, %c0_40, %c1_41, %c0_42, %c0_43] : memref<3x3x3x128x128xbf16, #tpu.memory_space<vmem>>, vector<1x1x1x128x128xbf16>
    %60 = vector.shape_cast %59 : vector<1x1x1x128x128xbf16> to vector<128x128xbf16>
    %cst_44 = arith.constant dense<0.000000e+00> : vector<64x128xf32>
    %61 = tpu.matmul %58, %60, %cst_44 {dimension_numbers = #tpu.dot_dimension_numbers<[1], [0], [0], [1], [0, 0, 1, 1], [], []>} : vector<64x128xbf16>, vector<128x128xbf16>, vector<64x128xf32> -> vector<64x128xf32>
    %62 = arith.addf %55, %61 : vector<64x128xf32>
    %63 = arith.index_cast %48 : i32 to index
    %c0_45 = arith.constant 0 : index
    %c2 = arith.constant 2 : index
    %c0_46 = arith.constant 0 : index
    %64 = vector.load %arg14[%63, %c0_45, %c2, %c0_46] : memref<3x10x10x128xbf16, #tpu.memory_space<vmem>>, vector<1x8x8x128xbf16>
    %65 = vector.shape_cast %64 : vector<1x8x8x128xbf16> to vector<64x128xbf16>
    %c0_47 = arith.constant 0 : index
    %c0_48 = arith.constant 0 : index
    %c2_49 = arith.constant 2 : index
    %c0_50 = arith.constant 0 : index
    %c0_51 = arith.constant 0 : index
    %66 = vector.load %arg5[%c0_47, %c0_48, %c2_49, %c0_50, %c0_51] : memref<3x3x3x128x128xbf16, #tpu.memory_space<vmem>>, vector<1x1x1x128x128xbf16>
    %67 = vector.shape_cast %66 : vector<1x1x1x128x128xbf16> to vector<128x128xbf16>
    %cst_52 = arith.constant dense<0.000000e+00> : vector<64x128xf32>
    %68 = tpu.matmul %65, %67, %cst_52 {dimension_numbers = #tpu.dot_dimension_numbers<[1], [0], [0], [1], [0, 0, 1, 1], [], []>} : vector<64x128xbf16>, vector<128x128xbf16>, vector<64x128xf32> -> vector<64x128xf32>
    %69 = arith.addf %62, %68 : vector<64x128xf32>
    %70 = arith.index_cast %48 : i32 to index
    %c1_53 = arith.constant 1 : index
    %c0_54 = arith.constant 0 : index
    %c0_55 = arith.constant 0 : index
    %71 = vector.load %arg14[%70, %c1_53, %c0_54, %c0_55] : memref<3x10x10x128xbf16, #tpu.memory_space<vmem>>, vector<1x8x8x128xbf16>
    %72 = vector.shape_cast %71 : vector<1x8x8x128xbf16> to vector<64x128xbf16>
    %c0_56 = arith.constant 0 : index
    %c1_57 = arith.constant 1 : index
    %c0_58 = arith.constant 0 : index
    %c0_59 = arith.constant 0 : index
    %c0_60 = arith.constant 0 : index
    %73 = vector.load %arg5[%c0_56, %c1_57, %c0_58, %c0_59, %c0_60] : memref<3x3x3x128x128xbf16, #tpu.memory_space<vmem>>, vector<1x1x1x128x128xbf16>
    %74 = vector.shape_cast %73 : vector<1x1x1x128x128xbf16> to vector<128x128xbf16>
    %cst_61 = arith.constant dense<0.000000e+00> : vector<64x128xf32>
    %75 = tpu.matmul %72, %74, %cst_61 {dimension_numbers = #tpu.dot_dimension_numbers<[1], [0], [0], [1], [0, 0, 1, 1], [], []>} : vector<64x128xbf16>, vector<128x128xbf16>, vector<64x128xf32> -> vector<64x128xf32>
    %76 = arith.addf %69, %75 : vector<64x128xf32>
    %77 = arith.index_cast %48 : i32 to index
    %c1_62 = arith.constant 1 : index
    %c1_63 = arith.constant 1 : index
    %c0_64 = arith.constant 0 : index
    %78 = vector.load %arg14[%77, %c1_62, %c1_63, %c0_64] : memref<3x10x10x128xbf16, #tpu.memory_space<vmem>>, vector<1x8x8x128xbf16>
    %79 = vector.shape_cast %78 : vector<1x8x8x128xbf16> to vector<64x128xbf16>
    %c0_65 = arith.constant 0 : index
    %c1_66 = arith.constant 1 : index
    %c1_67 = arith.constant 1 : index
    %c0_68 = arith.constant 0 : index
    %c0_69 = arith.constant 0 : index
    %80 = vector.load %arg5[%c0_65, %c1_66, %c1_67, %c0_68, %c0_69] : memref<3x3x3x128x128xbf16, #tpu.memory_space<vmem>>, vector<1x1x1x128x128xbf16>
    %81 = vector.shape_cast %80 : vector<1x1x1x128x128xbf16> to vector<128x128xbf16>
    %cst_70 = arith.constant dense<0.000000e+00> : vector<64x128xf32>
    %82 = tpu.matmul %79, %81, %cst_70 {dimension_numbers = #tpu.dot_dimension_numbers<[1], [0], [0], [1], [0, 0, 1, 1], [], []>} : vector<64x128xbf16>, vector<128x128xbf16>, vector<64x128xf32> -> vector<64x128xf32>
    %83 = arith.addf %76, %82 : vector<64x128xf32>
    %84 = arith.index_cast %48 : i32 to index
    %c1_71 = arith.constant 1 : index
    %c2_72 = arith.constant 2 : index
    %c0_73 = arith.constant 0 : index
    %85 = vector.load %arg14[%84, %c1_71, %c2_72, %c0_73] : memref<3x10x10x128xbf16, #tpu.memory_space<vmem>>, vector<1x8x8x128xbf16>
    %86 = vector.shape_cast %85 : vector<1x8x8x128xbf16> to vector<64x128xbf16>
    %c0_74 = arith.constant 0 : index
    %c1_75 = arith.constant 1 : index
    %c2_76 = arith.constant 2 : index
    %c0_77 = arith.constant 0 : index
    %c0_78 = arith.constant 0 : index
    %87 = vector.load %arg5[%c0_74, %c1_75, %c2_76, %c0_77, %c0_78] : memref<3x3x3x128x128xbf16, #tpu.memory_space<vmem>>, vector<1x1x1x128x128xbf16>
    %88 = vector.shape_cast %87 : vector<1x1x1x128x128xbf16> to vector<128x128xbf16>
    %cst_79 = arith.constant dense<0.000000e+00> : vector<64x128xf32>
    %89 = tpu.matmul %86, %88, %cst_79 {dimension_numbers = #tpu.dot_dimension_numbers<[1], [0], [0], [1], [0, 0, 1, 1], [], []>} : vector<64x128xbf16>, vector<128x128xbf16>, vector<64x128xf32> -> vector<64x128xf32>
    %90 = arith.addf %83, %89 : vector<64x128xf32>
    %91 = arith.index_cast %48 : i32 to index
    %c2_80 = arith.constant 2 : index
    %c0_81 = arith.constant 0 : index
    %c0_82 = arith.constant 0 : index
    %92 = vector.load %arg14[%91, %c2_80, %c0_81, %c0_82] : memref<3x10x10x128xbf16, #tpu.memory_space<vmem>>, vector<1x8x8x128xbf16>
    %93 = vector.shape_cast %92 : vector<1x8x8x128xbf16> to vector<64x128xbf16>
    %c0_83 = arith.constant 0 : index
    %c2_84 = arith.constant 2 : index
    %c0_85 = arith.constant 0 : index
    %c0_86 = arith.constant 0 : index
    %c0_87 = arith.constant 0 : index
    %94 = vector.load %arg5[%c0_83, %c2_84, %c0_85, %c0_86, %c0_87] : memref<3x3x3x128x128xbf16, #tpu.memory_space<vmem>>, vector<1x1x1x128x128xbf16>
    %95 = vector.shape_cast %94 : vector<1x1x1x128x128xbf16> to vector<128x128xbf16>
    %cst_88 = arith.constant dense<0.000000e+00> : vector<64x128xf32>
    %96 = tpu.matmul %93, %95, %cst_88 {dimension_numbers = #tpu.dot_dimension_numbers<[1], [0], [0], [1], [0, 0, 1, 1], [], []>} : vector<64x128xbf16>, vector<128x128xbf16>, vector<64x128xf32> -> vector<64x128xf32>
    %97 = arith.addf %90, %96 : vector<64x128xf32>
    %98 = arith.index_cast %48 : i32 to index
    %c2_89 = arith.constant 2 : index
    %c1_90 = arith.constant 1 : index
    %c0_91 = arith.constant 0 : index
    %99 = vector.load %arg14[%98, %c2_89, %c1_90, %c0_91] : memref<3x10x10x128xbf16, #tpu.memory_space<vmem>>, vector<1x8x8x128xbf16>
    %100 = vector.shape_cast %99 : vector<1x8x8x128xbf16> to vector<64x128xbf16>
    %c0_92 = arith.constant 0 : index
    %c2_93 = arith.constant 2 : index
    %c1_94 = arith.constant 1 : index
    %c0_95 = arith.constant 0 : index
    %c0_96 = arith.constant 0 : index
    %101 = vector.load %arg5[%c0_92, %c2_93, %c1_94, %c0_95, %c0_96] : memref<3x3x3x128x128xbf16, #tpu.memory_space<vmem>>, vector<1x1x1x128x128xbf16>
    %102 = vector.shape_cast %101 : vector<1x1x1x128x128xbf16> to vector<128x128xbf16>
    %cst_97 = arith.constant dense<0.000000e+00> : vector<64x128xf32>
    %103 = tpu.matmul %100, %102, %cst_97 {dimension_numbers = #tpu.dot_dimension_numbers<[1], [0], [0], [1], [0, 0, 1, 1], [], []>} : vector<64x128xbf16>, vector<128x128xbf16>, vector<64x128xf32> -> vector<64x128xf32>
    %104 = arith.addf %97, %103 : vector<64x128xf32>
    %105 = arith.index_cast %48 : i32 to index
    %c2_98 = arith.constant 2 : index
    %c2_99 = arith.constant 2 : index
    %c0_100 = arith.constant 0 : index
    %106 = vector.load %arg14[%105, %c2_98, %c2_99, %c0_100] : memref<3x10x10x128xbf16, #tpu.memory_space<vmem>>, vector<1x8x8x128xbf16>
    %107 = vector.shape_cast %106 : vector<1x8x8x128xbf16> to vector<64x128xbf16>
    %c0_101 = arith.constant 0 : index
    %c2_102 = arith.constant 2 : index
    %c2_103 = arith.constant 2 : index
    %c0_104 = arith.constant 0 : index
    %c0_105 = arith.constant 0 : index
    %108 = vector.load %arg5[%c0_101, %c2_102, %c2_103, %c0_104, %c0_105] : memref<3x3x3x128x128xbf16, #tpu.memory_space<vmem>>, vector<1x1x1x128x128xbf16>
    %109 = vector.shape_cast %108 : vector<1x1x1x128x128xbf16> to vector<128x128xbf16>
    %cst_106 = arith.constant dense<0.000000e+00> : vector<64x128xf32>
    %110 = tpu.matmul %107, %109, %cst_106 {dimension_numbers = #tpu.dot_dimension_numbers<[1], [0], [0], [1], [0, 0, 1, 1], [], []>} : vector<64x128xbf16>, vector<128x128xbf16>, vector<64x128xf32> -> vector<64x128xf32>
    %111 = arith.addf %104, %110 : vector<64x128xf32>
    %c1_i32_107 = arith.constant 1 : i32
    %112 = arith.addi %arg1, %c1_i32_107 : i32
    %c2_i32_108 = arith.constant 2 : i32
    %113 = arith.addi %112, %c2_i32_108 : i32
    %c3_i32_109 = arith.constant 3 : i32
    %c0_i32_110 = arith.constant 0 : i32
    %114 = arith.cmpi eq, %c3_i32_109, %c0_i32_110 : i32
    %c1_i32_111 = arith.constant 1 : i32
    %115 = arith.select %114, %c1_i32_111, %c3_i32_109 : i32
    %116 = arith.remsi %113, %115 : i32
    %c0_i32_112 = arith.constant 0 : i32
    %117 = arith.cmpi ne, %116, %c0_i32_112 : i32
    %c0_i32_113 = arith.constant 0 : i32
    %118 = arith.cmpi slt, %116, %c0_i32_113 : i32
    %c0_i32_114 = arith.constant 0 : i32
    %119 = arith.cmpi slt, %115, %c0_i32_114 : i32
    %120 = arith.xori %118, %119 : i1
    %121 = arith.andi %120, %117 : i1
    %122 = arith.addi %116, %115 : i32
    %123 = arith.select %121, %122, %116 : i32
    %124 = arith.index_cast %123 : i32 to index
    %c0_115 = arith.constant 0 : index
    %c0_116 = arith.constant 0 : index
    %c0_117 = arith.constant 0 : index
    %125 = vector.load %arg14[%124, %c0_115, %c0_116, %c0_117] : memref<3x10x10x128xbf16, #tpu.memory_space<vmem>>, vector<1x8x8x128xbf16>
    %126 = vector.shape_cast %125 : vector<1x8x8x128xbf16> to vector<64x128xbf16>
    %c1_118 = arith.constant 1 : index
    %c0_119 = arith.constant 0 : index
    %c0_120 = arith.constant 0 : index
    %c0_121 = arith.constant 0 : index
    %c0_122 = arith.constant 0 : index
    %127 = vector.load %arg5[%c1_118, %c0_119, %c0_120, %c0_121, %c0_122] : memref<3x3x3x128x128xbf16, #tpu.memory_space<vmem>>, vector<1x1x1x128x128xbf16>
    %128 = vector.shape_cast %127 : vector<1x1x1x128x128xbf16> to vector<128x128xbf16>
    %cst_123 = arith.constant dense<0.000000e+00> : vector<64x128xf32>
    %129 = tpu.matmul %126, %128, %cst_123 {dimension_numbers = #tpu.dot_dimension_numbers<[1], [0], [0], [1], [0, 0, 1, 1], [], []>} : vector<64x128xbf16>, vector<128x128xbf16>, vector<64x128xf32> -> vector<64x128xf32>
    %130 = arith.addf %111, %129 : vector<64x128xf32>
    %131 = arith.index_cast %123 : i32 to index
    %c0_124 = arith.constant 0 : index
    %c1_125 = arith.constant 1 : index
    %c0_126 = arith.constant 0 : index
    %132 = vector.load %arg14[%131, %c0_124, %c1_125, %c0_126] : memref<3x10x10x128xbf16, #tpu.memory_space<vmem>>, vector<1x8x8x128xbf16>
    %133 = vector.shape_cast %132 : vector<1x8x8x128xbf16> to vector<64x128xbf16>
    %c1_127 = arith.constant 1 : index
    %c0_128 = arith.constant 0 : index
    %c1_129 = arith.constant 1 : index
    %c0_130 = arith.constant 0 : index
    %c0_131 = arith.constant 0 : index
    %134 = vector.load %arg5[%c1_127, %c0_128, %c1_129, %c0_130, %c0_131] : memref<3x3x3x128x128xbf16, #tpu.memory_space<vmem>>, vector<1x1x1x128x128xbf16>
    %135 = vector.shape_cast %134 : vector<1x1x1x128x128xbf16> to vector<128x128xbf16>
    %cst_132 = arith.constant dense<0.000000e+00> : vector<64x128xf32>
    %136 = tpu.matmul %133, %135, %cst_132 {dimension_numbers = #tpu.dot_dimension_numbers<[1], [0], [0], [1], [0, 0, 1, 1], [], []>} : vector<64x128xbf16>, vector<128x128xbf16>, vector<64x128xf32> -> vector<64x128xf32>
    %137 = arith.addf %130, %136 : vector<64x128xf32>
    %138 = arith.index_cast %123 : i32 to index
    %c0_133 = arith.constant 0 : index
    %c2_134 = arith.constant 2 : index
    %c0_135 = arith.constant 0 : index
    %139 = vector.load %arg14[%138, %c0_133, %c2_134, %c0_135] : memref<3x10x10x128xbf16, #tpu.memory_space<vmem>>, vector<1x8x8x128xbf16>
    %140 = vector.shape_cast %139 : vector<1x8x8x128xbf16> to vector<64x128xbf16>
    %c1_136 = arith.constant 1 : index
    %c0_137 = arith.constant 0 : index
    %c2_138 = arith.constant 2 : index
    %c0_139 = arith.constant 0 : index
    %c0_140 = arith.constant 0 : index
    %141 = vector.load %arg5[%c1_136, %c0_137, %c2_138, %c0_139, %c0_140] : memref<3x3x3x128x128xbf16, #tpu.memory_space<vmem>>, vector<1x1x1x128x128xbf16>
    %142 = vector.shape_cast %141 : vector<1x1x1x128x128xbf16> to vector<128x128xbf16>
    %cst_141 = arith.constant dense<0.000000e+00> : vector<64x128xf32>
    %143 = tpu.matmul %140, %142, %cst_141 {dimension_numbers = #tpu.dot_dimension_numbers<[1], [0], [0], [1], [0, 0, 1, 1], [], []>} : vector<64x128xbf16>, vector<128x128xbf16>, vector<64x128xf32> -> vector<64x128xf32>
    %144 = arith.addf %137, %143 : vector<64x128xf32>
    %145 = arith.index_cast %123 : i32 to index
    %c1_142 = arith.constant 1 : index
    %c0_143 = arith.constant 0 : index
    %c0_144 = arith.constant 0 : index
    %146 = vector.load %arg14[%145, %c1_142, %c0_143, %c0_144] : memref<3x10x10x128xbf16, #tpu.memory_space<vmem>>, vector<1x8x8x128xbf16>
    %147 = vector.shape_cast %146 : vector<1x8x8x128xbf16> to vector<64x128xbf16>
    %c1_145 = arith.constant 1 : index
    %c1_146 = arith.constant 1 : index
    %c0_147 = arith.constant 0 : index
    %c0_148 = arith.constant 0 : index
    %c0_149 = arith.constant 0 : index
    %148 = vector.load %arg5[%c1_145, %c1_146, %c0_147, %c0_148, %c0_149] : memref<3x3x3x128x128xbf16, #tpu.memory_space<vmem>>, vector<1x1x1x128x128xbf16>
    %149 = vector.shape_cast %148 : vector<1x1x1x128x128xbf16> to vector<128x128xbf16>
    %cst_150 = arith.constant dense<0.000000e+00> : vector<64x128xf32>
    %150 = tpu.matmul %147, %149, %cst_150 {dimension_numbers = #tpu.dot_dimension_numbers<[1], [0], [0], [1], [0, 0, 1, 1], [], []>} : vector<64x128xbf16>, vector<128x128xbf16>, vector<64x128xf32> -> vector<64x128xf32>
    %151 = arith.addf %144, %150 : vector<64x128xf32>
    %152 = arith.index_cast %123 : i32 to index
    %c1_151 = arith.constant 1 : index
    %c1_152 = arith.constant 1 : index
    %c0_153 = arith.constant 0 : index
    %153 = vector.load %arg14[%152, %c1_151, %c1_152, %c0_153] : memref<3x10x10x128xbf16, #tpu.memory_space<vmem>>, vector<1x8x8x128xbf16>
    %154 = vector.shape_cast %153 : vector<1x8x8x128xbf16> to vector<64x128xbf16>
    %c1_154 = arith.constant 1 : index
    %c1_155 = arith.constant 1 : index
    %c1_156 = arith.constant 1 : index
    %c0_157 = arith.constant 0 : index
    %c0_158 = arith.constant 0 : index
    %155 = vector.load %arg5[%c1_154, %c1_155, %c1_156, %c0_157, %c0_158] : memref<3x3x3x128x128xbf16, #tpu.memory_space<vmem>>, vector<1x1x1x128x128xbf16>
    %156 = vector.shape_cast %155 : vector<1x1x1x128x128xbf16> to vector<128x128xbf16>
    %cst_159 = arith.constant dense<0.000000e+00> : vector<64x128xf32>
    %157 = tpu.matmul %154, %156, %cst_159 {dimension_numbers = #tpu.dot_dimension_numbers<[1], [0], [0], [1], [0, 0, 1, 1], [], []>} : vector<64x128xbf16>, vector<128x128xbf16>, vector<64x128xf32> -> vector<64x128xf32>
    %158 = arith.addf %151, %157 : vector<64x128xf32>
    %159 = arith.index_cast %123 : i32 to index
    %c1_160 = arith.constant 1 : index
    %c2_161 = arith.constant 2 : index
    %c0_162 = arith.constant 0 : index
    %160 = vector.load %arg14[%159, %c1_160, %c2_161, %c0_162] : memref<3x10x10x128xbf16, #tpu.memory_space<vmem>>, vector<1x8x8x128xbf16>
    %161 = vector.shape_cast %160 : vector<1x8x8x128xbf16> to vector<64x128xbf16>
    %c1_163 = arith.constant 1 : index
    %c1_164 = arith.constant 1 : index
    %c2_165 = arith.constant 2 : index
    %c0_166 = arith.constant 0 : index
    %c0_167 = arith.constant 0 : index
    %162 = vector.load %arg5[%c1_163, %c1_164, %c2_165, %c0_166, %c0_167] : memref<3x3x3x128x128xbf16, #tpu.memory_space<vmem>>, vector<1x1x1x128x128xbf16>
    %163 = vector.shape_cast %162 : vector<1x1x1x128x128xbf16> to vector<128x128xbf16>
    %cst_168 = arith.constant dense<0.000000e+00> : vector<64x128xf32>
    %164 = tpu.matmul %161, %163, %cst_168 {dimension_numbers = #tpu.dot_dimension_numbers<[1], [0], [0], [1], [0, 0, 1, 1], [], []>} : vector<64x128xbf16>, vector<128x128xbf16>, vector<64x128xf32> -> vector<64x128xf32>
    %165 = arith.addf %158, %164 : vector<64x128xf32>
    %166 = arith.index_cast %123 : i32 to index
    %c2_169 = arith.constant 2 : index
    %c0_170 = arith.constant 0 : index
    %c0_171 = arith.constant 0 : index
    %167 = vector.load %arg14[%166, %c2_169, %c0_170, %c0_171] : memref<3x10x10x128xbf16, #tpu.memory_space<vmem>>, vector<1x8x8x128xbf16>
    %168 = vector.shape_cast %167 : vector<1x8x8x128xbf16> to vector<64x128xbf16>
    %c1_172 = arith.constant 1 : index
    %c2_173 = arith.constant 2 : index
    %c0_174 = arith.constant 0 : index
    %c0_175 = arith.constant 0 : index
    %c0_176 = arith.constant 0 : index
    %169 = vector.load %arg5[%c1_172, %c2_173, %c0_174, %c0_175, %c0_176] : memref<3x3x3x128x128xbf16, #tpu.memory_space<vmem>>, vector<1x1x1x128x128xbf16>
    %170 = vector.shape_cast %169 : vector<1x1x1x128x128xbf16> to vector<128x128xbf16>
    %cst_177 = arith.constant dense<0.000000e+00> : vector<64x128xf32>
    %171 = tpu.matmul %168, %170, %cst_177 {dimension_numbers = #tpu.dot_dimension_numbers<[1], [0], [0], [1], [0, 0, 1, 1], [], []>} : vector<64x128xbf16>, vector<128x128xbf16>, vector<64x128xf32> -> vector<64x128xf32>
    %172 = arith.addf %165, %171 : vector<64x128xf32>
    %173 = arith.index_cast %123 : i32 to index
    %c2_178 = arith.constant 2 : index
    %c1_179 = arith.constant 1 : index
    %c0_180 = arith.constant 0 : index
    %174 = vector.load %arg14[%173, %c2_178, %c1_179, %c0_180] : memref<3x10x10x128xbf16, #tpu.memory_space<vmem>>, vector<1x8x8x128xbf16>
    %175 = vector.shape_cast %174 : vector<1x8x8x128xbf16> to vector<64x128xbf16>
    %c1_181 = arith.constant 1 : index
    %c2_182 = arith.constant 2 : index
    %c1_183 = arith.constant 1 : index
    %c0_184 = arith.constant 0 : index
    %c0_185 = arith.constant 0 : index
    %176 = vector.load %arg5[%c1_181, %c2_182, %c1_183, %c0_184, %c0_185] : memref<3x3x3x128x128xbf16, #tpu.memory_space<vmem>>, vector<1x1x1x128x128xbf16>
    %177 = vector.shape_cast %176 : vector<1x1x1x128x128xbf16> to vector<128x128xbf16>
    %cst_186 = arith.constant dense<0.000000e+00> : vector<64x128xf32>
    %178 = tpu.matmul %175, %177, %cst_186 {dimension_numbers = #tpu.dot_dimension_numbers<[1], [0], [0], [1], [0, 0, 1, 1], [], []>} : vector<64x128xbf16>, vector<128x128xbf16>, vector<64x128xf32> -> vector<64x128xf32>
    %179 = arith.addf %172, %178 : vector<64x128xf32>
    %180 = arith.index_cast %123 : i32 to index
    %c2_187 = arith.constant 2 : index
    %c2_188 = arith.constant 2 : index
    %c0_189 = arith.constant 0 : index
    %181 = vector.load %arg14[%180, %c2_187, %c2_188, %c0_189] : memref<3x10x10x128xbf16, #tpu.memory_space<vmem>>, vector<1x8x8x128xbf16>
    %182 = vector.shape_cast %181 : vector<1x8x8x128xbf16> to vector<64x128xbf16>
    %c1_190 = arith.constant 1 : index
    %c2_191 = arith.constant 2 : index
    %c2_192 = arith.constant 2 : index
    %c0_193 = arith.constant 0 : index
    %c0_194 = arith.constant 0 : index
    %183 = vector.load %arg5[%c1_190, %c2_191, %c2_192, %c0_193, %c0_194] : memref<3x3x3x128x128xbf16, #tpu.memory_space<vmem>>, vector<1x1x1x128x128xbf16>
    %184 = vector.shape_cast %183 : vector<1x1x1x128x128xbf16> to vector<128x128xbf16>
    %cst_195 = arith.constant dense<0.000000e+00> : vector<64x128xf32>
    %185 = tpu.matmul %182, %184, %cst_195 {dimension_numbers = #tpu.dot_dimension_numbers<[1], [0], [0], [1], [0, 0, 1, 1], [], []>} : vector<64x128xbf16>, vector<128x128xbf16>, vector<64x128xf32> -> vector<64x128xf32>
    %186 = arith.addf %179, %185 : vector<64x128xf32>
    %c2_i32_196 = arith.constant 2 : i32
    %187 = arith.addi %arg1, %c2_i32_196 : i32
    %c2_i32_197 = arith.constant 2 : i32
    %188 = arith.addi %187, %c2_i32_197 : i32
    %c3_i32_198 = arith.constant 3 : i32
    %c0_i32_199 = arith.constant 0 : i32
    %189 = arith.cmpi eq, %c3_i32_198, %c0_i32_199 : i32
    %c1_i32_200 = arith.constant 1 : i32
    %190 = arith.select %189, %c1_i32_200, %c3_i32_198 : i32
    %191 = arith.remsi %188, %190 : i32
    %c0_i32_201 = arith.constant 0 : i32
    %192 = arith.cmpi ne, %191, %c0_i32_201 : i32
    %c0_i32_202 = arith.constant 0 : i32
    %193 = arith.cmpi slt, %191, %c0_i32_202 : i32
    %c0_i32_203 = arith.constant 0 : i32
    %194 = arith.cmpi slt, %190, %c0_i32_203 : i32
    %195 = arith.xori %193, %194 : i1
    %196 = arith.andi %195, %192 : i1
    %197 = arith.addi %191, %190 : i32
    %198 = arith.select %196, %197, %191 : i32
    %199 = arith.index_cast %198 : i32 to index
    %c0_204 = arith.constant 0 : index
    %c0_205 = arith.constant 0 : index
    %c0_206 = arith.constant 0 : index
    %200 = vector.load %arg14[%199, %c0_204, %c0_205, %c0_206] : memref<3x10x10x128xbf16, #tpu.memory_space<vmem>>, vector<1x8x8x128xbf16>
    %201 = vector.shape_cast %200 : vector<1x8x8x128xbf16> to vector<64x128xbf16>
    %c2_207 = arith.constant 2 : index
    %c0_208 = arith.constant 0 : index
    %c0_209 = arith.constant 0 : index
    %c0_210 = arith.constant 0 : index
    %c0_211 = arith.constant 0 : index
    %202 = vector.load %arg5[%c2_207, %c0_208, %c0_209, %c0_210, %c0_211] : memref<3x3x3x128x128xbf16, #tpu.memory_space<vmem>>, vector<1x1x1x128x128xbf16>
    %203 = vector.shape_cast %202 : vector<1x1x1x128x128xbf16> to vector<128x128xbf16>
    %cst_212 = arith.constant dense<0.000000e+00> : vector<64x128xf32>
    %204 = tpu.matmul %201, %203, %cst_212 {dimension_numbers = #tpu.dot_dimension_numbers<[1], [0], [0], [1], [0, 0, 1, 1], [], []>} : vector<64x128xbf16>, vector<128x128xbf16>, vector<64x128xf32> -> vector<64x128xf32>
    %205 = arith.addf %186, %204 : vector<64x128xf32>
    %206 = arith.index_cast %198 : i32 to index
    %c0_213 = arith.constant 0 : index
    %c1_214 = arith.constant 1 : index
    %c0_215 = arith.constant 0 : index
    %207 = vector.load %arg14[%206, %c0_213, %c1_214, %c0_215] : memref<3x10x10x128xbf16, #tpu.memory_space<vmem>>, vector<1x8x8x128xbf16>
    %208 = vector.shape_cast %207 : vector<1x8x8x128xbf16> to vector<64x128xbf16>
    %c2_216 = arith.constant 2 : index
    %c0_217 = arith.constant 0 : index
    %c1_218 = arith.constant 1 : index
    %c0_219 = arith.constant 0 : index
    %c0_220 = arith.constant 0 : index
    %209 = vector.load %arg5[%c2_216, %c0_217, %c1_218, %c0_219, %c0_220] : memref<3x3x3x128x128xbf16, #tpu.memory_space<vmem>>, vector<1x1x1x128x128xbf16>
    %210 = vector.shape_cast %209 : vector<1x1x1x128x128xbf16> to vector<128x128xbf16>
    %cst_221 = arith.constant dense<0.000000e+00> : vector<64x128xf32>
    %211 = tpu.matmul %208, %210, %cst_221 {dimension_numbers = #tpu.dot_dimension_numbers<[1], [0], [0], [1], [0, 0, 1, 1], [], []>} : vector<64x128xbf16>, vector<128x128xbf16>, vector<64x128xf32> -> vector<64x128xf32>
    %212 = arith.addf %205, %211 : vector<64x128xf32>
    %213 = arith.index_cast %198 : i32 to index
    %c0_222 = arith.constant 0 : index
    %c2_223 = arith.constant 2 : index
    %c0_224 = arith.constant 0 : index
    %214 = vector.load %arg14[%213, %c0_222, %c2_223, %c0_224] : memref<3x10x10x128xbf16, #tpu.memory_space<vmem>>, vector<1x8x8x128xbf16>
    %215 = vector.shape_cast %214 : vector<1x8x8x128xbf16> to vector<64x128xbf16>
    %c2_225 = arith.constant 2 : index
    %c0_226 = arith.constant 0 : index
    %c2_227 = arith.constant 2 : index
    %c0_228 = arith.constant 0 : index
    %c0_229 = arith.constant 0 : index
    %216 = vector.load %arg5[%c2_225, %c0_226, %c2_227, %c0_228, %c0_229] : memref<3x3x3x128x128xbf16, #tpu.memory_space<vmem>>, vector<1x1x1x128x128xbf16>
    %217 = vector.shape_cast %216 : vector<1x1x1x128x128xbf16> to vector<128x128xbf16>
    %cst_230 = arith.constant dense<0.000000e+00> : vector<64x128xf32>
    %218 = tpu.matmul %215, %217, %cst_230 {dimension_numbers = #tpu.dot_dimension_numbers<[1], [0], [0], [1], [0, 0, 1, 1], [], []>} : vector<64x128xbf16>, vector<128x128xbf16>, vector<64x128xf32> -> vector<64x128xf32>
    %219 = arith.addf %212, %218 : vector<64x128xf32>
    %220 = arith.index_cast %198 : i32 to index
    %c1_231 = arith.constant 1 : index
    %c0_232 = arith.constant 0 : index
    %c0_233 = arith.constant 0 : index
    %221 = vector.load %arg14[%220, %c1_231, %c0_232, %c0_233] : memref<3x10x10x128xbf16, #tpu.memory_space<vmem>>, vector<1x8x8x128xbf16>
    %222 = vector.shape_cast %221 : vector<1x8x8x128xbf16> to vector<64x128xbf16>
    %c2_234 = arith.constant 2 : index
    %c1_235 = arith.constant 1 : index
    %c0_236 = arith.constant 0 : index
    %c0_237 = arith.constant 0 : index
    %c0_238 = arith.constant 0 : index
    %223 = vector.load %arg5[%c2_234, %c1_235, %c0_236, %c0_237, %c0_238] : memref<3x3x3x128x128xbf16, #tpu.memory_space<vmem>>, vector<1x1x1x128x128xbf16>
    %224 = vector.shape_cast %223 : vector<1x1x1x128x128xbf16> to vector<128x128xbf16>
    %cst_239 = arith.constant dense<0.000000e+00> : vector<64x128xf32>
    %225 = tpu.matmul %222, %224, %cst_239 {dimension_numbers = #tpu.dot_dimension_numbers<[1], [0], [0], [1], [0, 0, 1, 1], [], []>} : vector<64x128xbf16>, vector<128x128xbf16>, vector<64x128xf32> -> vector<64x128xf32>
    %226 = arith.addf %219, %225 : vector<64x128xf32>
    %227 = arith.index_cast %198 : i32 to index
    %c1_240 = arith.constant 1 : index
    %c1_241 = arith.constant 1 : index
    %c0_242 = arith.constant 0 : index
    %228 = vector.load %arg14[%227, %c1_240, %c1_241, %c0_242] : memref<3x10x10x128xbf16, #tpu.memory_space<vmem>>, vector<1x8x8x128xbf16>
    %229 = vector.shape_cast %228 : vector<1x8x8x128xbf16> to vector<64x128xbf16>
    %c2_243 = arith.constant 2 : index
    %c1_244 = arith.constant 1 : index
    %c1_245 = arith.constant 1 : index
    %c0_246 = arith.constant 0 : index
    %c0_247 = arith.constant 0 : index
    %230 = vector.load %arg5[%c2_243, %c1_244, %c1_245, %c0_246, %c0_247] : memref<3x3x3x128x128xbf16, #tpu.memory_space<vmem>>, vector<1x1x1x128x128xbf16>
    %231 = vector.shape_cast %230 : vector<1x1x1x128x128xbf16> to vector<128x128xbf16>
    %cst_248 = arith.constant dense<0.000000e+00> : vector<64x128xf32>
    %232 = tpu.matmul %229, %231, %cst_248 {dimension_numbers = #tpu.dot_dimension_numbers<[1], [0], [0], [1], [0, 0, 1, 1], [], []>} : vector<64x128xbf16>, vector<128x128xbf16>, vector<64x128xf32> -> vector<64x128xf32>
    %233 = arith.addf %226, %232 : vector<64x128xf32>
    %234 = arith.index_cast %198 : i32 to index
    %c1_249 = arith.constant 1 : index
    %c2_250 = arith.constant 2 : index
    %c0_251 = arith.constant 0 : index
    %235 = vector.load %arg14[%234, %c1_249, %c2_250, %c0_251] : memref<3x10x10x128xbf16, #tpu.memory_space<vmem>>, vector<1x8x8x128xbf16>
    %236 = vector.shape_cast %235 : vector<1x8x8x128xbf16> to vector<64x128xbf16>
    %c2_252 = arith.constant 2 : index
    %c1_253 = arith.constant 1 : index
    %c2_254 = arith.constant 2 : index
    %c0_255 = arith.constant 0 : index
    %c0_256 = arith.constant 0 : index
    %237 = vector.load %arg5[%c2_252, %c1_253, %c2_254, %c0_255, %c0_256] : memref<3x3x3x128x128xbf16, #tpu.memory_space<vmem>>, vector<1x1x1x128x128xbf16>
    %238 = vector.shape_cast %237 : vector<1x1x1x128x128xbf16> to vector<128x128xbf16>
    %cst_257 = arith.constant dense<0.000000e+00> : vector<64x128xf32>
    %239 = tpu.matmul %236, %238, %cst_257 {dimension_numbers = #tpu.dot_dimension_numbers<[1], [0], [0], [1], [0, 0, 1, 1], [], []>} : vector<64x128xbf16>, vector<128x128xbf16>, vector<64x128xf32> -> vector<64x128xf32>
    %240 = arith.addf %233, %239 : vector<64x128xf32>
    %241 = arith.index_cast %198 : i32 to index
    %c2_258 = arith.constant 2 : index
    %c0_259 = arith.constant 0 : index
    %c0_260 = arith.constant 0 : index
    %242 = vector.load %arg14[%241, %c2_258, %c0_259, %c0_260] : memref<3x10x10x128xbf16, #tpu.memory_space<vmem>>, vector<1x8x8x128xbf16>
    %243 = vector.shape_cast %242 : vector<1x8x8x128xbf16> to vector<64x128xbf16>
    %c2_261 = arith.constant 2 : index
    %c2_262 = arith.constant 2 : index
    %c0_263 = arith.constant 0 : index
    %c0_264 = arith.constant 0 : index
    %c0_265 = arith.constant 0 : index
    %244 = vector.load %arg5[%c2_261, %c2_262, %c0_263, %c0_264, %c0_265] : memref<3x3x3x128x128xbf16, #tpu.memory_space<vmem>>, vector<1x1x1x128x128xbf16>
    %245 = vector.shape_cast %244 : vector<1x1x1x128x128xbf16> to vector<128x128xbf16>
    %cst_266 = arith.constant dense<0.000000e+00> : vector<64x128xf32>
    %246 = tpu.matmul %243, %245, %cst_266 {dimension_numbers = #tpu.dot_dimension_numbers<[1], [0], [0], [1], [0, 0, 1, 1], [], []>} : vector<64x128xbf16>, vector<128x128xbf16>, vector<64x128xf32> -> vector<64x128xf32>
    %247 = arith.addf %240, %246 : vector<64x128xf32>
    %248 = arith.index_cast %198 : i32 to index
    %c2_267 = arith.constant 2 : index
    %c1_268 = arith.constant 1 : index
    %c0_269 = arith.constant 0 : index
    %249 = vector.load %arg14[%248, %c2_267, %c1_268, %c0_269] : memref<3x10x10x128xbf16, #tpu.memory_space<vmem>>, vector<1x8x8x128xbf16>
    %250 = vector.shape_cast %249 : vector<1x8x8x128xbf16> to vector<64x128xbf16>
    %c2_270 = arith.constant 2 : index
    %c2_271 = arith.constant 2 : index
    %c1_272 = arith.constant 1 : index
    %c0_273 = arith.constant 0 : index
    %c0_274 = arith.constant 0 : index
    %251 = vector.load %arg5[%c2_270, %c2_271, %c1_272, %c0_273, %c0_274] : memref<3x3x3x128x128xbf16, #tpu.memory_space<vmem>>, vector<1x1x1x128x128xbf16>
    %252 = vector.shape_cast %251 : vector<1x1x1x128x128xbf16> to vector<128x128xbf16>
    %cst_275 = arith.constant dense<0.000000e+00> : vector<64x128xf32>
    %253 = tpu.matmul %250, %252, %cst_275 {dimension_numbers = #tpu.dot_dimension_numbers<[1], [0], [0], [1], [0, 0, 1, 1], [], []>} : vector<64x128xbf16>, vector<128x128xbf16>, vector<64x128xf32> -> vector<64x128xf32>
    %254 = arith.addf %247, %253 : vector<64x128xf32>
    %255 = arith.index_cast %198 : i32 to index
    %c2_276 = arith.constant 2 : index
    %c2_277 = arith.constant 2 : index
    %c0_278 = arith.constant 0 : index
    %256 = vector.load %arg14[%255, %c2_276, %c2_277, %c0_278] : memref<3x10x10x128xbf16, #tpu.memory_space<vmem>>, vector<1x8x8x128xbf16>
    %257 = vector.shape_cast %256 : vector<1x8x8x128xbf16> to vector<64x128xbf16>
    %c2_279 = arith.constant 2 : index
    %c2_280 = arith.constant 2 : index
    %c2_281 = arith.constant 2 : index
    %c0_282 = arith.constant 0 : index
    %c0_283 = arith.constant 0 : index
    %258 = vector.load %arg5[%c2_279, %c2_280, %c2_281, %c0_282, %c0_283] : memref<3x3x3x128x128xbf16, #tpu.memory_space<vmem>>, vector<1x1x1x128x128xbf16>
    %259 = vector.shape_cast %258 : vector<1x1x1x128x128xbf16> to vector<128x128xbf16>
    %cst_284 = arith.constant dense<0.000000e+00> : vector<64x128xf32>
    %260 = tpu.matmul %257, %259, %cst_284 {dimension_numbers = #tpu.dot_dimension_numbers<[1], [0], [0], [1], [0, 0, 1, 1], [], []>} : vector<64x128xbf16>, vector<128x128xbf16>, vector<64x128xf32> -> vector<64x128xf32>
    %261 = arith.addf %254, %260 : vector<64x128xf32>
    %c0_285 = arith.constant 0 : index
    %c0_286 = arith.constant 0 : index
    %262 = vector.load %arg9[%c0_285, %c0_286] : memref<1x128xf32, #tpu.memory_space<vmem>>, vector<1x128xf32>
    %263 = vector.broadcast %262 : vector<1x128xf32> to vector<64x128xf32>
    %264 = arith.mulf %261, %263 : vector<64x128xf32>
    %c0_287 = arith.constant 0 : index
    %c0_288 = arith.constant 0 : index
    %265 = vector.load %arg10[%c0_287, %c0_288] : memref<1x128xf32, #tpu.memory_space<vmem>>, vector<1x128xf32>
    %266 = vector.broadcast %265 : vector<1x128xf32> to vector<64x128xf32>
    %267 = arith.addf %264, %266 : vector<64x128xf32>
    %cst_289 = arith.constant 0.000000e+00 : f32
    %268 = vector.broadcast %cst_289 : f32 to vector<64x128xf32>
    %269 = arith.maximumf %267, %268 : vector<64x128xf32>
    %270 = arith.truncf %269 : vector<64x128xf32> to vector<64x128xbf16>
    %c0_290 = arith.constant 0 : index
    %c0_291 = arith.constant 0 : index
    %271 = vector.load %arg6[%c0_290, %c0_291] : memref<128x128xbf16, #tpu.memory_space<vmem>>, vector<128x128xbf16>
    %cst_292 = arith.constant dense<0.000000e+00> : vector<64x128xf32>
    %272 = tpu.matmul %270, %271, %cst_292 {dimension_numbers = #tpu.dot_dimension_numbers<[1], [0], [0], [1], [0, 0, 1, 1], [], []>} : vector<64x128xbf16>, vector<128x128xbf16>, vector<64x128xf32> -> vector<64x128xf32>
    %c0_293 = arith.constant 0 : index
    %c0_294 = arith.constant 0 : index
    %c0_295 = arith.constant 0 : index
    %c0_296 = arith.constant 0 : index
    %c0_297 = arith.constant 0 : index
    %273 = vector.load %arg2[%c0_293, %c0_294, %c0_295, %c0_296, %c0_297] : memref<1x1x8x8x128xf32, #tpu.memory_space<vmem>>, vector<1x1x8x8x128xf32>
    %274 = vector.shape_cast %273 : vector<1x1x8x8x128xf32> to vector<64x128xf32>
    %c0_298 = arith.constant 0 : index
    %c0_299 = arith.constant 0 : index
    %275 = vector.load %arg11[%c0_298, %c0_299] : memref<1x128xf32, #tpu.memory_space<vmem>>, vector<1x128xf32>
    %276 = vector.broadcast %275 : vector<1x128xf32> to vector<64x128xf32>
    %277 = arith.mulf %272, %276 : vector<64x128xf32>
    %c0_300 = arith.constant 0 : index
    %c0_301 = arith.constant 0 : index
    %278 = vector.load %arg12[%c0_300, %c0_301] : memref<1x128xf32, #tpu.memory_space<vmem>>, vector<1x128xf32>
    %279 = vector.broadcast %278 : vector<1x128xf32> to vector<64x128xf32>
    %280 = arith.addf %277, %279 : vector<64x128xf32>
    %281 = arith.addf %280, %274 : vector<64x128xf32>
    %cst_302 = arith.constant 0.000000e+00 : f32
    %282 = vector.broadcast %cst_302 : f32 to vector<64x128xf32>
    %283 = arith.maximumf %281, %282 : vector<64x128xf32>
    %284 = vector.shape_cast %283 : vector<64x128xf32> to vector<1x1x8x8x128xf32>
    %c0_303 = arith.constant 0 : index
    %c0_304 = arith.constant 0 : index
    %c0_305 = arith.constant 0 : index
    %c0_306 = arith.constant 0 : index
    %c0_307 = arith.constant 0 : index
    %285 = vector.load %arg13[%c0_303, %c0_304, %c0_305, %c0_306, %c0_307] : memref<1x1x8x8x128xf32, #tpu.memory_space<vmem>>, vector<1x1x8x8x128xf32>
    tpu.vector_store %arg13[%c0_303, %c0_304, %c0_305, %c0_306, %c0_307], %284 {strides = array<i32>} : memref<1x1x8x8x128xf32, #tpu.memory_space<vmem>>, vector<1x1x8x8x128xf32>,
    return
  }
  func.func @transform_0(%arg0: i32, %arg1: i32) -> (i32, i32, i32, i32, i32) {
    %c0_i32 = arith.constant 0 : i32
    %c0_i32_0 = arith.constant 0 : i32
    %c0_i32_1 = arith.constant 0 : i32
    %c0_i32_2 = arith.constant 0 : i32
    return %arg0, %arg1, %c0_i32, %c0_i32_0, %c0_i32_1 : i32, i32, i32, i32, i32
  }
  func.func @transform_1(%arg0: i32, %arg1: i32) -> (i32, i32, i32, i32, i32) {
    %c1_i32 = arith.constant 1 : i32
    %0 = arith.addi %arg1, %c1_i32 : i32
    %c3_i32 = arith.constant 3 : i32
    %1 = arith.minsi %0, %c3_i32 : i32
    %c0_i32 = arith.constant 0 : i32
    %c0_i32_0 = arith.constant 0 : i32
    %c0_i32_1 = arith.constant 0 : i32
    %c0_i32_2 = arith.constant 0 : i32
    return %arg0, %1, %c0_i32, %c0_i32_0, %c0_i32_1 : i32, i32, i32, i32, i32
  }
  func.func @transform_2(%arg0: i32, %arg1: i32) -> (i32, i32) {
    %c0_i32 = arith.constant 0 : i32
    %c0_i32_0 = arith.constant 0 : i32
    %c0_i32_1 = arith.constant 0 : i32
    return %c0_i32, %c0_i32_0 : i32, i32
  }
  func.func @transform_3(%arg0: i32, %arg1: i32) -> (i32, i32, i32, i32, i32) {
    %c0_i32 = arith.constant 0 : i32
    %c0_i32_0 = arith.constant 0 : i32
    %c0_i32_1 = arith.constant 0 : i32
    %c0_i32_2 = arith.constant 0 : i32
    %c0_i32_3 = arith.constant 0 : i32
    %c0_i32_4 = arith.constant 0 : i32
    return %c0_i32, %c0_i32_0, %c0_i32_1, %c0_i32_2, %c0_i32_3 : i32, i32, i32, i32, i32
  }
  func.func @transform_4(%arg0: i32, %arg1: i32) -> (i32, i32) {
    %c0_i32 = arith.constant 0 : i32
    %c0_i32_0 = arith.constant 0 : i32
    %c0_i32_1 = arith.constant 0 : i32
    return %c0_i32, %c0_i32_0 : i32, i32
  }
  func.func @transform_5(%arg0: i32, %arg1: i32) -> (i32, i32) {
    %c0_i32 = arith.constant 0 : i32
    %c0_i32_0 = arith.constant 0 : i32
    %c0_i32_1 = arith.constant 0 : i32
    return %c0_i32, %c0_i32_0 : i32, i32
  }
  func.func @transform_6(%arg0: i32, %arg1: i32) -> (i32, i32) {
    %c0_i32 = arith.constant 0 : i32
    %c0_i32_0 = arith.constant 0 : i32
    %c0_i32_1 = arith.constant 0 : i32
    return %c0_i32, %c0_i32_0 : i32, i32
  }
  func.func @transform_7(%arg0: i32, %arg1: i32) -> (i32, i32) {
    %c0_i32 = arith.constant 0 : i32
    %c0_i32_0 = arith.constant 0 : i32
    %c0_i32_1 = arith.constant 0 : i32
    return %c0_i32, %c0_i32_0 : i32, i32
  }
  func.func @transform_8(%arg0: i32, %arg1: i32) -> (i32, i32) {
    %c0_i32 = arith.constant 0 : i32
    %c0_i32_0 = arith.constant 0 : i32
    %c0_i32_1 = arith.constant 0 : i32
    return %c0_i32, %c0_i32_0 : i32, i32
  }
  func.func @transform_9(%arg0: i32, %arg1: i32) -> (i32, i32) {
    %c0_i32 = arith.constant 0 : i32
    %c0_i32_0 = arith.constant 0 : i32
    %c0_i32_1 = arith.constant 0 : i32
    return %c0_i32, %c0_i32_0 : i32, i32
  }
  func.func @transform_10(%arg0: i32, %arg1: i32) -> (i32, i32) {
    %c0_i32 = arith.constant 0 : i32
    %c0_i32_0 = arith.constant 0 : i32
    %c0_i32_1 = arith.constant 0 : i32
    return %c0_i32, %c0_i32_0 : i32, i32
  }
  func.func @transform_11(%arg0: i32, %arg1: i32) -> (i32, i32, i32, i32, i32) {
    %c0_i32 = arith.constant 0 : i32
    %c0_i32_0 = arith.constant 0 : i32
    %c0_i32_1 = arith.constant 0 : i32
    %c0_i32_2 = arith.constant 0 : i32
    return %arg0, %arg1, %c0_i32, %c0_i32_0, %c0_i32_1 : i32, i32, i32, i32, i32
  }
}

</mosaic_0001>

<bundles_post_ra>
// kernel: tpu_custom_call.1
= control target key start
LH: loop header
LB: loop body
LE: loop exit
PB: predicated region body
PF: predicated region fallthrough
CT: control target
= control target key end

     0   :  { %s12236_s0 = inlined_call_operand.hbm [shape: f32[2,4,8,8,128], index: 0, kind: input, shape index: {}]   ;;  %s12237_s1 = inlined_call_operand.hbm [shape: f32[2,4,8,8,128], index: 1, kind: input, shape index: {}]   ;;  %s12238_s2 = inlined_call_operand.hbm [shape: bf16[128,128], index: 2, kind: input, shape index: {}]   ;;  %s12239_s3 = inlined_call_operand.hbm [shape: bf16[3,3,3,128,128], index: 3, kind: input, shape index: {}]   ;;  %s12240_s4 = inlined_call_operand.hbm [shape: bf16[128,128], index: 4, kind: input, shape index: {}]   ;;  %s12241_s5 = inlined_call_operand.vmem [shape: f32[1,128], index: 5, kind: input, shape index: {}]   ;;  %s12242_s6 = inlined_call_operand.vmem [shape: f32[1,128], index: 6, kind: input, shape index: {}]   ;;  %s12243_s7 = inlined_call_operand.vmem [shape: f32[1,128], index: 7, kind: input, shape index: {}]   ;;  %s12244_s8 = inlined_call_operand.vmem [shape: f32[1,128], index: 8, kind: input, shape index: {}]   ;;  %s12245_s9 = inlined_call_operand.vmem [shape: f32[1,128], index: 9, kind: input, shape index: {}]   ;;  %s12246_s10 = inlined_call_operand.vmem [shape: f32[1,128], index: 10, kind: input, shape index: {}]   ;;  %s12247_s11 = inlined_call_operand.hbm [shape: f32[2,4,8,8,128], index: 11, kind: output, shape index: {}]  }
   0x1   :  { %12261 = sst [smem:[#allocation24_spill]] %s12236_s0 }
   0x2   :  { %12262 = sst [smem:[#allocation25_spill]] %s12238_s2 }
   0x3   :  { %12263 = sst [smem:[#allocation26_spill]] %s12239_s3 }
   0x4   :  { %12264 = sst [smem:[#allocation27_spill]] %s12240_s4 }
   0x5   :  { %12265 = sst [smem:[#allocation28_spill]] %s12241_s5 }
   0x6   :  { %12266 = sst [smem:[#allocation29_spill]] %s12242_s6 }
   0x7   :  { %12267 = sst [smem:[#allocation30_spill]] %s12243_s7 }
   0x8   :  { %12268 = sst [smem:[#allocation31_spill]] %s12244_s8 }
   0x9   :  { %12269 = sst [smem:[#allocation32_spill]] %s12245_s9 }
   0xa   :  { %12270 = sst [smem:[#allocation33_spill]] %s12246_s10 }
   0xb   :  { %12271 = sst [smem:[#allocation34_spill]] %s12247_s11 }
   0xc   :  { %16 = vsyncpa [#allocation4], 0 }
   0xd   :  { %18 = vsyncpa [#allocation4 + $0x1], 0 }
   0xe   :  { %19 = vsyncpa [#allocation7], 0 }
   0xf   :  { %21 = vsyncpa [#allocation7 + $0x1], 0 }
  0x10   :  { %22 = vsyncpa [#allocation10], 0 }
  0x11   :  { %23 = vsyncpa [#allocation5], 0 }
  0x12   :  { %25 = vsyncpa [#allocation5 + $0x1], 0  ;;  %s10568_s17 = smov 0   ;;  %s10570_s18 = smov 0  }
  0x13   :  { %s10572_s19 = smov 0   ;;  %s10574_s20 = smov 0  }
  0x14   :  { %s10576_s21 = smov 0   ;;  %s10578_s22 = smov 0  }
  0x15   :  { %s10580_s23 = smov 0   ;;  %s10582_s24 = smov 0  }
  0x16   :  { %s10584_s25 = smov 0   ;;  %s10586_s26 = smov 0  }
  0x17   :  { %s10588_s27 = smov 0  }
  0x18 LB: > { %12272 = sst [smem:[#allocation18_spill]] %s10465_s20  ;;  %s10622_s28 = sadd.s32 4294967295, %s10493_s27   ;;  %s10493_s27 = sphi %s10588_s27, %s31_s27   ;;  %s10489_s26 = sphi %s10586_s26, %s12342_s26   ;;  %s10485_s25 = sphi %s10584_s25, %s12341_s25   ;;  %s10481_s24 = sphi %s10582_s24, %s12340_s24   ;;  %s10477_s23 = sphi %s10580_s23, %s12339_s23   ;;  %s10473_s22 = sphi %s10578_s22, %s12338_s22   ;;  %s10469_s21 = sphi %s10576_s21, %s12337_s21   ;;  %s10465_s20 = sphi %s10574_s20, %s12336_s20   ;;  %s10461_s19 = sphi %s10572_s19, %s12335_s19   ;;  %s10457_s18 = sphi %s10570_s18, %s12334_s18   ;;  %s10453_s17 = sphi %s10568_s17, %s12333_s17  }
  0x19   : > { %12273 = sst [smem:[#allocation19_spill]] %s10477_s23  ;;  %s7744_s29 = sadd.s32 4294967294, %s10493_s27  }
  0x1a   : > { %12274 = sst [smem:[#allocation20_spill]] %s10481_s24  ;;  %p65_p0 = scmp.ne.s32.totalorder %s10469_s21, %s10465_s20 }
  0x1b   : > { %p12251_p1 = scmp.eq.s32.totalorder %s10622_s28, 0  ;;  %p99_p2 = scmp.ne.s32.totalorder %s10457_s18, %s10453_s17 }
  0x1c   : > { %p320_p5 = scmp.eq.s32.totalorder %s7744_s29, 7  ;;  %p7745_p7 = scmp.ge.s32.totalorder %s10493_s27, 1 }
  0x1d   : > { %p10632_p4 = por %p12251_p1, %p65_p0  ;;  %p10638_p6 = por %p99_p2, %p12251_p1 }
  0x1e   : > { %p10643_p8 = por %p320_p5, %p65_p0  ;;  %p327_p9 = scmp.lt.s32.totalorder %s10493_s27, 9 }
  0x1f   : > { %s12275_s30 = scalar_select %p10632_p4, 1, 0 }
  0x20   : > { %s12276_s12 = scalar_select %p10638_p6, 1, 0 }
  0x21   : > { %s12278_s13 = scalar_select %p10643_p8, 1, 0 }
  0x22   : > { %12277 = sst [smem:[#allocation21_spill]] %s12276_s12  ;;  %p10648_p10 = pnand %p7745_p7, %p327_p9 }
  0x23   : > { %12279 = sst [smem:[#allocation22_spill]] %s12278_s13  ;;  %s10495_s15 = smov [#allocation8]  }
  0x24   : > { %s12280_s14 = scalar_select %p10648_p10, 1, 0 }
  0x25   : > { %s339_s16 = sshll.u32 %s10495_s15, 4  ;;  %p9803_p11 = pneg %p10648_p10  ;;  %s10652_s16 = int_to_ptr.vmem [resolvable:$true] %s339_s16 }
  0x26   : > { %s10496_s29 = smov [#allocation9]   ;;  %s10497_s20 = smov [#allocation11]  }
  0x27   : > { %p10658_p12 = pnand %p9803_p11, %p12251_p1  ;;  %s352_s13 = sshll.u32 %s10496_s29, 4  ;;  %s10662_s13 = int_to_ptr.vmem [resolvable:$true] %s352_s13 }
  0x28   : > { %s10664_s11 = sshll.u32 %s10497_s20, 4  ;;  %s12282_s2 = sld [smem:[#allocation25_spill]]  ;;  %s366_s11 = int_to_ptr.vmem [resolvable:$true] %s10664_s11 }
  0x29   : > { %p10674_p0 = pneg %p10658_p12 }
  0x2e   : > { %s10215_s15 = scalar_lea.hbm %s12282_s2, 1024 }
  0x2f   : > { %p10216_p13 = scmp.ne.s32.totalorder %s12282_s2, %s10215_s15  ;;  %p10222_p7 = scmp.lt.u32.totalorder %s10215_s15, %s12282_s2 }
  0x31   : > { %p10218_p2 = pnand %p10674_p0, %p10216_p13 }
  0x33   : > { %p10219_p5 = pneg %p10218_p2 }
  0x35   : > { %p10224_p9 = pnand %p10222_p7, %p10219_p5 }
  0x37   : > { %10227 = shalt.err (!%p10224_p9)
}
  0x38   : > { %s10228_s8 = scalar_lea.vmem %s10652_s16, 1024  ;;  %p10236_p8 = scmp.lt.s32.totalorder %s10652_s16, %s10652_s16 }
  0x39   : > { %p10229_p11 = scmp.ne.s32.totalorder %s10652_s16, %s10228_s8  ;;  %p10237_p6 = scmp.lt.s32.totalorder %s10228_s8, %s10228_s8 }
  0x3b   : > { %p10231_p1 = pnand %p10229_p11, %p10674_p0  ;;  %p10238_p13 = por %p10237_p6, %p10236_p8 }
  0x3d   : > { %p10232_p3 = pneg %p10231_p1 }
  0x3f   : > { %p10239_p2 = pnand %p10238_p13, %p10232_p3 }
  0x41   : > { %10242 = shalt.err (!%p10239_p2)
}
  0x42   : > { %s10498_s9 = smov 64   ;;  %s10499_s10 = smov 4  }
  0x43   : > { %9806 = dma.hbm_to_vmem [thread:$0]  (!%p10658_p12), %s12282_s2, 1024, %s10652_s16, [#allocation7], %s10498_s9, %s10498_s9, %s10499_s10  }
  0x44   : > { %s12284_s3 = sld [smem:[#allocation26_spill]] }
  0x4a   : > { %s10243_s8 = scalar_lea.hbm %s12284_s3, 27648 }
  0x4b   : > { %p10244_p1 = scmp.ne.s32.totalorder %s12284_s3, %s10243_s8  ;;  %p10250_p8 = scmp.lt.u32.totalorder %s10243_s8, %s12284_s3 }
  0x4d   : > { %p10246_p3 = pnand %p10244_p1, %p10674_p0 }
  0x4f   : > { %p10247_p6 = pneg %p10246_p3 }
  0x51   : > { %p10252_p5 = pnand %p10250_p8, %p10247_p6 }
  0x53   : > { %10255 = shalt.err (!%p10252_p5)
}
  0x54   : > { %s10256_s16 = scalar_lea.vmem %s10662_s13, 27648  ;;  %p10264_p13 = scmp.lt.s32.totalorder %s10662_s13, %s10662_s13 }
  0x55   : > { %p10257_p7 = scmp.ne.s32.totalorder %s10662_s13, %s10256_s16  ;;  %p10265_p2 = scmp.lt.s32.totalorder %s10256_s16, %s10256_s16 }
  0x57   : > { %p10259_p9 = pnand %p10257_p7, %p10674_p0  ;;  %p10266_p1 = por %p10265_p2, %p10264_p13 }
  0x59   : > { %p10260_p11 = pneg %p10259_p9 }
  0x5b   : > { %p10267_p3 = pnand %p10266_p1, %p10260_p11 }
  0x5d   : > { %10270 = shalt.err (!%p10267_p3)
}
  0x5e   : > { %9809 = dma.hbm_to_vmem [thread:$0]  (!%p10658_p12), %s12284_s3, 27648, %s10662_s13, [#allocation10], %s10498_s9, %s10498_s9, %s10499_s10  }
  0x5f   : > { %s12285_s4 = sld [smem:[#allocation27_spill]] }
  0x65   : > { %s10271_s24 = scalar_lea.hbm %s12285_s4, 1024 }
  0x66   : > { %p10272_p6 = scmp.ne.s32.totalorder %s12285_s4, %s10271_s24  ;;  %p10278_p7 = scmp.lt.u32.totalorder %s10271_s24, %s12285_s4 }
  0x68   : > { %p10274_p8 = pnand %p10272_p6, %p10674_p0 }
  0x6a   : > { %p10275_p5 = pneg %p10274_p8 }
  0x6c   : > { %p10280_p9 = pnand %p10278_p7, %p10275_p5 }
  0x6e   : > { %10283 = shalt.err (!%p10280_p9)
}
  0x6f   : > { %s10284_s16 = scalar_lea.vmem %s366_s11, 1024  ;;  %p10292_p1 = scmp.lt.s32.totalorder %s366_s11, %s366_s11 }
  0x70   : > { %p10285_p11 = scmp.ne.s32.totalorder %s366_s11, %s10284_s16  ;;  %p10293_p3 = scmp.lt.s32.totalorder %s10284_s16, %s10284_s16 }
  0x72   : > { %p10287_p13 = pnand %p10285_p11, %p10674_p0  ;;  %p10294_p4 = por %p10293_p3, %p10292_p1 }
  0x74   : > { %p10288_p2 = pneg %p10287_p13 }
  0x76   : > { %p10295_p10 = pnand %p10294_p4, %p10288_p2 }
  0x78   : > { %10298 = shalt.err (!%p10295_p10)
}
  0x79   : > { %9812 = dma.hbm_to_vmem [thread:$0]  (!%p10658_p12), %s12285_s4, 1024, %s366_s11, [#allocation10], %s10498_s9, %s10498_s9, %s10499_s10  }
  0x7a   : > { %s40_s7 = sadd.s32 1, %s10485_s25  ;;  %s43_s17 = sadd.s32 1, %s10489_s26 }
  0x7b   : > { %p41_p4 = scmp.ge.s32.totalorder %s40_s7, 4  ;;  %s52_s6 = sadd.s32 1, %s10473_s22 }
  0x7c   : > { %p59_p10 = scmp.ne.s32.totalorder %s10473_s22, %s10469_s21  ;;  %p12259_p0 = scmp.eq.s32.totalorder %s10493_s27, 0 }
  0x7d   : > { %s10751_s23 = scalar_select %p41_p4, 0, %s40_s7  }
  0x7e   : > { %s12344_s17 = smov (!%p41_p4, %s43_s17), %s10489_s26  ;;  %p76_p6 = scmp.lt.s32.totalorder %s40_s7, 3 }
  0x7f   : > { %s48_s12 = ssub.s32 %s10485_s25, %s10751_s23  ;;  %p45_p12 = scmp.ge.s32.totalorder %s12344_s17, 2 }
  0x80   : > { %p10762_p8 = por %p12259_p0, %p59_p10  ;;  %s78_s9 = sadd.s32 1, %s10751_s23 }
  0x81   : > { %s12346_s17 = smov (%p45_p12, %s12344_s17), 0  ;;  %s12348_s7 = smov (!%p76_p6, %s40_s7), 3 }
  0x82   : > { %12287 = sst [smem:[#allocation23_spill]] %s12346_s17  ;;  %s47_s10 = ssub.s32 %s10489_s26, %s12346_s17 }
  0x83   : > { %p79_p5 = scmp.lt.s32.totalorder %s78_s9, 3  ;;  %s49_s24 = sor.u32 %s48_s12, %s47_s10 }
  0x84   : > { %p12288_p7 = scmp.eq.s32.totalorder %s10622_s28, 7  ;;  %p50_p11 = scmp.eq.s32.totalorder %s49_s24, 0 }
  0x85   : > { %p12258_p13 = scmp.lt.s32.totalorder %s10493_s27, 8  ;;  %s12350_s9 = smov (!%p79_p5, %s78_s9), 3 }
  0x86   : > { %p10778_p9 = por %p12288_p7, %p59_p10  ;;  %s82_s20 = ssub.s32 %s12348_s7, %s12350_s9 }
  0x87   : > { %s10784_s29 = scalar_select %p50_p11, %s10473_s22, %s52_s6  }
  0x88   : > { %s397_s8 = sand.u32 1, %s10473_s22   ;;  %s10788_s16 = sor.u32 %s82_s20, %s47_s10 }
  0x89   : > { %s7750_s13 = sshll.u32 %s397_s8, 6  ;;  %s7751_s5 = sshll.u32 %s10485_s25, 3 }
  0x8a   : > { %s7752_s12 = sshll.u32 %s10489_s26, 5  ;;  %s401_s2 = scalar_lea.vmem [#allocation3], %s7750_s13 }
  0x8b   : > { %s410_s3 = sshll.u32 %s401_s2, 4  ;;  %s407_s4 = sadd.s32 %s7752_s12, %s7751_s5  ;;  %s10795_s3 = int_to_ptr.vmem [resolvable:$true] %s410_s3 }
  0x8c   : > { %s7753_s24 = sshll.u32 %s407_s4, 7  ;;  %p10801_p1 = pnand %p12258_p13, %p10762_p8 }
  0x8d   : > { %s12291_s0 = sld [smem:[#allocation24_spill]]  ;;  %s10810_s2 = scalar_lea.sflag [#allocation4], %s397_s8 }
  0x8e   : > { %p10301_p4 = pneg %p10801_p1 }
  0x93   : > { %s10808_s20 = scalar_lea.hbm %s12291_s0, %s7753_s24  ;;  %s10304_s5 = scalar_lea.hbm %s12291_s0, 8192 }
  0x94   : > { %s10299_s4 = scalar_lea.hbm %s10808_s20, 1024  ;;  %p10305_p6 = scmp.lt.u32.totalorder %s10808_s20, %s12291_s0 }
  0x95   : > { %p10300_p3 = scmp.ne.s32.totalorder %s10808_s20, %s10299_s4  ;;  %p10306_p8 = scmp.lt.u32.totalorder %s10304_s5, %s10299_s4 }
  0x96   : > { %p10308_p7 = scmp.lt.u32.totalorder %s10299_s4, %s10808_s20 }
  0x97   : > { %p10302_p10 = pnand %p10301_p4, %p10300_p3  ;;  %p10307_p5 = por %p10306_p8, %p10305_p6 }
  0x99   : > { %p10303_p12 = pneg %p10302_p10  ;;  %p10309_p11 = por %p10308_p7, %p10307_p5 }
  0x9b   : > { %p10310_p13 = pnand %p10309_p11, %p10303_p12 }
  0x9d   : > { %10313 = shalt.err (!%p10310_p13)
}
  0x9e   : > { %s10314_s8 = scalar_lea.vmem %s10795_s3, 1024  ;;  %s10500_s10 = smov [#allocation3]  }
  0x9f   : > { %p10315_p3 = scmp.ne.s32.totalorder %s10795_s3, %s10314_s8  ;;  %s10319_s11 = sshll.u32 %s10500_s10, 4  ;;  %s10320_s11 = int_to_ptr.vmem [resolvable:$false] %s10319_s11 }
  0xa0   : > { %s10321_s13 = scalar_lea.vmem %s10320_s11, 2048  ;;  %p10322_p2 = scmp.lt.s32.totalorder %s10795_s3, %s10320_s11 }
  0xa1   : > { %p10317_p10 = pnand %p10315_p3, %p10301_p4  ;;  %p10323_p6 = scmp.lt.s32.totalorder %s10321_s13, %s10314_s8 }
  0xa3   : > { %p10318_p0 = pneg %p10317_p10  ;;  %p10324_p8 = por %p10323_p6, %p10322_p2 }
  0xa5   : > { %p10325_p5 = pnand %p10324_p8, %p10318_p0 }
  0xa7   : > { %10328 = shalt.err (!%p10325_p5)
}
  0xa8   : > { %s10501_s4 = smov 128   ;;  %s10502_s5 = smov 8  }
  0xa9   : > { %9816 = dma.hbm_to_vmem [thread:$0]  (!%p10801_p1), %s10808_s20, 1024, %s10795_s3, %s10810_s2, %s10501_s4, %s10501_s4, %s10502_s5  }
  0xaa   : > { %s7755_s24 = sshll.u32 %s12348_s7, 3  ;;  %s86_s8 = sadd.s32 1, %s10461_s19 }
  0xab   : > { %s433_s9 = sadd.s32 %s7755_s24, %s7752_s12  ;;  %p93_p0 = scmp.ne.s32.totalorder %s10461_s19, %s10457_s18 }
  0xac   : > { %s7757_s10 = sshll.u32 %s433_s9, 7  ;;  %p12292_p13 = scmp.eq.s32.totalorder %s10788_s16, 0 }
  0xad   : > { %p12293_p2 = scmp.eq.s32.totalorder %s10493_s27, 0  ;;  %s420_s13 = sand.u32 1, %s10493_s27  }
  0xae   : > { %s10850_s11 = scalar_select %p12292_p13, %s10461_s19, %s86_s8  }
  0xaf   : > { %p95_p4 = por %p93_p0, %p12293_p2  ;;  %s10858_s6 = scalar_lea.hbm %s12237_s1, %s7757_s10 }
  0xb0   : > { %s422_s3 = sand.u32 1, %s10461_s19   ;;  %p12294_p1 = scmp.lt.s32.totalorder %s10493_s27, 8 }
  0xb1   : > { %s7754_s7 = sshll.u32 %s422_s3, 6  ;;  %s10869_s0 = scalar_lea.sflag [#allocation7], %s420_s13 }
  0xb2   : > { %p10863_p12 = pnand %p12294_p1, %p95_p4  ;;  %s424_s16 = scalar_lea.vmem [#allocation6], %s7754_s7 }
  0xb3   : > { %s436_s20 = sshll.u32 %s424_s16, 4  ;;  %s10329_s17 = scalar_lea.hbm %s10858_s6, 1024  ;;  %s10867_s20 = int_to_ptr.vmem [resolvable:$true] %s436_s20 }
  0xb4   : > { %p10330_p7 = scmp.ne.s32.totalorder %s10858_s6, %s10329_s17  ;;  %p10331_p11 = pneg %p10863_p12 }
  0xb5   : > { %s10334_s9 = scalar_lea.hbm %s12237_s1, 8192  ;;  %p10335_p6 = scmp.lt.u32.totalorder %s10858_s6, %s12237_s1 }
  0xb6   : > { %p10332_p3 = pnand %p10331_p11, %p10330_p7  ;;  %p10336_p8 = scmp.lt.u32.totalorder %s10334_s9, %s10329_s17 }
  0xb7   : > { %p10338_p0 = scmp.lt.u32.totalorder %s10329_s17, %s10858_s6 }
  0xb8   : > { %p10333_p10 = pneg %p10332_p3  ;;  %p10337_p5 = por %p10336_p8, %p10335_p6 }
  0xba   : > { %p10339_p13 = por %p10338_p0, %p10337_p5 }
  0xbc   : > { %p10340_p2 = pnand %p10339_p13, %p10333_p10 }
  0xbe   : > { %10343 = shalt.err (!%p10340_p2)
}
  0xbf   : > { %s10344_s13 = scalar_lea.vmem %s10867_s20, 1024  ;;  %s10503_s3 = smov [#allocation6]  }
  0xc0   : > { %p10345_p4 = scmp.ne.s32.totalorder %s10867_s20, %s10344_s13  ;;  %s10349_s7 = sshll.u32 %s10503_s3, 4  ;;  %s10350_s7 = int_to_ptr.vmem [resolvable:$false] %s10349_s7 }
  0xc1   : > { %s10351_s16 = scalar_lea.vmem %s10350_s7, 2048  ;;  %p10352_p3 = scmp.lt.s32.totalorder %s10867_s20, %s10350_s7 }
  0xc2   : > { %p10347_p1 = pnand %p10345_p4, %p10331_p11  ;;  %p10353_p6 = scmp.lt.s32.totalorder %s10351_s16, %s10344_s13 }
  0xc4   : > { %p10348_p7 = pneg %p10347_p1  ;;  %p10354_p8 = por %p10353_p6, %p10352_p3 }
  0xc6   : > { %p10355_p5 = pnand %p10354_p8, %p10348_p7 }
  0xc8   : > { %10358 = shalt.err (!%p10355_p5)
}
  0xc9   : > { %9819 = dma.hbm_to_vmem [thread:$0]  (!%p10863_p12), %s10858_s6, 1024, %s10867_s20, %s10869_s0, %s10501_s4, %s10501_s4, %s10502_s5  }
  0xca   : > { %p12296_p11 = scmp.ne.s32.totalorder %s12280_s14, 0 }
  0xcb   : > { %s10903_s17 = sand.u32 (!%p12296_p11), 1, %s10469_s21   ;;  %p12297_p10 = scmp.ne.s32.totalorder (!%p12296_p11), %s12275_s30, 0 }
  0xcc   : > { %448 = sbr.rel (%p12296_p11) target bundleno = 1724 (0x6bc), region = 64  ;;  %s7759_s2 = sshll.u32 (!%p12296_p11), %s10903_s17, 6 }
  0xcd   : > { %s451_s24 = scalar_lea.sflag (!%p12296_p11), [#allocation4], %s10903_s17  ;;  %s10907_s9 = scalar_lea.vmem (!%p12296_p11), [#allocation3], %s7759_s2 }
  0xd3   : > { %10432 = dma.done.wait (%p12297_p10), %s451_s24, 1024  }
  0xd4   : > { %10434 = vsyncadd (%p12297_p10), %s451_s24, 4294966272  ;;  %s12298_s4 = sld [smem:[#allocation21_spill]]  ;;  %s459_s14 = sand.u32 1, %s10622_s28  }
  0xd5   : > { %s461_s5 = sand.u32 1, %s10457_s18   ;;  %s460_s12 = scalar_lea.sflag [#allocation7], %s459_s14 }
  0xd6   : > { %s7760_s6 = sshll.u32 %s461_s5, 6 }
  0xd7   : > { %s10915_s20 = scalar_lea.vmem [#allocation6], %s7760_s6 }
  0xda   : > { %p12299_p12 = scmp.ne.s32.totalorder %s12298_s4, 0 }
  0xdc   : > { %10436 = dma.done.wait (%p12299_p12), %s460_s12, 1024  }
  0xdd   : > { %10438 = vsyncadd (%p12299_p12), %s460_s12, 4294966272  ;;  %p12300_p0 = scmp.eq.s32.totalorder %s10622_s28, 0 }
  0xdf   : > { %10440 = dma.done.wait (%p12300_p0), [#allocation7], 1024   ;;  %p12301_p13 = pmov %p12300_p0 }
  0xe0   : > { %p12302_p2 = pmov %p12300_p0 }
  0xe1   : > { %10442 = vsyncadd (%p12301_p13), [#allocation7], 4294966272 }
  0xe2   : > { %10444 = dma.done.wait (%p12302_p2), [#allocation10], 28672   ;;  %p12303_p4 = pmov %p12300_p0 }
  0xe3   : > { %s10929_s30 = scalar_lea.vmem [#allocation12], %s7759_s2  ;;  %s12304_s0 = sld [smem:[#allocation19_spill]] }
  0xe4   : > { %10446 = vsyncadd (%p12303_p4), [#allocation10], 4294938624 }
  0xe9   : > { %p7765_p1 = scmp.ne.s32.totalorder %s12304_s0, 0 }
  0xea   : > { %v10932_v0 = vld [vmem:[#allocation8] sm:$0xff] (!%p7765_p1)   ;;  %v10934_v1 = vld [vmem:[#allocation8 + $0x8] sm:$0xff] (!%p7765_p1)   ;;  %v10504_v2 = vmov (!%p7765_p1), 0   ;;  %v9933_v3 = vld [vmem:[#allocation8 + $0x10] sm:$0xff] (!%p7765_p1)   ;;  %s12305_s10 = sld [smem:[#allocation28_spill]] (!%p7765_p1)  ;;  %s12306_s7 = sld [smem:[#allocation29_spill]] (!%p7765_p1) }
  0xeb   : > { %526 = sbr.rel (%p7765_p1) target bundleno = 506 (0x1fa), region = 88  ;;  %527 = vst [vmem:[#allocation2] sm:$0xf] (!%p7765_p1), %v10504_v2  ;;  %528 = vst [vmem:[#allocation2 + $0x4] sm:$0x1] (!%p7765_p1), %v10504_v2  ;;  %8841 = vmatprep.subr.bf16.mxu0 (!%p7765_p1), %v10932_v0  ;;  %9561 = vmatprep.subr.bf16.mxu1 (!%p7765_p1), %v10932_v0  ;;  %v9934_v4 = vld [vmem:[#allocation8 + $0x18] sm:$0xff] (!%p7765_p1)  }
  0xec   : > { %533 = vst [vmem:[#allocation2 + $0x18] sm:$0xf] (!%p7765_p1), %v10504_v2  ;;  %534 = vst [vmem:[#allocation2 + $0x1c] sm:$0x1] (!%p7765_p1), %v10504_v2  ;;  %8842 = vmatpush3.bf16.msra.mxu0 (!%p7765_p1), %v10932_v0  ;;  %9569 = vmatpush3.bf16.msra.mxu1 (!%p7765_p1), %v10932_v0  ;;  %v587_v5 = vld [vmem:[%s10907_s9] sm:$0xff] (!%p7765_p1)  ;;  %v588_v6 = vld [vmem:[%s10907_s9 + $0x8] sm:$0xff] (!%p7765_p1) }
  0xed   : > { %545 = vst [vmem:[#allocation2 + $0x48] sm:$0xf] (!%p7765_p1), %v10504_v2  ;;  %546 = vst [vmem:[#allocation2 + $0x4c] sm:$0x1] (!%p7765_p1), %v10504_v2  ;;  %8843 = vmatprep.subr.bf16.mxu0 (!%p7765_p1), %v10934_v1  ;;  %9562 = vmatprep.subr.bf16.mxu1 (!%p7765_p1), %v10934_v1  ;;  %v591_v7 = vld [vmem:[%s10907_s9 + $0x20] sm:$0xff] (!%p7765_p1)  ;;  %v595_v8 = vpack.c.bf16 (!%p7765_p1), %v588_v6, %v587_v5  ;;  %v592_v9 = vld [vmem:[%s10907_s9 + $0x28] sm:$0xff] (!%p7765_p1) }
  0xee   : > { %547 = vst [vmem:[#allocation2 + $0x50] sm:$0xf] (!%p7765_p1), %v10504_v2  ;;  %548 = vst [vmem:[#allocation2 + $0x54] sm:$0x1] (!%p7765_p1), %v10504_v2  ;;  %v597_v10 = vpack.c.bf16 (!%p7765_p1), %v592_v9, %v591_v7  ;;  %v9935_v11 = vld [vmem:[#allocation8 + $0x20] sm:$0xff] (!%p7765_p1)   ;;  %v9936_v12 = vld [vmem:[#allocation8 + $0x28] sm:$0xff] (!%p7765_p1)  }
  0xef   : > { %549 = vst [vmem:[#allocation2 + $0x58] sm:$0xf] (!%p7765_p1), %v10504_v2  ;;  %550 = vst [vmem:[#allocation2 + $0x5c] sm:$0x1] (!%p7765_p1), %v10504_v2  ;;  %8857 = vmatprep.mubr.bf16.mxu0 (!%p7765_p1), %v595_v8  ;;  %v9937_v13 = vld [vmem:[#allocation8 + $0x30] sm:$0xff] (!%p7765_p1)   ;;  %v9938_v14 = vld [vmem:[#allocation8 + $0x38] sm:$0xff] (!%p7765_p1)  }
  0xf0   : > { %551 = vst [vmem:[#allocation2 + $0x60] sm:$0xf] (!%p7765_p1), %v10504_v2  ;;  %552 = vst [vmem:[#allocation2 + $0x64] sm:$0x1] (!%p7765_p1), %v10504_v2  ;;  %8844 = vmatpush3.bf16.msra.mxu0 (!%p7765_p1), %v10934_v1  ;;  %9570 = vmatpush3.bf16.msra.mxu1 (!%p7765_p1), %v10934_v1  ;;  %v589_v15 = vld [vmem:[%s10907_s9 + $0x10] sm:$0xff] (!%p7765_p1)  ;;  %v590_v16 = vld [vmem:[%s10907_s9 + $0x18] sm:$0xff] (!%p7765_p1) }
  0xf1   : > { %553 = vst [vmem:[#allocation2 + $0x68] sm:$0xf] (!%p7765_p1), %v10504_v2  ;;  %554 = vst [vmem:[#allocation2 + $0x6c] sm:$0x1] (!%p7765_p1), %v10504_v2  ;;  %8845 = vmatprep.subr.bf16.mxu0 (!%p7765_p1), %v9933_v3  ;;  %9563 = vmatprep.subr.bf16.mxu1 (!%p7765_p1), %v9933_v3  ;;  %v593_v17 = vld [vmem:[%s10907_s9 + $0x30] sm:$0xff] (!%p7765_p1)  ;;  %v594_v18 = vld [vmem:[%s10907_s9 + $0x38] sm:$0xff] (!%p7765_p1)  ;;  %v596_v19 = vpack.c.bf16 (!%p7765_p1), %v590_v16, %v589_v15 }
  0xf2   : > { %555 = vst [vmem:[#allocation2 + $0x70] sm:$0xf] %v10504_v2  ;;  %556 = vst [vmem:[#allocation2 + $0x74] sm:$0x1] %v10504_v2  ;;  %8861 = vmatprep.mubr.bf16.mxu1 %v597_v10  ;;  %v598_v20 = vpack.c.bf16 %v594_v18, %v593_v17  ;;  %v7774_v21 = vld [vmem:[%s12305_s10] ss:$0 sm:$0xff] }
  0xf3   : > { %557 = vst [vmem:[#allocation2 + $0x78] sm:$0xf] %v10504_v2  ;;  %558 = vst [vmem:[#allocation2 + $0x7c] sm:$0x1] %v10504_v2  ;;  %v7775_v23 = vld [vmem:[%s12306_s7] ss:$0 sm:$0xff] }
  0xf4   : > { %559 = vst [vmem:[#allocation2 + $0x80] sm:$0xf] %v10504_v2  ;;  %560 = vst [vmem:[#allocation2 + $0x84] sm:$0x1] %v10504_v2  ;;  %8846 = vmatpush3.bf16.msra.mxu0 %v9933_v3  ;;  %9571 = vmatpush3.bf16.msra.mxu1 %v9933_v3  ;;  %vm879_vm0 = vcmask 1043456   ;;  %vm885_vm2 = vcmask 1040384  }
  0xf5   : > { %561 = vst [vmem:[#allocation2 + $0x88] sm:$0xf] %v10504_v2  ;;  %562 = vst [vmem:[#allocation2 + $0x8c] sm:$0x1] %v10504_v2  ;;  %8847 = vmatprep.subr.bf16.mxu0 %v9934_v4  ;;  %9564 = vmatprep.subr.bf16.mxu1 %v9934_v4  ;;  %vm880_vm1 = vsmask.f32 7938 }
  0xf6   : > { %563 = vst [vmem:[#allocation2 + $0x90] sm:$0xf] %v10504_v2  ;;  %564 = vst [vmem:[#allocation2 + $0x94] sm:$0x1] %v10504_v2  ;;  %vm886_vm3 = vsmask.f32 256 }
  0xf7   : > { %565 = vst [vmem:[#allocation2 + $0x98] sm:$0xf] %v10504_v2  ;;  %566 = vst [vmem:[#allocation2 + $0x9c] sm:$0x1] %v10504_v2  ;;  %v897_v63 = vld [vmem:[#allocation2 + $0x18] sm:$0xf] }
  0xf8   : > { %567 = vst [vmem:[#allocation2 + $0xa0] sm:$0xf] %v10504_v2  ;;  %568 = vst [vmem:[#allocation2 + $0xa4] sm:$0x1] %v10504_v2  ;;  %8848 = vmatpush3.bf16.msra.mxu0 %v9934_v4  ;;  %9572 = vmatpush3.bf16.msra.mxu1 %v9934_v4  ;;  %v900_v0 = vld [vmem:[#allocation2 + $0x1c] sm:$0x1] }
  0xf9   : > { %569 = vst [vmem:[#allocation2 + $0xa8] sm:$0xf] %v10504_v2  ;;  %570 = vst [vmem:[#allocation2 + $0xac] sm:$0x1] %v10504_v2  ;;  %8849 = vmatprep.subr.bf16.mxu0 %v9935_v11  ;;  %9565 = vmatprep.subr.bf16.mxu1 %v9935_v11 }
  0xfa   : > { %571 = vst [vmem:[#allocation2 + $0xb0] sm:$0xf] %v10504_v2  ;;  %572 = vst [vmem:[#allocation2 + $0xb4] sm:$0x1] %v10504_v2 }
  0xfb   : > { %573 = vst [vmem:[#allocation2 + $0xb8] sm:$0xf] %v10504_v2  ;;  %574 = vst [vmem:[#allocation2 + $0xbc] sm:$0x1] %v10504_v2 }
  0xfc   : > { %575 = vst [vmem:[#allocation2 + $0xc0] sm:$0xf] %v10504_v2  ;;  %576 = vst [vmem:[#allocation2 + $0xc4] sm:$0x1] %v10504_v2  ;;  %8850 = vmatpush3.bf16.msra.mxu0 %v9935_v11  ;;  %9573 = vmatpush3.bf16.msra.mxu1 %v9935_v11 }
  0xfd   : > { %577 = vst [vmem:[#allocation2 + $0xc8] sm:$0xf] %v10504_v2  ;;  %578 = vst [vmem:[#allocation2 + $0xcc] sm:$0x1] %v10504_v2  ;;  %8851 = vmatprep.subr.bf16.mxu0 %v9936_v12  ;;  %9566 = vmatprep.subr.bf16.mxu1 %v9936_v12 }
  0xfe   : > { %579 = vst [vmem:[#allocation2 + $0xd0] sm:$0xf] %v10504_v2  ;;  %580 = vst [vmem:[#allocation2 + $0xd4] sm:$0x1] %v10504_v2 }
  0xff   : > { %581 = vst [vmem:[#allocation2 + $0xd8] sm:$0xf] %v10504_v2  ;;  %582 = vst [vmem:[#allocation2 + $0xdc] sm:$0x1] %v10504_v2 }
 0x100   : > { %583 = vst [vmem:[#allocation2 + $0xe0] sm:$0xf] %v10504_v2  ;;  %584 = vst [vmem:[#allocation2 + $0xe4] sm:$0x1] %v10504_v2  ;;  %8852 = vmatpush3.bf16.msra.mxu0 %v9936_v12  ;;  %9574 = vmatpush3.bf16.msra.mxu1 %v9936_v12 }
 0x101   : > { %585 = vst [vmem:[#allocation2 + $0xe8] sm:$0xf] %v10504_v2  ;;  %586 = vst [vmem:[#allocation2 + $0xec] sm:$0x1] %v10504_v2  ;;  %8853 = vmatprep.subr.bf16.mxu0 %v9937_v13  ;;  %9567 = vmatprep.subr.bf16.mxu1 %v9937_v13 }
 0x102   : > { %529 = vst [vmem:[#allocation2 + $0x8] sm:$0xf] %v10504_v2  ;;  %530 = vst [vmem:[#allocation2 + $0xc] sm:$0x1] %v10504_v2 }
 0x103   : > { %531 = vst [vmem:[#allocation2 + $0x10] sm:$0xf] %v10504_v2  ;;  %532 = vst [vmem:[#allocation2 + $0x14] sm:$0x1] %v10504_v2 }
 0x104   : > { %535 = vst [vmem:[#allocation2 + $0x20] sm:$0xf] %v10504_v2  ;;  %536 = vst [vmem:[#allocation2 + $0x24] sm:$0x1] %v10504_v2  ;;  %8854 = vmatpush3.bf16.msra.mxu0 %v9937_v13  ;;  %9575 = vmatpush3.bf16.msra.mxu1 %v9937_v13 }
 0x105   : > { %537 = vst [vmem:[#allocation2 + $0x28] sm:$0xf] %v10504_v2  ;;  %538 = vst [vmem:[#allocation2 + $0x2c] sm:$0x1] %v10504_v2  ;;  %8855 = vmatprep.subr.bf16.mxu0 %v9938_v14  ;;  %9568 = vmatprep.subr.bf16.mxu1 %v9938_v14 }
 0x106   : > { %539 = vst [vmem:[#allocation2 + $0x30] sm:$0xf] %v10504_v2  ;;  %540 = vst [vmem:[#allocation2 + $0x34] sm:$0x1] %v10504_v2 }
 0x107   : > { %541 = vst [vmem:[#allocation2 + $0x38] sm:$0xf] %v10504_v2  ;;  %542 = vst [vmem:[#allocation2 + $0x3c] sm:$0x1] %v10504_v2 }
 0x108   : > { %543 = vst [vmem:[#allocation2 + $0x40] sm:$0xf] %v10504_v2  ;;  %544 = vst [vmem:[#allocation2 + $0x44] sm:$0x1] %v10504_v2  ;;  %8856 = vmatpush3.bf16.msra.mxu0 %v9938_v14  ;;  %9576 = vmatpush3.bf16.msra.mxu1 %v9938_v14 }
 0x109   : > { %vm10960_vm4 = vmand %vm879_vm0, %vm880_vm1  ;;  %v882_v14 = vld [vmem:[#allocation2 + $0x8] sm:$0xf]  ;;  %v888_v15 = vld [vmem:[#allocation2 + $0xc] sm:$0x1] }
 0x10a   : > { %vm10966_vm5 = vmand %vm885_vm2, %vm886_vm3 }
 0x10b   : > { %8858 = vmatmul.mubr.bf16.vlgmr.msra.gmra.mrb[0].mxu0 %v596_v19  ;;  %8862 = vmatmul.mubr.bf16.vlgmr.msra.gmra.mrb[0].mxu1 %v598_v20 }
 0x10e   : > { %v921_v8 = vld [vmem:[#allocation2 + $0x38] sm:$0xf]  ;;  %v924_v9 = vld [vmem:[#allocation2 + $0x3c] sm:$0x1] }
 0x1de   : > { %v8859_v22 = vpop.f32.mrb[0].mxu0  ;;  %v8863_v24 = vpop.f32.mrb[0].mxu1 }
 0x1df   : > { %v737_v25 = vmul.f32 %v8859_v22, %v7774_v21  ;;  %v741_v26 = vmul.f32 %v8863_v24, %v7774_v21  ;;  %v697_v27 = vpop.f32.mrb[1].mxu0  ;;  %v713_v28 = vpop.f32.mrb[1].mxu1  ;;  %v912_v24 = vld [vmem:[#allocation2 + $0x2c] sm:$0x1] }
 0x1e0   : > { %v735_v29 = vmul.f32 %v7774_v21, %v697_v27  ;;  %v739_v30 = vmul.f32 %v7774_v21, %v713_v28  ;;  %v8860_v31 = vpop.f32.mrb[2].mxu0  ;;  %v8864_v32 = vpop.f32.mrb[2].mxu1 }
 0x1e1   : > { %v752_v33 = vadd.f32 %v7775_v23, %v737_v25  ;;  %v756_v34 = vadd.f32 %v7775_v23, %v741_v26  ;;  %v738_v35 = vmul.f32 %v8860_v31, %v7774_v21  ;;  %v742_v36 = vmul.f32 %v8864_v32, %v7774_v21  ;;  %v700_v37 = vpop.f32.mrb[3].mxu0  ;;  %v716_v38 = vpop.f32.mrb[3].mxu1 }
 0x1e2   : > { %v750_v39 = vadd.f32 %v7775_v23, %v735_v29  ;;  %v754_v40 = vadd.f32 %v7775_v23, %v739_v30  ;;  %v736_v41 = vmul.f32 %v7774_v21, %v700_v37  ;;  %v740_v42 = vmul.f32 %v7774_v21, %v716_v38 }
 0x1e3   : > { %v760_v43 = vmax.f32 %v752_v33, 0.0  ;;  %v764_v44 = vmax.f32 %v756_v34, 0.0  ;;  %v753_v45 = vadd.f32 %v7775_v23, %v738_v35  ;;  %v757_v46 = vadd.f32 %v7775_v23, %v742_v36 }
 0x1e4   : > { %v758_v47 = vmax.f32 %v750_v39, 0.0  ;;  %v762_v48 = vmax.f32 %v754_v40, 0.0  ;;  %v751_v49 = vadd.f32 %v7775_v23, %v736_v41  ;;  %v755_v50 = vadd.f32 %v7775_v23, %v740_v42  ;;  %v909_v23 = vld [vmem:[#allocation2 + $0x28] sm:$0xf]  ;;  %v903_v39 = vld [vmem:[#allocation2 + $0x20] sm:$0xf] }
 0x1e5   : > { %v8464_v51 = vpack.c.bf16 %v760_v43, %v760_v43  ;;  %v8468_v52 = vpack.c.bf16 %v764_v44, %v764_v44  ;;  %v761_v53 = vmax.f32 %v753_v45, 0.0  ;;  %v765_v54 = vmax.f32 %v757_v46, 0.0  ;;  %v906_v40 = vld [vmem:[#allocation2 + $0x24] sm:$0x1]  ;;  %v927_v41 = vld [vmem:[#allocation2 + $0x40] sm:$0xf] }
 0x1e6   : > { %v8462_v55 = vpack.c.bf16 %v758_v47, %v758_v47  ;;  %v8466_v56 = vpack.c.bf16 %v762_v48, %v762_v48  ;;  %v759_v57 = vmax.f32 %v751_v49, 0.0  ;;  %v763_v58 = vmax.f32 %v755_v50, 0.0  ;;  %v930_v42 = vld [vmem:[#allocation2 + $0x44] sm:$0x1]  ;;  %v891_v49 = vld [vmem:[#allocation2 + $0x10] sm:$0xf] }
 0x1e7   : > { %v815_v59 = vshrl.u32 %v8464_v51, 16  ;;  %v818_v60 = vshll.u32 %v8464_v51, 16  ;;  %v847_v61 = vshrl.u32 %v8468_v52, 16  ;;  %v850_v62 = vshll.u32 %v8468_v52, 16  ;;  %v894_v52 = vld [vmem:[#allocation2 + $0x14] sm:$0x1] }
 0x1e8   : > { %v799_v1 = vshrl.u32 %v8462_v55, 16  ;;  %v802_v2 = vshll.u32 %v8462_v55, 16  ;;  %v831_v3 = vshrl.u32 %v8466_v56, 16  ;;  %v834_v4 = vshll.u32 %v8466_v56, 16 }
 0x1e9   : > { %v817_v5 = vrot.slane %v815_v59, 7  ;;  %v849_v7 = vrot.slane %v847_v61, 7  ;;  %v8465_v10 = vpack.c.bf16 %v761_v53, %v761_v53  ;;  %v8469_v11 = vpack.c.bf16 %v765_v54, %v765_v54  ;;  %v915_v59 = vld [vmem:[#allocation2 + $0x30] sm:$0xf] }
 0x1ea   : > { %v801_v13 = vrot.slane %v799_v1, 7  ;;  %v833_v16 = vrot.slane %v831_v3, 7  ;;  %v8463_v17 = vpack.c.bf16 %v759_v57, %v759_v57  ;;  %v8467_v18 = vpack.c.bf16 %v763_v58, %v763_v58 }
 0x1eb   : > { %v820_v19 = vor.u32 %v818_v60, %v817_v5  ;;  %v821_v20 = vrot.slane %v817_v5, 4  ;;  %v852_v21 = vor.u32 %v850_v62, %v849_v7  ;;  %v853_v22 = vrot.slane %v849_v7, 4  ;;  %v918_v60 = vld [vmem:[#allocation2 + $0x34] sm:$0x1] }
 0x1ec   : > { %v804_v25 = vor.u32 %v802_v2, %v801_v13  ;;  %v805_v26 = vrot.slane %v801_v13, 4  ;;  %v836_v27 = vor.u32 %v834_v4, %v833_v16  ;;  %v837_v28 = vrot.slane %v833_v16, 4 }
 0x1ed   : > { %v898_v29 = vsel %vm10960_vm4, %v820_v19, %v897_v63  ;;  %v901_v30 = vsel %vm10966_vm5, %v821_v20, %v900_v0  ;;  %v922_v31 = vsel %vm10960_vm4, %v852_v21, %v921_v8  ;;  %v925_v32 = vsel %vm10966_vm5, %v853_v22, %v924_v9 }
 0x1ee   : > { %899 = vst [vmem:[#allocation2 + $0x18] sm:$0xf] %v898_v29  ;;  %902 = vst [vmem:[#allocation2 + $0x1c] sm:$0x1] %v901_v30  ;;  %v883_v33 = vsel %vm10960_vm4, %v804_v25, %v882_v14  ;;  %v889_v34 = vsel %vm10966_vm5, %v805_v26, %v888_v15  ;;  %v910_v35 = vsel %vm10960_vm4, %v836_v27, %v909_v23  ;;  %v823_v37 = vshrl.u32 %v8465_v10, 16 }
 0x1ef   : > { %923 = vst [vmem:[#allocation2 + $0x38] sm:$0xf] %v922_v31  ;;  %926 = vst [vmem:[#allocation2 + $0x3c] sm:$0x1] %v925_v32  ;;  %v913_v36 = vsel %vm10966_vm5, %v837_v28, %v912_v24  ;;  %v855_v38 = vshrl.u32 %v8469_v11, 16  ;;  %v807_v43 = vshrl.u32 %v8463_v17, 16 }
 0x1f0   : > { %884 = vst [vmem:[#allocation2 + $0x8] sm:$0xf] %v883_v33  ;;  %890 = vst [vmem:[#allocation2 + $0xc] sm:$0x1] %v889_v34  ;;  %v839_v44 = vshrl.u32 %v8467_v18, 16  ;;  %v825_v45 = vrot.slane %v823_v37, 7 }
 0x1f1   : > { %911 = vst [vmem:[#allocation2 + $0x28] sm:$0xf] %v910_v35  ;;  %914 = vst [vmem:[#allocation2 + $0x2c] sm:$0x1] %v913_v36  ;;  %v826_v46 = vshll.u32 %v8465_v10, 16  ;;  %v857_v47 = vrot.slane %v855_v38, 7 }
 0x1f2   : > { %v858_v48 = vshll.u32 %v8469_v11, 16  ;;  %v809_v50 = vrot.slane %v807_v43, 7  ;;  %v810_v51 = vshll.u32 %v8463_v17, 16  ;;  %v841_v53 = vrot.slane %v839_v44, 7 }
 0x1f3   : > { %v842_v54 = vshll.u32 %v8467_v18, 16  ;;  %v828_v55 = vor.u32 %v826_v46, %v825_v45  ;;  %v829_v56 = vrot.slane %v825_v45, 4  ;;  %v861_v58 = vrot.slane %v857_v47, 4 }
 0x1f4   : > { %v860_v57 = vor.u32 %v858_v48, %v857_v47  ;;  %v812_v61 = vor.u32 %v810_v51, %v809_v50  ;;  %v813_v62 = vrot.slane %v809_v50, 4  ;;  %v845_v0 = vrot.slane %v841_v53, 4 }
 0x1f5   : > { %v844_v63 = vor.u32 %v842_v54, %v841_v53  ;;  %v904_v1 = vsel %vm10960_vm4, %v828_v55, %v903_v39  ;;  %v907_v2 = vsel %vm10966_vm5, %v829_v56, %v906_v40  ;;  %v931_v4 = vsel %vm10966_vm5, %v861_v58, %v930_v42 }
 0x1f6   : > { %v928_v3 = vsel %vm10960_vm4, %v860_v57, %v927_v41  ;;  %905 = vst [vmem:[#allocation2 + $0x20] sm:$0xf] %v904_v1  ;;  %908 = vst [vmem:[#allocation2 + $0x24] sm:$0x1] %v907_v2  ;;  %v892_v5 = vsel %vm10960_vm4, %v812_v61, %v891_v49  ;;  %v895_v7 = vsel %vm10966_vm5, %v813_v62, %v894_v52 }
 0x1f7   : > { %929 = vst [vmem:[#allocation2 + $0x40] sm:$0xf] %v928_v3  ;;  %932 = vst [vmem:[#allocation2 + $0x44] sm:$0x1] %v931_v4  ;;  %v916_v8 = vsel %vm10960_vm4, %v844_v63, %v915_v59  ;;  %v919_v9 = vsel %vm10966_vm5, %v845_v0, %v918_v60 }
 0x1f8   : > { %893 = vst [vmem:[#allocation2 + $0x10] sm:$0xf] %v892_v5  ;;  %896 = vst [vmem:[#allocation2 + $0x14] sm:$0x1] %v895_v7 }
 0x1f9   : > { %917 = vst [vmem:[#allocation2 + $0x30] sm:$0xf] %v916_v8  ;;  %920 = vst [vmem:[#allocation2 + $0x34] sm:$0x1] %v919_v9 }
 0x1fa PF: > { %v9939_v10 = vld [vmem:[#allocation8] sm:$0xff]   ;;  %s12311_s16 = sld [smem:[#allocation19_spill]]  ;;  %v9940_v11 = vld [vmem:[#allocation8 + $0x8] sm:$0xff]   ;;  %v9941_v6 = vld [vmem:[#allocation8 + $0x10] sm:$0xff]   ;;  %vm1254_vm6 = vcmask 1043456   ;;  %vm1260_vm8 = vcmask 1040384  }
 0x1fb   : > { %8865 = vmatprep.subr.bf16.mxu0 %v9939_v10  ;;  %v9942_v12 = vld [vmem:[#allocation8 + $0x18] sm:$0xff]   ;;  %v950_v13 = vld [vmem:[%s10915_s20] sm:$0xff]  ;;  %v951_v14 = vld [vmem:[%s10915_s20 + $0x8] sm:$0xff]  ;;  %vm1255_vm7 = vsmask.f32 7938  ;;  %vm1779_vm15 = vcmask 1042432  }
 0x1fc   : > { %8866 = vmatpush3.bf16.msra.mxu0 %v9939_v10  ;;  %v958_v15 = vpack.c.bf16 %v951_v14, %v950_v13  ;;  %v9943_v16 = vld [vmem:[#allocation8 + $0x20] sm:$0xff]   ;;  %v9944_v17 = vld [vmem:[#allocation8 + $0x28] sm:$0xff]   ;;  %v9945_v18 = vld [vmem:[#allocation8 + $0x30] sm:$0xff]   ;;  %vm1261_vm9 = vsmask.f32 256  ;;  %vm1780_vm0 = vcmask 1046532  }
 0x1fd   : > { %8867 = vmatprep.subr.bf16.mxu0 %v9940_v11  ;;  %v9946_v19 = vld [vmem:[#allocation8 + $0x38] sm:$0xff]   ;;  %v952_v20 = vld [vmem:[%s10915_s20 + $0x10] sm:$0xff]  ;;  %v954_v22 = vld [vmem:[%s10915_s20 + $0x20] sm:$0xff]  ;;  %vm1357_vm12 = vsmask.f32 3328 }
 0x1fe   : > { %8881 = vmatprep.mubr.bf16.mxu0 %v958_v15  ;;  %v953_v21 = vld [vmem:[%s10915_s20 + $0x18] sm:$0xff]  ;;  %v955_v23 = vld [vmem:[%s10915_s20 + $0x28] sm:$0xff]  ;;  %v956_v26 = vld [vmem:[%s10915_s20 + $0x30] sm:$0xff]  ;;  %vm1358_vm13 = vsmask.f32 7440 }
 0x1ff   : > { %v959_v24 = vpack.c.bf16 %v953_v21, %v952_v20  ;;  %v960_v25 = vpack.c.bf16 %v955_v23, %v954_v22  ;;  %v957_v27 = vld [vmem:[%s10915_s20 + $0x38] sm:$0xff]  ;;  %v9947_v29 = vld [vmem:[#allocation9 + $0x300] sm:$0xff]   ;;  %v9948_v30 = vld [vmem:[#allocation9 + $0x308] sm:$0xff]  }
 0x200   : > { %s11003_s2 = sadd.s32 1, %s12311_s16  ;;  %8868 = vmatpush3.bf16.msra.mxu0 %v9940_v11  ;;  %v961_v28 = vpack.c.bf16 %v957_v27, %v956_v26  ;;  %9177 = vmatprep.subr.bf16.mxu1 %v9947_v29  ;;  %s11016_s14 = sadd.s32 2, %s12311_s16  ;;  %v9949_v31 = vld [vmem:[#allocation9 + $0x310] sm:$0xff]   ;;  %v9950_v32 = vld [vmem:[#allocation9 + $0x40] sm:$0xff]   ;;  %v9951_v33 = vld [vmem:[#allocation9 + $0x318] sm:$0xff]  }
 0x201   : > { %s935_s24 = ssub.s32 0, %s11003_s2  ;;  %8869 = vmatprep.subr.bf16.mxu0 %v9941_v6  ;;  %9178 = vmatpush3.bf16.msra.mxu1 %v9947_v29  ;;  %s11019_s5 = sadd.s32 3, %s12311_s16  ;;  %v9952_v34 = vld [vmem:[#allocation9 + $0x48] sm:$0xff]   ;;  %v9953_v35 = vld [vmem:[#allocation9 + $0x320] sm:$0xff]   ;;  %v9954_v36 = vld [vmem:[#allocation9 + $0x50] sm:$0xff]  }
 0x202   : > { %s7784_s4 = smin.u32 %s935_s24, %s11003_s2  ;;  %s1310_s6 = ssub.s32 0, %s11016_s14  ;;  %9179 = vmatprep.subr.bf16.mxu1 %v9948_v30  ;;  %v9955_v37 = vld [vmem:[#allocation9 + $0x328] sm:$0xff]   ;;  %v9956_v38 = vld [vmem:[#allocation9 + $0x58] sm:$0xff]   ;;  %v9957_v39 = vld [vmem:[#allocation9 + $0x330] sm:$0xff]  }
 0x203   : > { %10207 = sdivrem.u32 %s7784_s4, 3  ;;  %s3300_s12 = ssub.s32 0, %s11019_s5  ;;  %v9958_v40 = vld [vmem:[#allocation9 + $0x60] sm:$0xff]   ;;  %v9959_v41 = vld [vmem:[#allocation9 + $0x338] sm:$0xff]   ;;  %v9960_v42 = vld [vmem:[#allocation9 + $0x68] sm:$0xff]  }
 0x204   : > { %8870 = vmatpush3.bf16.msra.mxu0 %v9941_v6  ;;  %s7838_s0 = smin.u32 %s1310_s6, %s11016_s14  ;;  %s8040_s28 = smin.u32 %s3300_s12, %s11019_s5  ;;  %v11030_v43 = vld [vmem:[#allocation9 + $0x340] sm:$0xff]   ;;  %v9963_v44 = vld [vmem:[#allocation9 + $0x70] sm:$0xff]   ;;  %v9967_v45 = vld [vmem:[#allocation9 + $0x78] sm:$0xff]  }
 0x205   : > { %8871 = vmatprep.subr.bf16.mxu0 %v9942_v12  ;;  %s11026_s20 = sadd.s32 4, %s12311_s16  ;;  %10209 = sdivrem.u32 %s7838_s0, 3  ;;  %9180 = vmatpush3.bf16.msra.mxu1 %v9948_v30  ;;  %v11033_v46 = vld [vmem:[#allocation9] sm:$0xff]   ;;  %vm11071_vm10 = vmand %vm1254_vm6, %vm1255_vm7 }
 0x206   : > { %s5309_s8 = ssub.s32 0, %s11026_s20  ;;  %10211 = sdivrem.u32 %s8040_s28, 3  ;;  %9181 = vmatprep.subr.bf16.mxu1 %v9949_v31  ;;  %vm11082_vm11 = vmand %vm1260_vm8, %vm1261_vm9 }
 0x207   : > { %s8242_s10 = smin.u32 %s5309_s8, %s11026_s20  ;;  %p934_p7 = scmp.lt.s32.totalorder %s11003_s2, 0  ;;  %vm11217_vm14 = vmor %vm1357_vm12, %vm1358_vm13 }
 0x208   : > { %8872 = vmatpush3.bf16.msra.mxu0 %v9942_v12  ;;  %10213 = sdivrem.u32 %s8242_s10, 3  ;;  %p947_p3 = scmp.lt.s32.totalorder %s11003_s2, 4  ;;  %vm11341_vm1 = vmor %vm1779_vm15, %vm1780_vm0 }
 0x209   : > { %8873 = vmatprep.subr.bf16.mxu0 %v9943_v16  ;;  %9182 = vmatpush3.bf16.msra.mxu1 %v9949_v31  ;;  %s12312_s6 = sld [smem:[#allocation28_spill]]  ;;  %s12313_s10 = sld [smem:[#allocation29_spill]] }
 0x20a   : > { %9183 = vmatprep.subr.bf16.mxu1 %v9951_v33  ;;  %s948_s7 = scalar_select %p947_p3, 1, 0 }
 0x20b   : > { %p1309_p8 = scmp.lt.s32.totalorder %s11016_s14, 0  ;;  %p3299_p5 = scmp.lt.s32.totalorder %s11019_s5, 0 }
 0x20c   : > { %8874 = vmatpush3.bf16.msra.mxu0 %v9943_v16  ;;  %s10208_s13 = spop.drf %10207  ;;  %s949_s0 = scvt.s32.f32 %s948_s7 }
 0x20d   : > { %8875 = vmatprep.subr.bf16.mxu0 %v9944_v17  ;;  %9184 = vmatpush3.bf16.msra.mxu1 %v9951_v33  ;;  %s939_s3 = ssub.s32 0, %s10208_s13  ;;  %p5308_p12 = scmp.lt.s32.totalorder %s11026_s20, 0 }
 0x20e   : > { %9185 = vmatprep.subr.bf16.mxu1 %v9953_v35  ;;  %s12352_s3 = smov (!%p934_p7, %s939_s3), %s10208_s13  ;;  %v11054_v57 = vstv %s949_s0 }
 0x20f   : > { %p7786_p6 = scmp.lt.s32.totalorder %s12352_s3, 0  ;;  %v11041_v47 = vld [vmem:[%s12312_s6] ss:$0 sm:$0xff]  ;;  %s945_s12 = sadd.s32 3, %s12352_s3 }
 0x210   : > { %8876 = vmatpush3.bf16.msra.mxu0 %v9944_v17  ;;  %v11046_v49 = vld [vmem:[%s12313_s10] ss:$0 sm:$0xff] }
 0x211   : > { %8877 = vmatprep.subr.bf16.mxu0 %v9945_v18  ;;  %9186 = vmatpush3.bf16.msra.mxu1 %v9953_v35  ;;  %s12354_s12 = smov (!%p7786_p6, %s945_s12), %s12352_s3  ;;  %s11097_s3 = spop.drf %10209 }
 0x212   : > { %9187 = vmatprep.subr.bf16.mxu1 %v9955_v37  ;;  %s7805_s2 = smul.u32 80, %s12354_s12  ;;  %s11107_s7 = spop.drf %10211 }
 0x213   : > { %s1314_s24 = ssub.s32 0, %s11097_s3  ;;  %s3304_s4 = ssub.s32 0, %s11107_s7 }
 0x214   : > { %8878 = vmatpush3.bf16.msra.mxu0 %v9945_v18  ;;  %s11077_s13 = scalar_lea.vmem [#allocation2], %s7805_s2  ;;  %s12356_s24 = smov (!%p1309_p8, %s1314_s24), %s11097_s3 }
 0x215   : > { %8879 = vmatprep.subr.bf16.mxu0 %v9946_v19  ;;  %9188 = vmatpush3.bf16.msra.mxu1 %v9955_v37  ;;  %v7816_v29 = vld [vmem:[%s11077_s13 + $0x1c] sm:$0x1]  ;;  %v7808_v37 = vld [vmem:[%s11077_s13 + $0xc] sm:$0x1]  ;;  %s12358_s4 = smov (!%p3299_p5, %s3304_s4), %s11107_s7  ;;  %p7840_p11 = scmp.lt.s32.totalorder %s12356_s24, 0 }
 0x216   : > { %9189 = vmatprep.subr.bf16.mxu1 %v9957_v39  ;;  %s1320_s14 = sadd.s32 3, %s12356_s24  ;;  %p8042_p10 = scmp.lt.s32.totalorder %s12358_s4, 0 }
 0x217   : > { %s3310_s5 = sadd.s32 3, %s12358_s4  ;;  %s12360_s14 = smov (!%p7840_p11, %s1320_s14), %s12356_s24 }
 0x218   : > { %8880 = vmatpush3.bf16.msra.mxu0 %v9946_v19  ;;  %s12362_s5 = smov (!%p8042_p10, %s3310_s5), %s12358_s4  ;;  %s8478_s6 = smul.u32 80, %s12360_s14 }
 0x219   : > { %8889 = vmatprep.subr.bf16.mxu0 %v9950_v32  ;;  %9190 = vmatpush3.bf16.msra.mxu1 %v9957_v39  ;;  %s8479_s12 = smul.u32 80, %s12362_s5  ;;  %s10214_s8 = spop.drf %10213 }
 0x21a   : > { %9191 = vmatprep.subr.bf16.mxu1 %v9959_v41  ;;  %s11179_s28 = scalar_lea.vmem [#allocation2], %s8478_s6  ;;  %s5313_s10 = ssub.s32 0, %s10214_s8 }
 0x21b   : > { %8882 = vmatmul.mubr.bf16.vlgmr.msra.gmra.mrb[0].mxu0 %v959_v24  ;;  %v7814_v24 = vld [vmem:[%s11077_s13 + $0x18] sm:$0xf]  ;;  %s11174_s0 = scalar_lea.vmem [#allocation2], %s8479_s12  ;;  %s12364_s10 = smov (!%p5308_p12, %s5313_s10), %s10214_s8 }
 0x21c   : > { %8885 = vmatprep.mubr.bf16.mxu0 %v960_v25  ;;  %8890 = vmatpush3.bf16.msra.mxu0 %v9950_v32  ;;  %p8244_p0 = scmp.lt.s32.totalorder %s12364_s10, 0  ;;  %s5319_s20 = sadd.s32 3, %s12364_s10 }
 0x21d   : > { %8891 = vmatprep.subr.bf16.mxu0 %v9952_v34  ;;  %9192 = vmatpush3.bf16.msra.mxu1 %v9959_v41  ;;  %s12322_s24 = sld [smem:[#allocation30_spill]]  ;;  %s12323_s5 = sld [smem:[#allocation31_spill]] }
 0x21e   : > { %9201 = vmatprep.subr.bf16.mxu1 %v11030_v43  ;;  %s12366_s20 = smov (!%p8244_p0, %s5319_s20), %s12364_s10  ;;  %s12325_s10 = sld [smem:[#allocation33_spill]] }
 0x21f   : > { %s8480_s2 = smul.u32 80, %s12366_s20  ;;  %s12326_s20 = sld [smem:[#allocation20_spill]] }
 0x220   : > { %8892 = vmatpush3.bf16.msra.mxu0 %v9952_v34  ;;  %s7565_s3 = sshll.u32 %s10929_s30, 4  ;;  %s12327_s4 = sld [smem:[#allocation34_spill]]  ;;  %s12165_s3 = int_to_ptr.vmem [resolvable:$true] %s7565_s3 }
 0x221   : > { %8893 = vmatprep.subr.bf16.mxu0 %v9954_v36  ;;  %s10359_s6 = scalar_lea.vmem %s12165_s3, 1024  ;;  %s10505_s12 = smov [#allocation12]  }
 0x222   : > { %p10360_p13 = scmp.ne.s32.totalorder %s12165_s3, %s10359_s6 }
 0x223   : > { %8886 = vmatmul.mubr.bf16.gmra.mrb[4].mxu0 %v961_v28 }
 0x224   : > { %8894 = vmatpush3.bf16.msra.mxu0 %v9954_v36  ;;  %v7806_v36 = vld [vmem:[%s11077_s13 + $0x8] sm:$0xf]  ;;  %p10361_p2 = pnand %p10360_p13, %p10778_p9 }
 0x225   : > { %8895 = vmatprep.subr.bf16.mxu0 %v9956_v38 }
 0x226   : > { %p10362_p4 = pneg %p10361_p2 }
 0x228   : > { %8896 = vmatpush3.bf16.msra.mxu0 %v9956_v38 }
 0x229   : > { %8897 = vmatprep.subr.bf16.mxu0 %v9958_v40 }
 0x22c   : > { %8898 = vmatpush3.bf16.msra.mxu0 %v9958_v40 }
 0x22d   : > { %8899 = vmatprep.subr.bf16.mxu0 %v9960_v42 }
 0x230   : > { %8900 = vmatpush3.bf16.msra.mxu0 %v9960_v42  ;;  %v7818_v42 = vld [vmem:[%s11077_s13 + $0x20] sm:$0xf] }
 0x231   : > { %8901 = vmatprep.subr.bf16.mxu0 %v9963_v44 }
 0x234   : > { %8902 = vmatpush3.bf16.msra.mxu0 %v9963_v44  ;;  %v7820_v44 = vld [vmem:[%s11077_s13 + $0x24] sm:$0x1] }
 0x235   : > { %8903 = vmatprep.subr.bf16.mxu0 %v9967_v45 }
 0x238   : > { %8904 = vmatpush3.bf16.msra.mxu0 %v9967_v45 }
 0x239   : > { %8913 = vmatprep.subr.bf16.mxu0 %v11033_v46 }
 0x2ee   : > { %v8883_v48 = vpop.f32.mrb[0].mxu0 }
 0x2ef   : > { %v1100_v50 = vmul.f32 %v8883_v48, %v11041_v47  ;;  %v1060_v51 = vpop.f32.mrb[1].mxu0 }
 0x2f0   : > { %v1098_v52 = vmul.f32 %v11041_v47, %v1060_v51  ;;  %v8884_v53 = vpop.f32.mrb[2].mxu0 }
 0x2f1   : > { %v1115_v54 = vadd.f32 %v11046_v49, %v1100_v50  ;;  %v1101_v55 = vmul.f32 %v8884_v53, %v11041_v47  ;;  %v1063_v56 = vpop.f32.mrb[3].mxu0 }
 0x2f2   : > { %v1113_v58 = vadd.f32 %v11046_v49, %v1098_v52  ;;  %v1099_v59 = vmul.f32 %v11041_v47, %v1063_v56 }
 0x2f3   : > { %v1123_v60 = vmax.f32 %v1115_v54, 0.0  ;;  %v1116_v61 = vadd.f32 %v11046_v49, %v1101_v55  ;;  %v7810_v54 = vld [vmem:[%s11077_s13 + $0x10] sm:$0xf]  ;;  %v7812_v55 = vld [vmem:[%s11077_s13 + $0x14] sm:$0x1] }
 0x2f4   : > { %v1121_v62 = vmax.f32 %v1113_v58, 0.0  ;;  %v1114_v63 = vadd.f32 %v11046_v49, %v1099_v59 }
 0x2f5   : > { %v1132_v0 = vmul.f32 %v11054_v57, %v1123_v60  ;;  %v1124_v1 = vmax.f32 %v1116_v61, 0.0 }
 0x2f6   : > { %v1130_v2 = vmul.f32 %v11054_v57, %v1121_v62  ;;  %v1122_v3 = vmax.f32 %v1114_v63, 0.0  ;;  %v8887_v4 = vpop.f32.mrb[4].mxu0 }
 0x2f7   : > { %v8472_v5 = vpack.c.bf16 %v1132_v0, %v1132_v0  ;;  %v1133_v7 = vmul.f32 %v11054_v57, %v1124_v1  ;;  %v1104_v8 = vmul.f32 %v8887_v4, %v11041_v47  ;;  %v1076_v9 = vpop.f32.mrb[5].mxu0 }
 0x2f8   : > { %v8470_v10 = vpack.c.bf16 %v1130_v2, %v1130_v2  ;;  %v1131_v11 = vmul.f32 %v11054_v57, %v1122_v3  ;;  %v1102_v6 = vmul.f32 %v11041_v47, %v1076_v9  ;;  %v8888_v12 = vpop.f32.mrb[6].mxu0 }
 0x2f9   : > { %v1187_v13 = vshrl.u32 %v8472_v5, 16  ;;  %v1190_v14 = vshll.u32 %v8472_v5, 16  ;;  %v8473_v15 = vpack.c.bf16 %v1133_v7, %v1133_v7  ;;  %v1119_v16 = vadd.f32 %v11046_v49, %v1104_v8  ;;  %v1079_v17 = vpop.f32.mrb[7].mxu0  ;;  %v7830_v8 = vld [vmem:[%s11077_s13 + $0x38] sm:$0xf] }
 0x2fa   : > { %v1171_v18 = vshrl.u32 %v8470_v10, 16  ;;  %v1174_v19 = vshll.u32 %v8470_v10, 16  ;;  %v8471_v20 = vpack.c.bf16 %v1131_v11, %v1131_v11  ;;  %v1117_v21 = vadd.f32 %v11046_v49, %v1102_v6  ;;  %v7832_v6 = vld [vmem:[%s11077_s13 + $0x3c] sm:$0x1] }
 0x2fb   : > { %v1189_v22 = vrot.slane %v1187_v13, 7  ;;  %v1195_v25 = vshrl.u32 %v8473_v15, 16  ;;  %v1198_v26 = vshll.u32 %v8473_v15, 16  ;;  %v1127_v27 = vmax.f32 %v1119_v16, 0.0  ;;  %v7824_v15 = vld [vmem:[%s11077_s13 + $0x2c] sm:$0x1] }
 0x2fc   : > { %v1173_v30 = vrot.slane %v1171_v18, 7  ;;  %v1179_v31 = vshrl.u32 %v8471_v20, 16  ;;  %v1182_v32 = vshll.u32 %v8471_v20, 16  ;;  %v1125_v33 = vmax.f32 %v1117_v21, 0.0 }
 0x2fd   : > { %v1192_v34 = vor.u32 %v1190_v14, %v1189_v22  ;;  %v1193_v35 = vrot.slane %v1189_v22, 4  ;;  %v1197_v38 = vrot.slane %v1195_v25, 7  ;;  %v1136_v39 = vmul.f32 %v11054_v57, %v1127_v27  ;;  %v7822_v14 = vld [vmem:[%s11077_s13 + $0x28] sm:$0xf] }
 0x2fe   : > { %v1176_v40 = vor.u32 %v1174_v19, %v1173_v30  ;;  %v1177_v41 = vrot.slane %v1173_v30, 4  ;;  %v1181_v45 = vrot.slane %v1179_v31, 7  ;;  %v1134_v48 = vmul.f32 %v11054_v57, %v1125_v33 }
 0x2ff   : > { %v1273_v50 = vsel %vm11071_vm10, %v1192_v34, %v7814_v24  ;;  %v1276_v51 = vsel %vm11082_vm11, %v1193_v35, %v7816_v29  ;;  %v1200_v52 = vor.u32 %v1198_v26, %v1197_v38  ;;  %v1201_v53 = vrot.slane %v1197_v38, 4  ;;  %v7834_v38 = vld [vmem:[%s11077_s13 + $0x40] sm:$0xf] }
 0x300   : > { %7815 = vst [vmem:[%s11077_s13 + $0x18] sm:$0xf] %v1273_v50  ;;  %7817 = vst [vmem:[%s11077_s13 + $0x1c] sm:$0x1] %v1276_v51  ;;  %v1258_v56 = vsel %vm11071_vm10, %v1176_v40, %v7806_v36  ;;  %v1264_v58 = vsel %vm11082_vm11, %v1177_v41, %v7808_v37  ;;  %v1184_v59 = vor.u32 %v1182_v32, %v1181_v45  ;;  %v1185_v60 = vrot.slane %v1181_v45, 4 }
 0x301   : > { %7807 = vst [vmem:[%s11077_s13 + $0x8] sm:$0xf] %v1258_v56  ;;  %7809 = vst [vmem:[%s11077_s13 + $0xc] sm:$0x1] %v1264_v58  ;;  %v1279_v61 = vsel %vm11071_vm10, %v1200_v52, %v7818_v42  ;;  %v1282_v62 = vsel %vm11082_vm11, %v1201_v53, %v7820_v44  ;;  %v8476_v63 = vpack.c.bf16 %v1136_v39, %v1136_v39  ;;  %v7836_v41 = vld [vmem:[%s11077_s13 + $0x44] sm:$0x1] }
 0x302   : > { %v8474_v0 = vpack.c.bf16 %v1134_v48, %v1134_v48  ;;  %7819 = vst [vmem:[%s11077_s13 + $0x20] sm:$0xf] %v1279_v61  ;;  %7821 = vst [vmem:[%s11077_s13 + $0x24] sm:$0x1] %v1282_v62  ;;  %v1267_v1 = vsel %vm11071_vm10, %v1184_v59, %v7810_v54  ;;  %v1270_v2 = vsel %vm11082_vm11, %v1185_v60, %v7812_v55  ;;  %v7826_v42 = vld [vmem:[%s11077_s13 + $0x30] sm:$0xf] }
 0x303   : > { %v1105_v3 = vmul.f32 %v8888_v12, %v11041_v47  ;;  %v1103_v4 = vmul.f32 %v11041_v47, %v1079_v17  ;;  %7811 = vst [vmem:[%s11077_s13 + $0x10] sm:$0xf] %v1267_v1  ;;  %7813 = vst [vmem:[%s11077_s13 + $0x14] sm:$0x1] %v1270_v2  ;;  %v1219_v5 = vshrl.u32 %v8476_v63, 16  ;;  %v1222_v47 = vshll.u32 %v8476_v63, 16 }
 0x304   : > { %v1203_v7 = vshrl.u32 %v8474_v0, 16  ;;  %v1206_v13 = vshll.u32 %v8474_v0, 16  ;;  %v7828_v44 = vld [vmem:[%s11077_s13 + $0x34] sm:$0x1]  ;;  %v9966_v52 = vld [vmem:[#allocation9 + $0x348] sm:$0xff]   ;;  %v9968_v63 = vld [vmem:[#allocation9 + $0x350] sm:$0xff]  }
 0x305   : > { %v1120_v9 = vadd.f32 %v11046_v49, %v1105_v3  ;;  %v1118_v10 = vadd.f32 %v11046_v49, %v1103_v4  ;;  %v1221_v11 = vrot.slane %v1219_v5, 7 }
 0x306   : > { %v1205_v12 = vrot.slane %v1203_v7, 7 }
 0x307   : > { %v1128_v16 = vmax.f32 %v1120_v9, 0.0  ;;  %v1126_v17 = vmax.f32 %v1118_v10, 0.0  ;;  %v1224_v18 = vor.u32 %v1222_v47, %v1221_v11  ;;  %v1225_v19 = vrot.slane %v1221_v11, 4 }
 0x308   : > { %v1208_v20 = vor.u32 %v1206_v13, %v1205_v12  ;;  %v1209_v21 = vrot.slane %v1205_v12, 4  ;;  %v10195_v13 = vld [vmem:[#allocation9 + $0x6a0] sm:$0xff]  }
 0x309   : > { %v1137_v49 = vmul.f32 %v11054_v57, %v1128_v16  ;;  %v1135_v22 = vmul.f32 %v11054_v57, %v1126_v17  ;;  %v1297_v24 = vsel %vm11071_vm10, %v1224_v18, %v7830_v8  ;;  %v1300_v25 = vsel %vm11082_vm11, %v1225_v19, %v7832_v6  ;;  %v9971_v19 = vld [vmem:[#allocation9 + $0x358] sm:$0xff]  }
 0x30a   : > { %v1285_v26 = vsel %vm11071_vm10, %v1208_v20, %v7822_v14  ;;  %v1288_v27 = vsel %vm11082_vm11, %v1209_v21, %v7824_v15  ;;  %7831 = vst [vmem:[%s11077_s13 + $0x38] sm:$0xf] %v1297_v24  ;;  %7833 = vst [vmem:[%s11077_s13 + $0x3c] sm:$0x1] %v1300_v25 }
 0x30b   : > { %7823 = vst [vmem:[%s11077_s13 + $0x28] sm:$0xf] %v1285_v26  ;;  %7825 = vst [vmem:[%s11077_s13 + $0x2c] sm:$0x1] %v1288_v27  ;;  %v8477_v57 = vpack.c.bf16 %v1137_v49, %v1137_v49  ;;  %v8475_v29 = vpack.c.bf16 %v1135_v22, %v1135_v22 }
 0x30d   : > { %v1227_v30 = vshrl.u32 %v8477_v57, 16  ;;  %v1211_v31 = vshrl.u32 %v8475_v29, 16  ;;  %v1230_v33 = vshll.u32 %v8477_v57, 16  ;;  %v1214_v35 = vshll.u32 %v8475_v29, 16 }
 0x30f   : > { %v1229_v32 = vrot.slane %v1227_v30, 7  ;;  %v1213_v34 = vrot.slane %v1211_v31, 7 }
 0x311   : > { %v1232_v36 = vor.u32 %v1230_v33, %v1229_v32  ;;  %v1233_v37 = vrot.slane %v1229_v32, 4  ;;  %v1216_v39 = vor.u32 %v1214_v35, %v1213_v34  ;;  %v1217_v40 = vrot.slane %v1213_v34, 4  ;;  %v9973_v34 = vld [vmem:[#allocation9 + $0x360] sm:$0xff]  }
 0x313   : > { %v1303_v45 = vsel %vm11071_vm10, %v1232_v36, %v7834_v38  ;;  %v1306_v48 = vsel %vm11082_vm11, %v1233_v37, %v7836_v41  ;;  %v1291_v50 = vsel %vm11071_vm10, %v1216_v39, %v7826_v42  ;;  %v1294_v51 = vsel %vm11082_vm11, %v1217_v40, %v7828_v44 }
 0x314   : > { %7835 = vst [vmem:[%s11077_s13 + $0x40] sm:$0xf] %v1303_v45  ;;  %7837 = vst [vmem:[%s11077_s13 + $0x44] sm:$0x1] %v1306_v48 }
 0x315   : > { %7827 = vst [vmem:[%s11077_s13 + $0x30] sm:$0xf] %v1291_v50  ;;  %7829 = vst [vmem:[%s11077_s13 + $0x34] sm:$0x1] %v1294_v51  ;;  %s11439_s13 = scalar_lea.vmem [#allocation2], %s8480_s2  ;;  %s8457_s2 = sshll.u32 %s12311_s16, 3 }
 0x31c   : > { %v9961_v53 = vld [vmem:[%s11174_s0 + $0x8] ss:$8 sps:$4 sm:$0xff]   ;;  %v9964_v23 = vld [vmem:[%s11174_s0 + $0x18] ss:$8 sps:$4 sm:$0xff]   ;;  %v11188_v56 = vld [vmem:[%s11179_s28 + $0x4] sm:$0x1] }
 0x31d   : > { %9193 = vmatprep.mubr.bf16.mxu1 %v9961_v53  ;;  %v9965_v54 = vld [vmem:[%s11174_s0 + $0x28] ss:$8 sps:$4 sm:$0xff]   ;;  %v11182_v28 = vld [vmem:[%s11179_s28] sm:$0xf]  ;;  %v11192_v58 = vld [vmem:[%s11179_s28 + $0xc] sm:$0x1] }
 0x31e   : > { %9194 = vmatmul.mubr.bf16.vlgmr.msra.gmra.mrb[0].mxu1 %v9964_v23  ;;  %v11185_v55 = vld [vmem:[%s11179_s28 + $0x8] sm:$0xf]  ;;  %v1361_v59 = vshrl.u32 %v11182_v28, 16  ;;  %v1364_v60 = vshll.u32 %v11182_v28, 16  ;;  %v1370_v61 = vshll.u32 %v11188_v56, 16  ;;  %v1384_v3 = vshll.u32 %v11192_v58, 16 }
 0x31f   : > { %9202 = vmatpush3.bf16.msra.mxu1 %v11030_v43  ;;  %9197 = vmatprep.mubr.bf16.mxu1 %v9965_v54  ;;  %v1375_v62 = vshrl.u32 %v11185_v55, 16  ;;  %v1378_v43 = vshll.u32 %v11185_v55, 16  ;;  %v9970_v7 = vld [vmem:[%s11174_s0 + $0x38] ss:$8 sps:$4 sm:$0xff]   ;;  %v11202_v8 = vld [vmem:[%s11179_s28 + $0x10] sm:$0xf] }
 0x320   : > { %9203 = vmatprep.subr.bf16.mxu1 %v9966_v52  ;;  %v1363_v0 = vrot.slane %v1361_v59, 4  ;;  %v1366_v1 = vrot.slane %v1364_v60, 5  ;;  %v1372_v4 = vrot.slane %v1370_v61, 5  ;;  %v11205_v9 = vld [vmem:[%s11179_s28 + $0x18] sm:$0xf]  ;;  %v1389_v6 = vshrl.u32 %v11202_v8, 16 }
 0x321   : > { %v1377_v2 = vrot.slane %v1375_v62, 4  ;;  %v1380_v5 = vrot.slane %v1378_v43, 5  ;;  %v11208_v11 = vld [vmem:[%s11179_s28 + $0x14] sm:$0x1]  ;;  %v11211_v47 = vld [vmem:[%s11179_s28 + $0x1c] sm:$0x1] }
 0x322   : > { %v1367_v10 = vor.u32 %v1366_v1, %v1363_v0  ;;  %v1392_v12 = vshll.u32 %v11202_v8, 16  ;;  %v1398_v15 = vshll.u32 %v11208_v11, 16  ;;  %v1403_v16 = vshrl.u32 %v11205_v9, 16  ;;  %v8109_v18 = vld [vmem:[%s11174_s0 + $0x8] sm:$0xf]  ;;  %v9976_v62 = vld [vmem:[#allocation9 + $0x368] sm:$0xff]  }
 0x323   : > { %9204 = vmatpush3.bf16.msra.mxu1 %v9966_v52  ;;  %v1381_v14 = vor.u32 %v1380_v5, %v1377_v2  ;;  %v1406_v17 = vshll.u32 %v11205_v9, 16  ;;  %v1386_v21 = vrot.slane %v1384_v3, 5  ;;  %v1391_v49 = vrot.slane %v1389_v6, 4  ;;  %v11226_v24 = vld [vmem:[%s11174_s0 + $0xc] sm:$0x1]  ;;  %v9972_v6 = vld [vmem:[#allocation9 + $0x8] sm:$0xff]  }
 0x324   : > { %9205 = vmatprep.subr.bf16.mxu1 %v9968_v63  ;;  %v1368_v20 = vrot.slane %v1367_v10, 4  ;;  %v1394_v22 = vrot.slane %v1392_v12, 5  ;;  %v1405_v26 = vrot.slane %v1403_v16, 4  ;;  %v1412_v57 = vshll.u32 %v11211_v47, 16  ;;  %v8111_v29 = vld [vmem:[%s11174_s0 + $0x10] sm:$0xf] }
 0x325   : > { %v1382_v25 = vrot.slane %v1381_v14, 4  ;;  %v1408_v27 = vrot.slane %v1406_v17, 5  ;;  %v1400_v32 = vrot.slane %v1398_v15, 5  ;;  %v4167_v33 = vshrl.u32 %v8109_v18, 16  ;;  %v11235_v37 = vld [vmem:[%s11174_s0 + $0x14] sm:$0x1] }
 0x326   : > { %9198 = vmatmul.mubr.bf16.gmra.mrb[4].mxu1 %v9970_v7  ;;  %v1373_v30 = vsel %vm11217_vm14, %v1368_v20, %v1372_v4  ;;  %v1395_v31 = vor.u32 %v1394_v22, %v1391_v49  ;;  %v4170_v38 = vshll.u32 %v8109_v18, 16  ;;  %v4176_v39 = vshll.u32 %v11226_v24, 16  ;;  %v11239_v40 = vld [vmem:[%s11179_s28 + $0x20] sm:$0xf]  ;;  %v11242_v53 = vld [vmem:[%s11179_s28 + $0x24] sm:$0x1] }
 0x327   : > { %9206 = vmatpush3.bf16.msra.mxu1 %v9968_v63  ;;  %v1387_v35 = vsel %vm11217_vm14, %v1382_v25, %v1386_v21  ;;  %v1409_v36 = vor.u32 %v1408_v27, %v1405_v26  ;;  %v4169_v44 = vrot.slane %v4167_v33, 4  ;;  %v4181_v45 = vshrl.u32 %v8111_v29, 16  ;;  %v11248_v60 = vld [vmem:[%s11179_s28 + $0x28] sm:$0xf]  ;;  %v11254_v1 = vld [vmem:[%s11179_s28 + $0x2c] sm:$0x1] }
 0x328   : > { %9207 = vmatprep.subr.bf16.mxu1 %v9971_v19  ;;  %v7842_v41 = vcombine.low %v1373_v30, %v1387_v35  ;;  %v1396_v42 = vrot.slane %v1395_v31, 4  ;;  %v1414_v50 = vrot.slane %v1412_v57, 5  ;;  %v4172_v51 = vrot.slane %v4170_v38, 5  ;;  %v11258_v3 = vld [vmem:[%s11179_s28 + $0x30] sm:$0xf]  ;;  %v9974_v57 = vld [vmem:[#allocation9 + $0x10] sm:$0xff]  }
 0x329   : > { %v1410_v48 = vrot.slane %v1409_v36, 4  ;;  %v4184_v52 = vshll.u32 %v8111_v29, 16  ;;  %v4183_v54 = vrot.slane %v4181_v45, 4  ;;  %v4190_v59 = vshll.u32 %v11235_v37, 16  ;;  %v11263_v17 = vld [vmem:[%s11179_s28 + $0x38] sm:$0xf] }
 0x32a   : > { %8905 = vmatprep.mubr.bf16.mxu0 %v7842_v41  ;;  %v1401_v23 = vsel %vm11217_vm14, %v1396_v42, %v1400_v32  ;;  %v1417_v61 = vshrl.u32 %v11239_v40, 16  ;;  %v4173_v43 = vor.u32 %v4172_v51, %v4169_v44  ;;  %v1420_v2 = vshll.u32 %v11239_v40, 16  ;;  %v11268_v21 = vld [vmem:[%s11179_s28 + $0x34] sm:$0x1]  ;;  %v9978_v29 = vld [vmem:[#allocation9 + $0x370] sm:$0xff]  }
 0x32b   : > { %9208 = vmatpush3.bf16.msra.mxu1 %v9971_v19  ;;  %v1415_v63 = vsel %vm11217_vm14, %v1410_v48, %v1414_v50  ;;  %v4186_v0 = vrot.slane %v4184_v52, 5  ;;  %v4178_v5 = vrot.slane %v4176_v39, 5  ;;  %v1426_v10 = vshll.u32 %v11242_v53, 16  ;;  %v11275_v32 = vld [vmem:[%s11179_s28 + $0x3c] sm:$0x1] }
 0x32c   : > { %9209 = vmatprep.subr.bf16.mxu1 %v9973_v34  ;;  %v7843_v4 = vcombine.low %v1401_v23, %v1415_v63  ;;  %v1419_v7 = vrot.slane %v1417_v61, 4  ;;  %v4174_v12 = vrot.slane %v4173_v43, 4  ;;  %v1422_v15 = vrot.slane %v1420_v2, 5  ;;  %v8113_v39 = vld [vmem:[%s11174_s0 + $0x18] sm:$0xf]  ;;  %v9977_v43 = vld [vmem:[#allocation9 + $0x18] sm:$0xff]  }
 0x32d   : > { %v4187_v14 = vor.u32 %v4186_v0, %v4183_v54  ;;  %v1431_v16 = vshrl.u32 %v11248_v60, 16  ;;  %v4192_v18 = vrot.slane %v4190_v59, 5  ;;  %v1434_v19 = vshll.u32 %v11248_v60, 16  ;;  %v11285_v48 = vld [vmem:[%s11174_s0 + $0x1c] sm:$0x1]  ;;  %v9980_v59 = vld [vmem:[#allocation9 + $0x378] sm:$0xff]  }
 0x32e   : > { %8906 = vmatmul.mubr.bf16.vlgmr.msra.gmra.mrb[8].mxu0 %v7843_v4  ;;  %v1440_v20 = vshll.u32 %v11254_v1, 16  ;;  %v1445_v49 = vshrl.u32 %v11258_v3, 16  ;;  %v4179_v22 = vsel %vm11217_vm14, %v4174_v12, %v4178_v5  ;;  %v1423_v26 = vor.u32 %v1422_v15, %v1419_v7  ;;  %v8115_v50 = vld [vmem:[%s11174_s0 + $0x20] sm:$0xf] }
 0x32f   : > { %9210 = vmatpush3.bf16.msra.mxu1 %v9973_v34  ;;  %8914 = vmatpush3.bf16.msra.mxu0 %v11033_v46  ;;  %v4188_v25 = vrot.slane %v4187_v14, 4  ;;  %v1433_v27 = vrot.slane %v1431_v16, 4  ;;  %v1428_v30 = vrot.slane %v1426_v10, 5  ;;  %v1436_v31 = vrot.slane %v1434_v19, 5  ;;  %v11295_v14 = vld [vmem:[%s11174_s0 + $0x24] sm:$0x1] }
 0x330   : > { %9211 = vmatprep.subr.bf16.mxu1 %v9976_v62  ;;  %8915 = vmatprep.subr.bf16.mxu0 %v9972_v6  ;;  %v1447_v33 = vrot.slane %v1445_v49, 4  ;;  %v1448_v46 = vshll.u32 %v11258_v3, 16  ;;  %v1424_v35 = vrot.slane %v1423_v26, 4  ;;  %v1454_v36 = vshll.u32 %v11268_v21, 16  ;;  %v8117_v16 = vld [vmem:[%s11174_s0 + $0x28] sm:$0xf] }
 0x331   : > { %v4193_v34 = vsel %vm11217_vm14, %v4188_v25, %v4192_v18  ;;  %v1459_v38 = vshrl.u32 %v11263_v17, 16  ;;  %v1437_v42 = vor.u32 %v1436_v31, %v1433_v27  ;;  %v1462_v45 = vshll.u32 %v11263_v17, 16  ;;  %v8119_v25 = vld [vmem:[%s11174_s0 + $0x30] sm:$0xf] }
 0x332   : > { %v8125_v41 = vcombine.low %v4179_v22, %v4193_v34  ;;  %v1450_v44 = vrot.slane %v1448_v46, 5  ;;  %v1429_v51 = vsel %vm11217_vm14, %v1424_v35, %v1428_v30  ;;  %v1442_v52 = vrot.slane %v1440_v20, 5  ;;  %v11300_v22 = vld [vmem:[#allocation9 + $0x380] sm:$0xff]  }
 0x333   : > { %9212 = vmatpush3.bf16.msra.mxu1 %v9976_v62  ;;  %8916 = vmatpush3.bf16.msra.mxu0 %v9972_v6  ;;  %v1461_v23 = vrot.slane %v1459_v38, 4  ;;  %v1468_v54 = vshll.u32 %v11275_v32, 16  ;;  %v1438_v61 = vrot.slane %v1437_v42, 4  ;;  %v1464_v62 = vrot.slane %v1462_v45, 5 }
 0x334   : > { %9213 = vmatprep.subr.bf16.mxu1 %v9978_v29  ;;  %9217 = vmatprep.mubr.bf16.mxu1 %v8125_v41  ;;  %v1451_v63 = vor.u32 %v1450_v44, %v1447_v33  ;;  %v4195_v0 = vshrl.u32 %v8113_v39, 16  ;;  %v1456_v2 = vrot.slane %v1454_v36, 5  ;;  %v4198_v4 = vshll.u32 %v8113_v39, 16  ;;  %v8121_v39 = vld [vmem:[%s11174_s0 + $0x38] sm:$0xf] }
 0x335   : > { %8917 = vmatprep.subr.bf16.mxu0 %v9974_v57  ;;  %v4204_v5 = vshll.u32 %v11285_v48, 16  ;;  %v4209_v7 = vshrl.u32 %v8115_v50, 16  ;;  %v1443_v10 = vsel %vm11217_vm14, %v1438_v61, %v1442_v52  ;;  %v1465_v12 = vor.u32 %v1464_v62, %v1461_v23  ;;  %v11314_v44 = vld [vmem:[%s11174_s0 + $0x34] sm:$0x1]  ;;  %v8123_v61 = vld [vmem:[%s11174_s0 + $0x40] sm:$0xf] }
 0x336   : > { %v1452_v6 = vrot.slane %v1451_v63, 4  ;;  %v4197_v15 = vrot.slane %v4195_v0, 4  ;;  %v7844_v18 = vcombine.low %v1429_v51, %v1443_v10  ;;  %v1470_v19 = vrot.slane %v1468_v54, 5  ;;  %v9981_v51 = vld [vmem:[#allocation9 + $0x28] sm:$0xff]   ;;  %v11325_v10 = vld [vmem:[%s11174_s0 + $0x44] sm:$0x1] }
 0x337   : > { %9214 = vmatpush3.bf16.msra.mxu1 %v9978_v29  ;;  %8918 = vmatpush3.bf16.msra.mxu0 %v9974_v57  ;;  %v7854_v20 = vcombine.low %v11182_v28, %v11185_v55  ;;  %v4200_v49 = vrot.slane %v4198_v4, 5  ;;  %v1466_v27 = vrot.slane %v1465_v12, 4  ;;  %v9979_v29 = vld [vmem:[#allocation9 + $0x20] sm:$0xff]   ;;  %v4211_v30 = vrot.slane %v4209_v7, 4  ;;  %v11307_v28 = vld [vmem:[%s11174_s0 + $0x2c] sm:$0x1] }
 0x338   : > { %9215 = vmatprep.subr.bf16.mxu1 %v9980_v59  ;;  %v1457_v26 = vsel %vm11217_vm14, %v1452_v6, %v1456_v2  ;;  %8919 = vmatprep.subr.bf16.mxu0 %v9977_v43  ;;  %v4212_v31 = vshll.u32 %v8115_v50, 16  ;;  %v4218_v57 = vshll.u32 %v11295_v14, 16  ;;  %v4223_v55 = vshrl.u32 %v8117_v16, 16  ;;  %v11321_v0 = vld [vmem:[%s11174_s0 + $0x3c] sm:$0x1]  ;;  %v9983_v12 = vld [vmem:[#allocation9 + $0x30] sm:$0xff]  }
 0x339   : > { %8909 = vmatprep.mubr.bf16.mxu0 %v7844_v18  ;;  %v4201_v33 = vor.u32 %v4200_v49, %v4197_v15  ;;  %v4226_v46 = vshll.u32 %v8117_v16, 16  ;;  %v1471_v34 = vsel %vm11217_vm14, %v1466_v27, %v1470_v19  ;;  %v4206_v35 = vrot.slane %v4204_v5, 5  ;;  %v8137_v19 = vld [vmem:[%s11174_s0 + $0x8] sm:$0xe] }
 0x33a   : > { %v4214_v36 = vrot.slane %v4212_v31, 5  ;;  %v4237_v38 = vshrl.u32 %v8119_v25, 16  ;;  %v7845_v41 = vcombine.low %v1457_v26, %v1471_v34  ;;  %v4225_v45 = vrot.slane %v4223_v55, 4 }
 0x33b   : > { %9216 = vmatpush3.bf16.msra.mxu1 %v9980_v59  ;;  %8920 = vmatpush3.bf16.msra.mxu0 %v9977_v43  ;;  %v4202_v42 = vrot.slane %v4201_v33, 4  ;;  %v4228_v50 = vrot.slane %v4226_v46, 5  ;;  %v4232_v23 = vshll.u32 %v11307_v28, 16  ;;  %v4240_v59 = vshll.u32 %v8119_v25, 16 }
 0x33c   : > { %9225 = vmatprep.subr.bf16.mxu1 %v11300_v22  ;;  %8921 = vmatprep.subr.bf16.mxu0 %v9979_v29  ;;  %v4215_v52 = vor.u32 %v4214_v36, %v4211_v30  ;;  %v4239_v54 = vrot.slane %v4237_v38, 4  ;;  %v4220_v62 = vrot.slane %v4218_v57, 5  ;;  %v4251_v2 = vshrl.u32 %v8121_v39, 16  ;;  %v9984_v30 = vld [vmem:[#allocation9 + $0x388] sm:$0xff]  }
 0x33d   : > { %8910 = vmatmul.mubr.bf16.gmra.mrb[12].mxu0 %v7845_v41  ;;  %v4207_v63 = vsel %vm11217_vm14, %v4202_v42, %v4206_v35  ;;  %v4229_v43 = vor.u32 %v4228_v50, %v4225_v45  ;;  %v4242_v5 = vrot.slane %v4240_v59, 5  ;;  %v4246_v7 = vshll.u32 %v11314_v44, 16  ;;  %v9985_v45 = vld [vmem:[#allocation9 + $0x38] sm:$0xff]  }
 0x33e   : > { %8929 = vmatprep.mubr.bf16.mxu0 %v7854_v20  ;;  %v4216_v4 = vrot.slane %v4215_v52, 4  ;;  %v4254_v6 = vshll.u32 %v8121_v39, 16  ;;  %v4253_v16 = vrot.slane %v4251_v2, 4  ;;  %v4265_v18 = vshrl.u32 %v8123_v61, 16  ;;  %v10205_v52 = vld [vmem:[#allocation11 + $0x30] sm:$0xff]  }
 0x33f   : > { %8922 = vmatpush3.bf16.msra.mxu0 %v9979_v29  ;;  %v4230_v15 = vrot.slane %v4229_v43, 4  ;;  %v4234_v25 = vrot.slane %v4232_v23, 5  ;;  %v4243_v20 = vor.u32 %v4242_v5, %v4239_v54  ;;  %v4260_v31 = vshll.u32 %v11321_v0, 16  ;;  %v8138_v29 = vld [vmem:[%s11174_s0 + $0x10] sm:$0xe]  ;;  %v9990_v5 = vld [vmem:[#allocation9 + $0x398] sm:$0xff]  }
 0x340   : > { %8923 = vmatprep.subr.bf16.mxu0 %v9981_v51  ;;  %v4221_v49 = vsel %vm11217_vm14, %v4216_v4, %v4220_v62  ;;  %v4256_v26 = vrot.slane %v4254_v6, 5  ;;  %v4267_v33 = vrot.slane %v4265_v18, 4  ;;  %v4268_v57 = vshll.u32 %v8123_v61, 16  ;;  %v9986_v61 = vld [vmem:[#allocation9 + $0x390] sm:$0xff]   ;;  %v9988_v43 = vld [vmem:[#allocation9 + $0x80] sm:$0xff]  }
 0x341   : > { %v8126_v27 = vcombine.low %v4207_v63, %v4221_v49  ;;  %v4235_v55 = vsel %vm11217_vm14, %v4230_v15, %v4234_v25  ;;  %v4244_v46 = vrot.slane %v4243_v20, 4  ;;  %v4248_v34 = vrot.slane %v4246_v7, 5  ;;  %v1755_v7 = vld [vmem:[%s11179_s28] sm:$0xe]  ;;  %v1758_v18 = vld [vmem:[%s11179_s28 + $0x18] sm:$0xe] }
 0x342   : > { %v4257_v35 = vor.u32 %v4256_v26, %v4253_v16  ;;  %v4270_v36 = vrot.slane %v4268_v57, 5  ;;  %v4274_v38 = vshll.u32 %v11325_v10, 16  ;;  %v8145_v39 = vrot.slane %v8137_v19, 9  ;;  %v1756_v16 = vld [vmem:[%s11179_s28 + $0x8] sm:$0xe]  ;;  %v9991_v49 = vld [vmem:[#allocation9 + $0x88] sm:$0xff]  }
 0x343   : > { %8924 = vmatpush3.bf16.msra.mxu0 %v9981_v51  ;;  %9218 = vmatmul.mubr.bf16.vlgmr.msra.gmra.mrb[0].mxu1 %v8126_v27  ;;  %v4458_v41 = vrot.slane %v11226_v24, 5  ;;  %v4249_v42 = vsel %vm11217_vm14, %v4244_v46, %v4248_v34  ;;  %v8146_v51 = vrot.slane %v8138_v29, 9  ;;  %v4462_v23 = vrot.slane %v11235_v37, 5  ;;  %v9995_v29 = vld [vmem:[#allocation9 + $0x3a8] sm:$0xff]   ;;  %v9996_v46 = vld [vmem:[#allocation9 + $0x98] sm:$0xff]  }
 0x344   : > { %8925 = vmatprep.subr.bf16.mxu0 %v9983_v12  ;;  %9226 = vmatpush3.bf16.msra.mxu1 %v11300_v22  ;;  %v4258_v50 = vrot.slane %v4257_v35, 4  ;;  %v8127_v54 = vcombine.low %v4235_v55, %v4249_v42  ;;  %v4262_v24 = vrot.slane %v4260_v31, 5  ;;  %v4271_v59 = vor.u32 %v4270_v36, %v4267_v33  ;;  %v9997_v35 = vld [vmem:[#allocation9 + $0x3b0] sm:$0xff]   ;;  %v9998_v36 = vld [vmem:[#allocation9 + $0xa0] sm:$0xff]  }
 0x345   : > { %9227 = vmatprep.subr.bf16.mxu1 %v9984_v30  ;;  %v4276_v62 = vrot.slane %v4274_v38, 5  ;;  %v4459_v37 = vsel %vm11341_vm1, %v8145_v39, %v4458_v41  ;;  %v4463_v2 = vsel %vm11341_vm1, %v8146_v51, %v4462_v23  ;;  %v7855_v19 = vcombine.low %v11202_v8, %v11205_v9  ;;  %v8139_v38 = vld [vmem:[%s11174_s0 + $0x18] sm:$0xe]  ;;  %v8140_v39 = vld [vmem:[%s11174_s0 + $0x20] sm:$0xe] }
 0x346   : > { %9221 = vmatprep.mubr.bf16.mxu1 %v8127_v54  ;;  %v4263_v22 = vsel %vm11217_vm14, %v4258_v50, %v4262_v24  ;;  %v4272_v63 = vrot.slane %v4271_v59, 4  ;;  %v8153_v15 = vcombine.low %v4459_v37, %v4463_v2  ;;  %v7856_v25 = vcombine.low %v11239_v40, %v11248_v60  ;;  %v9994_v60 = vld [vmem:[#allocation9 + $0x90] sm:$0xff]   ;;  %v8141_v41 = vld [vmem:[%s11174_s0 + $0x28] sm:$0xe]  ;;  %v8142_v42 = vld [vmem:[%s11174_s0 + $0x30] sm:$0xe] }
 0x347   : > { %8926 = vmatpush3.bf16.msra.mxu0 %v9983_v12  ;;  %v1757_v12 = vld [vmem:[%s11179_s28 + $0x10] sm:$0xe]  ;;  %v7866_v20 = vrot.slane %v1755_v7, 9  ;;  %v1792_v27 = vrot.slane %v11208_v11, 5  ;;  %v1784_v31 = vrot.slane %v11188_v56, 5  ;;  %v7867_v33 = vrot.slane %v1756_v16, 9 }
 0x348   : > { %8927 = vmatprep.subr.bf16.mxu0 %v9985_v45  ;;  %9228 = vmatpush3.bf16.msra.mxu1 %v9984_v30  ;;  %v4277_v4 = vsel %vm11217_vm14, %v4272_v63, %v4276_v62  ;;  %v7868_v26 = vrot.slane %v1757_v12, 9  ;;  %v9992_v30 = vld [vmem:[#allocation9 + $0x3a0] sm:$0xff]   ;;  %v1788_v57 = vrot.slane %v11192_v58, 5  ;;  %v7869_v8 = vrot.slane %v1758_v18, 9  ;;  %v10000_v23 = vld [vmem:[#allocation9 + $0xa8] sm:$0xff]   ;;  %v10004_v18 = vld [vmem:[#allocation9 + $0xb8] sm:$0xff]  }
 0x349   : > { %9229 = vmatprep.subr.bf16.mxu1 %v9986_v61  ;;  %v8128_v6 = vcombine.low %v4263_v22, %v4277_v4  ;;  %v1796_v40 = vrot.slane %v11211_v47, 5  ;;  %v1785_v56 = vsel %vm11341_vm1, %v7866_v20, %v1784_v31  ;;  %v7857_v55 = vcombine.low %v11258_v3, %v11263_v17  ;;  %v9999_v3 = vld [vmem:[#allocation9 + $0x3b8] sm:$0xff]   ;;  %v10001_v22 = vld [vmem:[#allocation9 + $0x3c0] sm:$0xff]   ;;  %v8143_v63 = vld [vmem:[%s11174_s0 + $0x38] sm:$0xe] }
 0x34a   : > { %v11367_v9 = vsel %vm11341_vm1, %v7868_v26, %v1792_v27  ;;  %v1789_v58 = vsel %vm11341_vm1, %v7867_v33, %v1788_v57  ;;  %v8147_v17 = vrot.slane %v8139_v38, 9  ;;  %v8148_v50 = vrot.slane %v8140_v39, 9  ;;  %v10003_v2 = vld [vmem:[#allocation9 + $0x3c8] sm:$0xff]   ;;  %v1760_v16 = vld [vmem:[%s11179_s28 + $0x28] sm:$0xe]  ;;  %v10006_v27 = vld [vmem:[#allocation9 + $0xc0] sm:$0xff]  }
 0x34b   : > { %8928 = vmatpush3.bf16.msra.mxu0 %v9985_v45  ;;  %9222 = vmatmul.mubr.bf16.gmra.mrb[4].mxu1 %v8128_v6  ;;  %v11372_v11 = vsel %vm11341_vm1, %v7869_v8, %v1796_v40  ;;  %v7874_v34 = vcombine.low %v1785_v56, %v1789_v58  ;;  %v4466_v45 = vrot.slane %v11285_v48, 5  ;;  %v4470_v51 = vrot.slane %v11295_v14, 5  ;;  %v10008_v33 = vld [vmem:[#allocation9 + $0x3d8] sm:$0xff]   ;;  %v1762_v57 = vld [vmem:[%s11179_s28 + $0x38] sm:$0xe]  ;;  %v10015_v39 = vld [vmem:[#allocation9 + $0x3f0] sm:$0xff]  }
 0x34c   : > { %8937 = vmatprep.subr.bf16.mxu0 %v9988_v43  ;;  %9230 = vmatpush3.bf16.msra.mxu1 %v9986_v61  ;;  %v7875_v47 = vcombine.low %v11367_v9, %v11372_v11  ;;  %v8149_v54 = vrot.slane %v8141_v41, 9  ;;  %v4474_v24 = vrot.slane %v11307_v28, 5  ;;  %v8150_v59 = vrot.slane %v8142_v42, 9  ;;  %v10002_v28 = vld [vmem:[#allocation9 + $0xb0] sm:$0xff]   ;;  %v10007_v8 = vld [vmem:[%s11174_s0 + $0x10] ss:$8 sps:$4 sm:$0xff]  }
 0x34d   : > { %9241 = vmatprep.mubr.bf16.mxu1 %v8153_v15  ;;  %9231 = vmatprep.subr.bf16.mxu1 %v9990_v5  ;;  %v4478_v61 = vrot.slane %v11314_v44, 5  ;;  %v4467_v48 = vsel %vm11341_vm1, %v8147_v17, %v4466_v45  ;;  %v4471_v14 = vsel %vm11341_vm1, %v8148_v50, %v4470_v51  ;;  %v8151_v4 = vrot.slane %v8143_v63, 9  ;;  %v10009_v40 = vld [vmem:[#allocation9 + $0xc8] sm:$0xff]   ;;  %v10014_v11 = vld [vmem:[#allocation9 + $0xd8] sm:$0xff]  }
 0x34e   : > { %8930 = vmatmul.mubr.bf16.vlgmr.msra.gmra.mrb[8].mxu0 %v7855_v19  ;;  %v4475_v44 = vsel %vm11341_vm1, %v8149_v54, %v4474_v24  ;;  %v8154_v37 = vcombine.low %v4467_v48, %v4471_v14  ;;  %v4482_v6 = vrot.slane %v11321_v0, 5  ;;  %v4486_v15 = vrot.slane %v11325_v10, 5  ;;  %v10005_v19 = vld [vmem:[#allocation9 + $0x3d0] sm:$0xff]   ;;  %v8188_v38 = vld [vmem:[%s11174_s0 + $0x18] sm:$0xf]  ;;  %v10017_v50 = vld [vmem:[#allocation9 + $0x3f8] sm:$0xff]  }
 0x34f   : > { %8933 = vmatprep.mubr.bf16.mxu0 %v7856_v25  ;;  %8938 = vmatpush3.bf16.msra.mxu0 %v9988_v43  ;;  %v4479_v62 = vsel %vm11341_vm1, %v8150_v59, %v4478_v61  ;;  %v8144_v43 = vld [vmem:[%s11174_s0 + $0x40] sm:$0xe]  ;;  %v1800_v25 = vrot.slane %v11242_v53, 5  ;;  %v7871_v0 = vrot.slane %v1760_v16, 9  ;;  %v1804_v10 = vrot.slane %v11254_v1, 5  ;;  %v10018_v51 = vld [vmem:[#allocation9 + $0xe8] sm:$0xff]  }
 0x350   : > { %8939 = vmatprep.subr.bf16.mxu0 %v9991_v49  ;;  %9232 = vmatpush3.bf16.msra.mxu1 %v9990_v5  ;;  %v1759_v5 = vld [vmem:[%s11179_s28 + $0x20] sm:$0xe]  ;;  %v8155_v7 = vcombine.low %v4475_v44, %v4479_v62  ;;  %v8152_v12 = vrot.slane %v8144_v43, 9  ;;  %v4483_v20 = vsel %vm11341_vm1, %v8151_v4, %v4482_v6  ;;  %v1761_v53 = vld [vmem:[%s11179_s28 + $0x30] sm:$0xe]  ;;  %v1808_v58 = vrot.slane %v11268_v21, 5 }
 0x351   : > { %9233 = vmatprep.subr.bf16.mxu1 %v9992_v30  ;;  %v1805_v31 = vsel %vm11341_vm1, %v7871_v0, %v1804_v10  ;;  %v4846_v17 = vshrl.u32 %v8188_v38, 16  ;;  %v4849_v45 = vshll.u32 %v8188_v38, 16  ;;  %v10020_v48 = vld [vmem:[#allocation9 + $0x400] sm:$0xff]   ;;  %v11450_v63 = vld [vmem:[%s11174_s0 + $0x1c] sm:$0x1] }
 0x352   : > { %v4487_v26 = vsel %vm11341_vm1, %v8152_v12, %v4486_v15  ;;  %v11447_v14 = vld [vmem:[%s11174_s0 + $0x14] sm:$0x1]  ;;  %v10022_v6 = vld [vmem:[%s11174_s0 + $0x30] ss:$8 sps:$4 sm:$0xff]   ;;  %v10024_v12 = vld [vmem:[#allocation9 + $0xf8] sm:$0xff]   ;;  %v4855_v16 = vshll.u32 %v11450_v63, 16 }
 0x353   : > { %8940 = vmatpush3.bf16.msra.mxu0 %v9991_v49  ;;  %v7870_v49 = vrot.slane %v1759_v5, 9  ;;  %v4848_v59 = vrot.slane %v4846_v17, 4  ;;  %v4851_v61 = vrot.slane %v4849_v45, 5  ;;  %v10019_v5 = vld [vmem:[%s11174_s0 + $0x20] ss:$8 sps:$4 sm:$0xff]   ;;  %v4841_v15 = vshll.u32 %v11447_v14, 16 }
 0x354   : > { %8941 = vmatprep.subr.bf16.mxu0 %v9994_v60  ;;  %9234 = vmatpush3.bf16.msra.mxu1 %v9992_v30  ;;  %v8156_v30 = vcombine.low %v4483_v20, %v4487_v26  ;;  %v8192_v10 = vld [vmem:[%s11174_s0 + $0x28] sm:$0xf]  ;;  %v10031_v38 = vld [vmem:[#allocation9 + $0x108] sm:$0xff]  }
 0x355   : > { %9235 = vmatprep.subr.bf16.mxu1 %v9995_v29  ;;  %v1801_v1 = vsel %vm11341_vm1, %v7870_v49, %v1800_v25 }
 0x356   : > { %8934 = vmatmul.mubr.bf16.gmra.mrb[12].mxu0 %v7857_v55  ;;  %v7876_v56 = vcombine.low %v1801_v1, %v1805_v31  ;;  %v1812_v55 = vrot.slane %v11275_v32, 5  ;;  %v4857_v1 = vrot.slane %v4855_v16, 5  ;;  %v8198_v16 = vld [vmem:[%s11174_s0 + $0x40] sm:$0xf] }
 0x357   : > { %8942 = vmatpush3.bf16.msra.mxu0 %v9994_v60  ;;  %8953 = vmatprep.mubr.bf16.mxu0 %v7874_v34  ;;  %v7872_v60 = vrot.slane %v1761_v53, 9  ;;  %v10011_v34 = vld [vmem:[#allocation9 + $0xd0] sm:$0xff]  }
 0x358   : > { %8943 = vmatprep.subr.bf16.mxu0 %v9996_v46  ;;  %9236 = vmatpush3.bf16.msra.mxu1 %v9995_v29  ;;  %v7873_v29 = vrot.slane %v1762_v57, 9  ;;  %v10026_v53 = vld [vmem:[#allocation9 + $0x410] sm:$0xff]  }
 0x359   : > { %9237 = vmatprep.subr.bf16.mxu1 %v9997_v35  ;;  %v1809_v21 = vsel %vm11341_vm1, %v7872_v60, %v1808_v58  ;;  %v10028_v60 = vld [vmem:[#allocation9 + $0x100] sm:$0xff]  }
 0x35a   : > { %v1813_v32 = vsel %vm11341_vm1, %v7873_v29, %v1812_v55 }
 0x35b   : > { %8944 = vmatpush3.bf16.msra.mxu0 %v9996_v46  ;;  %v10010_v46 = vld [vmem:[#allocation9 + $0x3e0] sm:$0xff]   ;;  %v7877_v9 = vcombine.low %v1809_v21, %v1813_v32 }
 0x35c   : > { %8945 = vmatprep.subr.bf16.mxu0 %v9998_v36  ;;  %9238 = vmatpush3.bf16.msra.mxu1 %v9997_v35  ;;  %v10013_v35 = vld [vmem:[#allocation9 + $0x3e8] sm:$0xff]  }
 0x35d   : > { %9239 = vmatprep.subr.bf16.mxu1 %v9999_v3 }
 0x35f   : > { %8946 = vmatpush3.bf16.msra.mxu0 %v9998_v36  ;;  %v10012_v36 = vld [vmem:[%s11179_s28 + $0x8] ss:$8 sps:$4 sm:$0xff]  }
 0x360   : > { %8947 = vmatprep.subr.bf16.mxu0 %v10000_v23  ;;  %9240 = vmatpush3.bf16.msra.mxu1 %v9999_v3  ;;  %v10016_v3 = vld [vmem:[#allocation9 + $0xe0] sm:$0xff]  }
 0x361   : > { %9249 = vmatprep.subr.bf16.mxu1 %v10001_v22 }
 0x363   : > { %8948 = vmatpush3.bf16.msra.mxu0 %v10000_v23  ;;  %9242 = vmatmul.mubr.bf16.vlgmr.msra.gmra.mrb[0].mxu1 %v8154_v37  ;;  %v7907_v23 = vld [vmem:[%s11179_s28 + $0x8] sm:$0xf]  ;;  %v10021_v37 = vld [vmem:[#allocation9 + $0xf0] sm:$0xff]  }
 0x364   : > { %8949 = vmatprep.subr.bf16.mxu0 %v10002_v28  ;;  %9245 = vmatprep.mubr.bf16.mxu1 %v8155_v7  ;;  %v2158_v44 = vshrl.u32 %v7907_v23, 16  ;;  %v2161_v62 = vshll.u32 %v7907_v23, 16  ;;  %v10023_v7 = vld [vmem:[#allocation9 + $0x408] sm:$0xff]  }
 0x365   : > { %9250 = vmatpush3.bf16.msra.mxu1 %v10001_v22  ;;  %v7909_v22 = vld [vmem:[%s11179_s28 + $0x10] sm:$0xf] }
 0x366   : > { %9251 = vmatprep.subr.bf16.mxu1 %v10003_v2  ;;  %v2172_v43 = vshrl.u32 %v7909_v22, 16  ;;  %v2175_v4 = vshll.u32 %v7909_v22, 16  ;;  %v2160_v49 = vrot.slane %v2158_v44, 4  ;;  %v2163_v25 = vrot.slane %v2161_v62, 5 }
 0x367   : > { %8950 = vmatpush3.bf16.msra.mxu0 %v10002_v28 }
 0x368   : > { %8951 = vmatprep.subr.bf16.mxu0 %v10004_v18  ;;  %v2174_v0 = vrot.slane %v2172_v43, 4  ;;  %v2177_v26 = vrot.slane %v2175_v4, 5  ;;  %v2164_v29 = vor.u32 %v2163_v25, %v2160_v49  ;;  %v11483_v43 = vld [vmem:[%s11174_s0 + $0x34] sm:$0x1]  ;;  %v8200_v25 = vld [vmem:[%s11174_s0 + $0x48] sm:$0xf] }
 0x369   : > { %9252 = vmatpush3.bf16.msra.mxu1 %v10003_v2  ;;  %v4852_v2 = vor.u32 %v4851_v61, %v4848_v59  ;;  %v10032_v61 = vld [vmem:[#allocation9 + $0x420] sm:$0xff]   ;;  %v4897_v49 = vshll.u32 %v11483_v43, 16 }
 0x36a   : > { %9253 = vmatprep.subr.bf16.mxu1 %v10005_v19  ;;  %v2178_v55 = vor.u32 %v2177_v26, %v2174_v0  ;;  %v2165_v17 = vrot.slane %v2164_v29, 4  ;;  %v11501_v26 = vld [vmem:[%s11174_s0 + $0x3c] sm:$0x1]  ;;  %v7913_v29 = vld [vmem:[%s11179_s28 + $0x20] sm:$0xf] }
 0x36b   : > { %8952 = vmatpush3.bf16.msra.mxu0 %v10004_v18  ;;  %9246 = vmatmul.mubr.bf16.gmra.mrb[4].mxu1 %v8156_v30  ;;  %v8190_v18 = vld [vmem:[%s11174_s0 + $0x20] sm:$0xf]  ;;  %v4853_v20 = vrot.slane %v4852_v2, 4  ;;  %v4843_v30 = vrot.slane %v4841_v15, 5 }
 0x36c   : > { %8961 = vmatprep.subr.bf16.mxu0 %v10006_v27  ;;  %9265 = vmatprep.mubr.bf16.mxu1 %v10007_v8  ;;  %v4860_v31 = vshrl.u32 %v8190_v18, 16  ;;  %v4863_v57 = vshll.u32 %v8190_v18, 16  ;;  %v4874_v8 = vshrl.u32 %v8192_v10, 16  ;;  %v2179_v45 = vrot.slane %v2178_v55, 4  ;;  %v10033_v18 = vld [vmem:[%s11179_s28 + $0x38] ss:$8 sps:$4 sm:$0xff]  }
 0x36d   : > { %9254 = vmatpush3.bf16.msra.mxu1 %v10005_v19  ;;  %v4858_v58 = vsel %vm11217_vm14, %v4853_v20, %v4857_v1  ;;  %v10037_v55 = vld [vmem:[#allocation9 + $0x430] sm:$0xff]  }
 0x36e   : > { %8954 = vmatmul.mubr.bf16.vlgmr.msra.gmra.mrb[8].mxu0 %v7875_v47  ;;  %9255 = vmatprep.subr.bf16.mxu1 %v10008_v33  ;;  %v8186_v47 = vld [vmem:[%s11174_s0 + $0x10] sm:$0xf] }
 0x36f   : > { %8957 = vmatprep.mubr.bf16.mxu0 %v7876_v56  ;;  %8962 = vmatpush3.bf16.msra.mxu0 %v10006_v27  ;;  %v4832_v41 = vshrl.u32 %v8186_v47, 16  ;;  %v4835_v42 = vshll.u32 %v8186_v47, 16  ;;  %v11459_v27 = vld [vmem:[%s11179_s28 + $0xc] sm:$0x1]  ;;  %v10027_v47 = vld [vmem:[%s11179_s28 + $0x18] ss:$8 sps:$4 sm:$0xff]  }
 0x370   : > { %8963 = vmatprep.subr.bf16.mxu0 %v10009_v40  ;;  %v2167_v21 = vshll.u32 %v11459_v27, 16 }
 0x371   : > { %9256 = vmatpush3.bf16.msra.mxu1 %v10008_v33  ;;  %v4834_v54 = vrot.slane %v4832_v41, 4  ;;  %v4837_v24 = vrot.slane %v4835_v42, 5  ;;  %v11462_v33 = vld [vmem:[%s11179_s28 + $0x14] sm:$0x1]  ;;  %v4876_v41 = vrot.slane %v4874_v8, 4 }
 0x372   : > { %9257 = vmatprep.subr.bf16.mxu1 %v10010_v46  ;;  %v2181_v32 = vshll.u32 %v11462_v33, 16  ;;  %v2169_v22 = vrot.slane %v2167_v21, 5  ;;  %v7911_v8 = vld [vmem:[%s11179_s28 + $0x18] sm:$0xf]  ;;  %v4911_v21 = vshll.u32 %v11501_v26, 16 }
 0x373   : > { %8964 = vmatpush3.bf16.msra.mxu0 %v10009_v40  ;;  %v4838_v28 = vor.u32 %v4837_v24, %v4834_v54  ;;  %v4877_v40 = vshll.u32 %v8192_v10, 16 }
 0x374   : > { %8965 = vmatprep.subr.bf16.mxu0 %v10011_v34  ;;  %v2170_v2 = vsel %vm11217_vm14, %v2165_v17, %v2169_v22 }
 0x375   : > { %9258 = vmatpush3.bf16.msra.mxu1 %v10010_v46  ;;  %v4839_v19 = vrot.slane %v4838_v28, 4  ;;  %v10025_v46 = vld [vmem:[%s11174_s0 + $0x40] ss:$8 sps:$4 sm:$0xff]   ;;  %v4879_v42 = vrot.slane %v4877_v40, 5 }
 0x376   : > { %8958 = vmatmul.mubr.bf16.gmra.mrb[12].mxu0 %v7877_v9  ;;  %9259 = vmatprep.subr.bf16.mxu1 %v10013_v35  ;;  %v8194_v9 = vld [vmem:[%s11174_s0 + $0x30] sm:$0xf] }
 0x377   : > { %8966 = vmatpush3.bf16.msra.mxu0 %v10011_v34  ;;  %8977 = vmatprep.mubr.bf16.mxu0 %v10012_v36  ;;  %v4844_v56 = vsel %vm11217_vm14, %v4839_v19, %v4843_v30  ;;  %v10030_v34 = vld [vmem:[#allocation9 + $0x418] sm:$0xff]   ;;  %v4888_v23 = vshrl.u32 %v8194_v9, 16  ;;  %v4891_v54 = vshll.u32 %v8194_v9, 16  ;;  %v4880_v62 = vor.u32 %v4879_v42, %v4876_v41  ;;  %v10035_v19 = vld [vmem:[#allocation9 + $0x428] sm:$0xff]  }
 0x378   : > { %8967 = vmatprep.subr.bf16.mxu0 %v10014_v11  ;;  %v8202_v36 = vcombine.low %v4844_v56, %v4858_v58  ;;  %v10036_v30 = vld [vmem:[#allocation9 + $0x118] sm:$0xff]   ;;  %v4930_v56 = vshrl.u32 %v8200_v25, 16  ;;  %v4933_v58 = vshll.u32 %v8200_v25, 16  ;;  %v2186_v9 = vshrl.u32 %v7911_v8, 16  ;;  %v7919_v25 = vld [vmem:[%s11179_s28 + $0x38] sm:$0xf] }
 0x379   : > { %9260 = vmatpush3.bf16.msra.mxu1 %v10013_v35  ;;  %v4862_v35 = vrot.slane %v4860_v31, 4  ;;  %v11498_v20 = vrot.slane %v4880_v62, 4  ;;  %v4916_v31 = vshrl.u32 %v8198_v16, 16  ;;  %v2200_v42 = vshrl.u32 %v7913_v29, 16 }
 0x37a   : > { %9261 = vmatprep.subr.bf16.mxu1 %v10015_v39 }
 0x37b   : > { %8968 = vmatpush3.bf16.msra.mxu0 %v10014_v11  ;;  %v8196_v11 = vld [vmem:[%s11174_s0 + $0x38] sm:$0xf] }
 0x37c   : > { %8969 = vmatprep.subr.bf16.mxu0 %v10016_v3  ;;  %v4902_v24 = vshrl.u32 %v8196_v11, 16  ;;  %v4905_v59 = vshll.u32 %v8196_v11, 16  ;;  %v2189_v11 = vshll.u32 %v7911_v8, 16  ;;  %v11538_v8 = vld [vmem:[%s11179_s28 + $0x24] sm:$0x1] }
 0x37d   : > { %9262 = vmatpush3.bf16.msra.mxu1 %v10015_v39  ;;  %v4865_v39 = vrot.slane %v4863_v57, 5  ;;  %v4919_v57 = vshll.u32 %v8198_v16, 16  ;;  %v10041_v16 = vld [vmem:[#allocation9 + $0x440] sm:$0xff]  }
 0x37e   : > { %9263 = vmatprep.subr.bf16.mxu1 %v10017_v50  ;;  %v4907_v15 = vrot.slane %v4905_v59, 5  ;;  %v10039_v59 = vld [vmem:[#allocation9 + $0x438] sm:$0xff]  }
 0x37f   : > { %8970 = vmatpush3.bf16.msra.mxu0 %v10016_v3  ;;  %v10029_v3 = vld [vmem:[%s11179_s28 + $0x28] ss:$8 sps:$4 sm:$0xff]   ;;  %v4866_v28 = vor.u32 %v4865_v39, %v4862_v35  ;;  %v4918_v39 = vrot.slane %v4916_v31, 4  ;;  %v4921_v41 = vrot.slane %v4919_v57, 5 }
 0x380   : > { %8971 = vmatprep.subr.bf16.mxu0 %v10018_v51 }
 0x381   : > { %9264 = vmatpush3.bf16.msra.mxu1 %v10017_v50  ;;  %v11476_v50 = vld [vmem:[%s11174_s0 + $0x24] sm:$0x1]  ;;  %v11494_v0 = vrot.slane %v4866_v28, 4 }
 0x382   : > { %9273 = vmatprep.subr.bf16.mxu1 %v10020_v48  ;;  %v4869_v44 = vshll.u32 %v11476_v50, 16 }
 0x383   : > { %8972 = vmatpush3.bf16.msra.mxu0 %v10018_v51  ;;  %v11479_v51 = vld [vmem:[%s11174_s0 + $0x2c] sm:$0x1] }
 0x384   : > { %9266 = vmatmul.mubr.bf16.vlgmr.msra.gmra.mrb[0].mxu1 %v10019_v5  ;;  %8973 = vmatprep.subr.bf16.mxu0 %v10021_v37  ;;  %v4883_v5 = vshll.u32 %v11479_v51, 16  ;;  %v11496_v10 = vrot.slane %v4869_v44, 5  ;;  %v4913_v44 = vrot.slane %v4911_v21, 5  ;;  %v8215_v21 = vld [vmem:[%s11174_s0 + $0x18] sm:$0xe] }
 0x385   : > { %9269 = vmatprep.mubr.bf16.mxu1 %v10022_v6  ;;  %9274 = vmatpush3.bf16.msra.mxu1 %v10020_v48  ;;  %v2183_v48 = vrot.slane %v2181_v32, 5  ;;  %v4893_v6 = vrot.slane %v4891_v54, 5  ;;  %v4932_v54 = vrot.slane %v4930_v56, 4  ;;  %v8214_v56 = vld [vmem:[%s11174_s0 + $0x10] sm:$0xe] }
 0x386   : > { %9275 = vmatprep.subr.bf16.mxu1 %v10023_v7  ;;  %v11503_v1 = vrot.slane %v4883_v5, 5  ;;  %v4872_v32 = vsel %vm11217_vm14, %v11494_v0, %v11496_v10  ;;  %v4922_v5 = vor.u32 %v4921_v41, %v4918_v39  ;;  %v10042_v0 = vld [vmem:[#allocation9 + $0x130] sm:$0xff]   ;;  %v2209_v41 = vshll.u32 %v11538_v8, 16 }
 0x387   : > { %8974 = vmatpush3.bf16.msra.mxu0 %v10021_v37  ;;  %v10034_v37 = vld [vmem:[#allocation9 + $0x110] sm:$0xff]   ;;  %v2184_v4 = vsel %vm11217_vm14, %v2179_v45, %v2183_v48 }
 0x388   : > { %8975 = vmatprep.subr.bf16.mxu0 %v10024_v12  ;;  %v4886_v35 = vsel %vm11217_vm14, %v11498_v20, %v11503_v1  ;;  %v7921_v1 = vld [vmem:[%s11179_s28 + $0x40] sm:$0xf] }
 0x389   : > { %9276 = vmatpush3.bf16.msra.mxu1 %v10023_v7  ;;  %v4890_v7 = vrot.slane %v4888_v23, 4  ;;  %v11522_v23 = vld [vmem:[%s11174_s0 + $0x4c] sm:$0x1]  ;;  %v8203_v31 = vcombine.low %v4872_v32, %v4886_v35  ;;  %v2245_v32 = vshll.u32 %v7919_v25, 16  ;;  %v2256_v35 = vshrl.u32 %v7921_v1, 16 }
 0x38a   : > { %9277 = vmatprep.subr.bf16.mxu1 %v10026_v53 }
 0x38b   : > { %8976 = vmatpush3.bf16.msra.mxu0 %v10024_v12  ;;  %v4904_v12 = vrot.slane %v4902_v24, 4  ;;  %v4894_v40 = vor.u32 %v4893_v6, %v4890_v7  ;;  %v4935_v24 = vrot.slane %v4933_v58, 5  ;;  %v4939_v7 = vshll.u32 %v11522_v23, 16  ;;  %v11527_v6 = vld [vmem:[%s11179_s28 + $0x1c] sm:$0x1] }
 0x38c   : > { %9270 = vmatmul.mubr.bf16.gmra.mrb[4].mxu1 %v10025_v46  ;;  %8985 = vmatprep.subr.bf16.mxu0 %v10028_v60  ;;  %v10038_v46 = vld [vmem:[#allocation9 + $0x120] sm:$0xff]  }
 0x38d   : > { %9278 = vmatpush3.bf16.msra.mxu1 %v10026_v53  ;;  %9289 = vmatprep.mubr.bf16.mxu1 %v8202_v36  ;;  %v7923_v53 = vcombine.low %v2170_v2, %v2184_v4  ;;  %v7917_v36 = vld [vmem:[%s11179_s28 + $0x30] sm:$0xf]  ;;  %v4895_v17 = vrot.slane %v4894_v40, 4  ;;  %v2191_v2 = vrot.slane %v2189_v11, 5  ;;  %v10040_v4 = vld [vmem:[#allocation9 + $0x128] sm:$0xff]  }
 0x38e   : > { %8978 = vmatmul.mubr.bf16.vlgmr.msra.gmra.mrb[8].mxu0 %v10027_v47  ;;  %9279 = vmatprep.subr.bf16.mxu1 %v10030_v34  ;;  %v7915_v47 = vld [vmem:[%s11179_s28 + $0x28] sm:$0xf]  ;;  %v2228_v48 = vshrl.u32 %v7917_v36, 16  ;;  %v2231_v28 = vshll.u32 %v7917_v36, 16  ;;  %v11547_v11 = vld [vmem:[%s11179_s28 + $0x34] sm:$0x1] }
 0x38f   : > { %8981 = vmatprep.mubr.bf16.mxu0 %v10029_v3  ;;  %8986 = vmatpush3.bf16.msra.mxu0 %v10028_v60  ;;  %v4908_v60 = vor.u32 %v4907_v15, %v4904_v12  ;;  %v2203_v3 = vshll.u32 %v7913_v29, 16  ;;  %v2217_v22 = vshll.u32 %v7915_v47, 16  ;;  %v2202_v12 = vrot.slane %v2200_v42, 4  ;;  %v10043_v36 = vld [vmem:[#allocation9 + $0x448] sm:$0xff]  }
 0x390   : > { %8987 = vmatprep.subr.bf16.mxu0 %v10031_v38  ;;  %v4923_v29 = vrot.slane %v4922_v5, 4 }
 0x391   : > { %9280 = vmatpush3.bf16.msra.mxu1 %v10030_v34  ;;  %v4899_v34 = vrot.slane %v4897_v49, 5  ;;  %v4909_v45 = vrot.slane %v4908_v60, 4  ;;  %v2205_v15 = vrot.slane %v2203_v3, 5  ;;  %v4936_v49 = vor.u32 %v4935_v24, %v4932_v54 }
 0x392   : > { %9281 = vmatprep.subr.bf16.mxu1 %v10032_v61  ;;  %v2219_v20 = vrot.slane %v2217_v22, 5  ;;  %v2195_v60 = vshll.u32 %v11527_v6, 16  ;;  %v5123_v54 = vrot.slane %v11447_v14, 5  ;;  %v8223_v24 = vrot.slane %v8215_v21, 9  ;;  %v10045_v14 = vld [vmem:[#allocation9 + $0x450] sm:$0xff]  }
 0x393   : > { %8988 = vmatpush3.bf16.msra.mxu0 %v10031_v38  ;;  %v11519_v38 = vld [vmem:[%s11174_s0 + $0x44] sm:$0x1]  ;;  %v4937_v39 = vrot.slane %v4936_v49, 4  ;;  %v5127_v22 = vrot.slane %v11450_v63, 5 }
 0x394   : > { %8989 = vmatprep.subr.bf16.mxu0 %v10034_v37  ;;  %v4925_v62 = vshll.u32 %v11519_v38, 16 }
 0x395   : > { %9282 = vmatpush3.bf16.msra.mxu1 %v10032_v61  ;;  %v2214_v61 = vshrl.u32 %v7915_v47, 16  ;;  %v2259_v47 = vshll.u32 %v7921_v1, 16 }
 0x396   : > { %8982 = vmatmul.mubr.bf16.gmra.mrb[12].mxu0 %v10033_v18  ;;  %9283 = vmatprep.subr.bf16.mxu1 %v10035_v19  ;;  %v4900_v18 = vsel %vm11217_vm14, %v4895_v17, %v4899_v34  ;;  %v11535_v57 = vrot.slane %v4925_v62, 5  ;;  %v2206_v34 = vor.u32 %v2205_v15, %v2202_v12  ;;  %v2247_v62 = vrot.slane %v2245_v32, 5 }
 0x397   : > { %8990 = vmatpush3.bf16.msra.mxu0 %v10034_v37  ;;  %9001 = vmatprep.mubr.bf16.mxu0 %v7923_v53  ;;  %v2188_v37 = vrot.slane %v2186_v9, 4  ;;  %v2216_v10 = vrot.slane %v2214_v61, 4  ;;  %v2230_v53 = vrot.slane %v2228_v48, 4  ;;  %v11544_v9 = vld [vmem:[%s11179_s28 + $0x2c] sm:$0x1]  ;;  %v2197_v12 = vrot.slane %v2195_v60, 5 }
 0x398   : > { %8991 = vmatprep.subr.bf16.mxu0 %v10036_v30  ;;  %v2207_v61 = vrot.slane %v2206_v34, 4  ;;  %v2223_v48 = vshll.u32 %v11544_v9, 16  ;;  %v4928_v63 = vsel %vm11217_vm14, %v4923_v29, %v11535_v57  ;;  %v2211_v15 = vrot.slane %v2209_v41, 5  ;;  %v10047_v60 = vld [vmem:[#allocation9 + $0x458] sm:$0xff]   ;;  %v7936_v34 = vld [vmem:[%s11179_s28 + $0x10] sm:$0xe] }
 0x399   : > { %9284 = vmatpush3.bf16.msra.mxu1 %v10035_v19  ;;  %v4914_v19 = vsel %vm11217_vm14, %v4909_v45, %v4913_v44  ;;  %v2192_v40 = vor.u32 %v2191_v2, %v2188_v37  ;;  %v2220_v42 = vor.u32 %v2219_v20, %v2216_v10  ;;  %v8222_v45 = vrot.slane %v8214_v56, 9  ;;  %v11567_v10 = vld [vmem:[%s11179_s28 + $0x44] sm:$0x1] }
 0x39a   : > { %9285 = vmatprep.subr.bf16.mxu1 %v10037_v55  ;;  %v8204_v58 = vcombine.low %v4900_v18, %v4914_v19  ;;  %v2258_v37 = vrot.slane %v2256_v35, 4  ;;  %v2261_v2 = vrot.slane %v2259_v47, 5  ;;  %v5128_v19 = vsel %vm11341_vm1, %v8223_v24, %v5127_v22 }
 0x39b   : > { %8992 = vmatpush3.bf16.msra.mxu0 %v10036_v30  ;;  %v2233_v30 = vrot.slane %v2231_v28, 5  ;;  %v2193_v17 = vrot.slane %v2192_v40, 4  ;;  %v2237_v28 = vshll.u32 %v11547_v11, 16  ;;  %v5124_v18 = vsel %vm11341_vm1, %v8222_v45, %v5123_v54  ;;  %v10050_v54 = vld [vmem:[#allocation9 + $0x150] sm:$0xff]  }
 0x39c   : > { %8993 = vmatprep.subr.bf16.mxu0 %v10038_v46  ;;  %v2225_v49 = vrot.slane %v2223_v48, 5  ;;  %v2262_v1 = vor.u32 %v2261_v2, %v2258_v37  ;;  %v8230_v56 = vcombine.low %v5124_v18, %v5128_v19  ;;  %v2265_v29 = vshll.u32 %v11567_v10, 16  ;;  %v10052_v48 = vld [vmem:[#allocation9 + $0x158] sm:$0xff]   ;;  %v8216_v37 = vld [vmem:[%s11174_s0 + $0x20] sm:$0xe] }
 0x39d   : > { %9286 = vmatpush3.bf16.msra.mxu1 %v10037_v55  ;;  %v4941_v55 = vrot.slane %v4939_v7, 5  ;;  %v2234_v3 = vor.u32 %v2233_v30, %v2230_v53  ;;  %v2198_v20 = vsel %vm11217_vm14, %v2193_v17, %v2197_v12  ;;  %v2212_v53 = vsel %vm11217_vm14, %v2207_v61, %v2211_v15  ;;  %v10051_v61 = vld [vmem:[#allocation9 + $0x468] sm:$0xff]   ;;  %v8217_v2 = vld [vmem:[%s11174_s0 + $0x28] sm:$0xe] }
 0x39e   : > { %9287 = vmatprep.subr.bf16.mxu1 %v10039_v59  ;;  %v7924_v21 = vcombine.low %v2198_v20, %v2212_v53  ;;  %v2263_v47 = vrot.slane %v2262_v1, 4  ;;  %v2449_v41 = vrot.slane %v11459_v27, 5  ;;  %v2267_v45 = vrot.slane %v2265_v29, 5  ;;  %v10057_v20 = vld [vmem:[#allocation9 + $0x480] sm:$0xff]   ;;  %v10058_v53 = vld [vmem:[#allocation9 + $0x170] sm:$0xff]  }
 0x39f   : > { %8994 = vmatpush3.bf16.msra.mxu0 %v10038_v46  ;;  %v2242_v46 = vshrl.u32 %v7919_v25, 16  ;;  %v2235_v5 = vrot.slane %v2234_v3, 4  ;;  %v4942_v7 = vsel %vm11217_vm14, %v4937_v39, %v4941_v55  ;;  %v2239_v25 = vrot.slane %v2237_v28, 5  ;;  %v7935_v55 = vld [vmem:[%s11179_s28 + $0x8] sm:$0xe] }
 0x3a0   : > { %8995 = vmatprep.subr.bf16.mxu0 %v10040_v4  ;;  %v7943_v39 = vrot.slane %v7935_v55, 9  ;;  %v2453_v3 = vrot.slane %v11462_v33, 5  ;;  %v8225_v12 = vrot.slane %v8217_v2, 9  ;;  %v5135_v15 = vrot.slane %v11479_v51, 5  ;;  %v8221_v1 = vld [vmem:[%s11174_s0 + $0x48] sm:$0xe] }
 0x3a1   : > { %9288 = vmatpush3.bf16.msra.mxu1 %v10039_v59  ;;  %v10044_v59 = vld [vmem:[#allocation9 + $0x138] sm:$0xff]   ;;  %v2244_v44 = vrot.slane %v2242_v46, 4  ;;  %v2240_v40 = vsel %vm11217_vm14, %v2235_v5, %v2239_v25  ;;  %v10048_v46 = vld [vmem:[#allocation9 + $0x148] sm:$0xff]   ;;  %v5139_v19 = vrot.slane %v11483_v43, 5  ;;  %v5143_v25 = vrot.slane %v11501_v26, 5 }
 0x3a2   : > { %9297 = vmatprep.subr.bf16.mxu1 %v10041_v16  ;;  %v2450_v27 = vsel %vm11341_vm1, %v7943_v39, %v2449_v41  ;;  %v10055_v5 = vld [vmem:[#allocation9 + $0x478] sm:$0xff]   ;;  %v5136_v51 = vsel %vm11341_vm1, %v8225_v12, %v5135_v15  ;;  %v5147_v55 = vrot.slane %v11519_v38, 5  ;;  %v2461_v39 = vrot.slane %v11538_v8, 5  ;;  %v10061_v41 = vld [vmem:[#allocation9 + $0x490] sm:$0xff]   ;;  %v10068_v12 = vld [vmem:[%s11179_s28 + $0x10] ss:$8 sps:$4 sm:$0xff]  }
 0x3a3   : > { %8996 = vmatpush3.bf16.msra.mxu0 %v10040_v4  ;;  %v2221_v4 = vrot.slane %v2220_v42, 4  ;;  %v2248_v30 = vor.u32 %v2247_v62, %v2244_v44  ;;  %v7944_v42 = vrot.slane %v7936_v34, 9  ;;  %v10053_v44 = vld [vmem:[#allocation9 + $0x470] sm:$0xff]   ;;  %v10054_v62 = vld [vmem:[#allocation9 + $0x160] sm:$0xff]   ;;  %v8229_v34 = vrot.slane %v8221_v1, 9 }
 0x3a4   : > { %9290 = vmatmul.mubr.bf16.vlgmr.msra.gmra.mrb[0].mxu1 %v8203_v31  ;;  %8997 = vmatprep.subr.bf16.mxu0 %v10042_v0  ;;  %v8205_v31 = vcombine.low %v4928_v63, %v4942_v7  ;;  %v8224_v63 = vrot.slane %v8216_v37, 9  ;;  %v5131_v7 = vrot.slane %v11476_v50, 5  ;;  %v2465_v38 = vrot.slane %v11544_v9, 5  ;;  %v5494_v15 = vld [vmem:[%s11439_s13] sm:$0xf] }
 0x3a5   : > { %9293 = vmatprep.mubr.bf16.mxu1 %v8204_v58  ;;  %9298 = vmatpush3.bf16.msra.mxu1 %v10041_v16  ;;  %v10046_v16 = vld [vmem:[#allocation9 + $0x140] sm:$0xff]   ;;  %v2226_v57 = vsel %vm11217_vm14, %v2221_v4, %v2225_v49  ;;  %v2249_v35 = vrot.slane %v2248_v30, 4  ;;  %v2454_v33 = vsel %vm11341_vm1, %v7944_v42, %v2453_v3  ;;  %v8219_v4 = vld [vmem:[%s11174_s0 + $0x38] sm:$0xe]  ;;  %v8220_v30 = vld [vmem:[%s11174_s0 + $0x40] sm:$0xe] }
 0x3a6   : > { %9299 = vmatprep.subr.bf16.mxu1 %v10043_v36  ;;  %v7925_v32 = vcombine.low %v2226_v57, %v2240_v40  ;;  %v7951_v28 = vcombine.low %v2450_v27, %v2454_v33  ;;  %v8227_v49 = vrot.slane %v8219_v4, 9  ;;  %v5132_v50 = vsel %vm11341_vm1, %v8224_v63, %v5131_v7  ;;  %v10059_v40 = vld [vmem:[#allocation9 + $0x488] sm:$0xff]   ;;  %v10064_v27 = vld [vmem:[#allocation9 + $0x498] sm:$0xff]   ;;  %v7942_v33 = vld [vmem:[%s11179_s28 + $0x40] sm:$0xe] }
 0x3a7   : > { %8998 = vmatpush3.bf16.msra.mxu0 %v10042_v0  ;;  %v11564_v0 = vld [vmem:[%s11179_s28 + $0x3c] sm:$0x1]  ;;  %v8231_v57 = vcombine.low %v5132_v50, %v5136_v51  ;;  %v7950_v37 = vrot.slane %v7942_v33, 9  ;;  %v2477_v2 = vrot.slane %v11567_v10, 5  ;;  %v10067_v4 = vld [vmem:[#allocation9 + $0x190] sm:$0xff]   ;;  %v10070_v7 = vld [vmem:[#allocation9 + $0x198] sm:$0xff]  }
 0x3a8   : > { %8999 = vmatprep.subr.bf16.mxu0 %v10044_v59  ;;  %v2251_v58 = vshll.u32 %v11564_v0, 16  ;;  %v5144_v26 = vsel %vm11341_vm1, %v8227_v49, %v5143_v25  ;;  %v10069_v63 = vld [vmem:[#allocation9 + $0x4a8] sm:$0xff]   ;;  %v5511_v49 = vshrl.u32 %v5494_v15, 16  ;;  %v5514_v25 = vshll.u32 %v5494_v15, 16  ;;  %v10073_v51 = vld [vmem:[#allocation9 + $0x4b8] sm:$0xff]  }
 0x3a9   : > { %9300 = vmatpush3.bf16.msra.mxu1 %v10043_v36  ;;  %v10049_v36 = vld [vmem:[#allocation9 + $0x460] sm:$0xff]  }
 0x3aa   : > { %9301 = vmatprep.subr.bf16.mxu1 %v10045_v14  ;;  %v2253_v17 = vrot.slane %v2251_v58, 5  ;;  %v7939_v58 = vld [vmem:[%s11179_s28 + $0x28] sm:$0xe] }
 0x3ab   : > { %9000 = vmatpush3.bf16.msra.mxu0 %v10044_v59  ;;  %v2268_v59 = vsel %vm11217_vm14, %v2263_v47, %v2267_v45  ;;  %v2457_v47 = vrot.slane %v11527_v6, 5  ;;  %v7947_v42 = vrot.slane %v7939_v58, 9  ;;  %v10062_v45 = vld [vmem:[#allocation9 + $0x180] sm:$0xff]  }
 0x3ac   : > { %9294 = vmatmul.mubr.bf16.gmra.mrb[4].mxu1 %v8205_v31  ;;  %9009 = vmatprep.subr.bf16.mxu0 %v10046_v16  ;;  %v2254_v24 = vsel %vm11217_vm14, %v2249_v35, %v2253_v17  ;;  %v7937_v31 = vld [vmem:[%s11179_s28 + $0x18] sm:$0xe] }
 0x3ad   : > { %9302 = vmatpush3.bf16.msra.mxu1 %v10045_v14  ;;  %9313 = vmatprep.mubr.bf16.mxu1 %v8230_v56  ;;  %v7926_v22 = vcombine.low %v2254_v24, %v2268_v59  ;;  %v8218_v14 = vld [vmem:[%s11174_s0 + $0x30] sm:$0xe]  ;;  %v7938_v56 = vld [vmem:[%s11179_s28 + $0x20] sm:$0xe]  ;;  %v7945_v35 = vrot.slane %v7937_v31, 9 }
 0x3ae   : > { %9002 = vmatmul.mubr.bf16.vlgmr.msra.gmra.mrb[8].mxu0 %v7924_v21  ;;  %9303 = vmatprep.subr.bf16.mxu1 %v10047_v60  ;;  %v8226_v18 = vrot.slane %v8218_v14, 9  ;;  %v5151_v21 = vrot.slane %v11522_v23, 5  ;;  %v2469_v23 = vrot.slane %v11547_v11, 5  ;;  %v2466_v11 = vsel %vm11341_vm1, %v7947_v42, %v2465_v38  ;;  %v10066_v14 = vld [vmem:[#allocation9 + $0x4a0] sm:$0xff]   ;;  %v10080_v42 = vld [vmem:[#allocation9 + $0x1b8] sm:$0xff]  }
 0x3af   : > { %9005 = vmatprep.mubr.bf16.mxu0 %v7925_v32  ;;  %9010 = vmatpush3.bf16.msra.mxu0 %v10046_v16  ;;  %v10056_v16 = vld [vmem:[#allocation9 + $0x168] sm:$0xff]   ;;  %v10060_v32 = vld [vmem:[#allocation9 + $0x178] sm:$0xff]   ;;  %v2458_v8 = vsel %vm11341_vm1, %v7945_v35, %v2457_v47  ;;  %v7984_v31 = vld [vmem:[%s11179_s28 + $0x10] sm:$0xf] }
 0x3b0   : > { %9011 = vmatprep.subr.bf16.mxu0 %v10048_v46  ;;  %v5140_v43 = vsel %vm11341_vm1, %v8226_v18, %v5139_v19  ;;  %v5152_v6 = vsel %vm11341_vm1, %v8229_v34, %v5151_v21  ;;  %v10071_v18 = vld [vmem:[#allocation9 + $0x4b0] sm:$0xff]   ;;  %v10072_v19 = vld [vmem:[#allocation9 + $0x1a0] sm:$0xff]   ;;  %v2823_v58 = vshrl.u32 %v7984_v31, 16  ;;  %v10079_v47 = vld [vmem:[#allocation9 + $0x4c8] sm:$0xff]  }
 0x3b1   : > { %9304 = vmatpush3.bf16.msra.mxu1 %v10047_v60  ;;  %v8228_v60 = vrot.slane %v8220_v30, 9  ;;  %v8232_v29 = vcombine.low %v5140_v43, %v5144_v26  ;;  %v5513_v30 = vrot.slane %v5511_v49, 4  ;;  %v5516_v43 = vrot.slane %v5514_v25, 5  ;;  %v10075_v35 = vld [vmem:[%s11439_s13 + $0x10] ss:$8 sps:$4 sm:$0xff]  }
 0x3b2   : > { %9305 = vmatprep.subr.bf16.mxu1 %v10049_v36  ;;  %v2825_v38 = vrot.slane %v2823_v58, 4  ;;  %v10088_v49 = vld [vmem:[#allocation9 + $0x4e0] sm:$0xff]  }
 0x3b3   : > { %9012 = vmatpush3.bf16.msra.mxu0 %v10048_v46  ;;  %v7940_v46 = vld [vmem:[%s11179_s28 + $0x30] sm:$0xe]  ;;  %v5148_v17 = vsel %vm11341_vm1, %v8228_v60, %v5147_v55  ;;  %v11646_v60 = vld [vmem:[%s11439_s13 + $0x4] sm:$0x1]  ;;  %v5517_v34 = vor.u32 %v5516_v43, %v5513_v30 }
 0x3b4   : > { %9013 = vmatprep.subr.bf16.mxu0 %v10050_v54  ;;  %v7948_v3 = vrot.slane %v7940_v46, 9  ;;  %v8233_v24 = vcombine.low %v5148_v17, %v5152_v6  ;;  %v10077_v55 = vld [vmem:[#allocation9 + $0x1b0] sm:$0xff]  }
 0x3b5   : > { %9306 = vmatpush3.bf16.msra.mxu1 %v10049_v36  ;;  %v7946_v36 = vrot.slane %v7938_v56, 9  ;;  %v11649_v56 = vld [vmem:[%s11439_s13 + $0xc] sm:$0x1] }
 0x3b6   : > { %9006 = vmatmul.mubr.bf16.gmra.mrb[12].mxu0 %v7926_v22  ;;  %9307 = vmatprep.subr.bf16.mxu1 %v10051_v61  ;;  %v2470_v59 = vsel %vm11341_vm1, %v7948_v3, %v2469_v23  ;;  %v5518_v23 = vrot.slane %v5517_v34, 4  ;;  %v10090_v34 = vld [vmem:[#allocation9 + $0x1d0] sm:$0xff]  }
 0x3b7   : > { %9014 = vmatpush3.bf16.msra.mxu0 %v10050_v54  ;;  %9025 = vmatprep.mubr.bf16.mxu0 %v7951_v28  ;;  %v2462_v9 = vsel %vm11341_vm1, %v7946_v36, %v2461_v39  ;;  %v7941_v54 = vld [vmem:[%s11179_s28 + $0x38] sm:$0xe]  ;;  %v5520_v36 = vshll.u32 %v11646_v60, 16  ;;  %v5534_v39 = vshll.u32 %v11649_v56, 16 }
 0x3b8   : > { %9015 = vmatprep.subr.bf16.mxu0 %v10052_v48  ;;  %v7952_v22 = vcombine.low %v2458_v8, %v2462_v9  ;;  %v7949_v28 = vrot.slane %v7941_v54, 9  ;;  %v5498_v8 = vld [vmem:[%s11439_s13 + $0x10] sm:$0xf]  ;;  %v10082_v9 = vld [vmem:[#allocation9 + $0x4d0] sm:$0xff]   ;;  %v11657_v54 = vld [vmem:[%s11179_s28 + $0x14] sm:$0x1] }
 0x3b9   : > { %9308 = vmatpush3.bf16.msra.mxu1 %v10051_v61  ;;  %v10063_v61 = vld [vmem:[%s11439_s13] ss:$8 sps:$4 sm:$0xff]   ;;  %v5539_v33 = vshrl.u32 %v5498_v8, 16 }
 0x3ba   : > { %9309 = vmatprep.subr.bf16.mxu1 %v10053_v44 }
 0x3bb   : > { %9016 = vmatpush3.bf16.msra.mxu0 %v10052_v48  ;;  %v10065_v48 = vld [vmem:[#allocation9 + $0x188] sm:$0xff]  }
 0x3bc   : > { %9017 = vmatprep.subr.bf16.mxu0 %v10054_v62 }
 0x3bd   : > { %9310 = vmatpush3.bf16.msra.mxu1 %v10053_v44  ;;  %v7953_v44 = vcombine.low %v2466_v11, %v2470_v59  ;;  %v5536_v11 = vrot.slane %v5534_v39, 5  ;;  %v11660_v59 = vld [vmem:[%s11179_s28 + $0x1c] sm:$0x1] }
 0x3be   : > { %9311 = vmatprep.subr.bf16.mxu1 %v10055_v5 }
 0x3bf   : > { %9018 = vmatpush3.bf16.msra.mxu0 %v10054_v62  ;;  %v2473_v62 = vrot.slane %v11564_v0, 5  ;;  %v2478_v0 = vsel %vm11341_vm1, %v7950_v37, %v2477_v2  ;;  %v10081_v2 = vld [vmem:[%s11439_s13 + $0x30] ss:$8 sps:$4 sm:$0xff]  }
 0x3c0   : > { %9019 = vmatprep.subr.bf16.mxu0 %v10056_v16 }
 0x3c1   : > { %9312 = vmatpush3.bf16.msra.mxu1 %v10055_v5  ;;  %v2474_v5 = vsel %vm11341_vm1, %v7949_v28, %v2473_v62 }
 0x3c2   : > { %9321 = vmatprep.subr.bf16.mxu1 %v10057_v20  ;;  %v7954_v10 = vcombine.low %v2474_v5, %v2478_v0  ;;  %v5502_v5 = vld [vmem:[%s11439_s13 + $0x20] sm:$0xf] }
 0x3c3   : > { %9020 = vmatpush3.bf16.msra.mxu0 %v10056_v16  ;;  %v5496_v16 = vld [vmem:[%s11439_s13 + $0x8] sm:$0xf]  ;;  %v5570_v30 = vshll.u32 %v5502_v5, 16 }
 0x3c4   : > { %9314 = vmatmul.mubr.bf16.vlgmr.msra.gmra.mrb[0].mxu1 %v8231_v57  ;;  %9021 = vmatprep.subr.bf16.mxu0 %v10058_v53  ;;  %v5528_v50 = vshll.u32 %v5496_v16, 16  ;;  %v7986_v57 = vld [vmem:[%s11179_s28 + $0x18] sm:$0xf]  ;;  %v10083_v0 = vld [vmem:[%s11179_s28 + $0x20] ss:$8 sps:$4 sm:$0xff]  }
 0x3c5   : > { %9317 = vmatprep.mubr.bf16.mxu1 %v8232_v29  ;;  %9322 = vmatpush3.bf16.msra.mxu1 %v10057_v20  ;;  %v5525_v20 = vshrl.u32 %v5496_v16, 16  ;;  %v2826_v29 = vshll.u32 %v7984_v31, 16  ;;  %v2837_v46 = vshrl.u32 %v7986_v57, 16  ;;  %v10085_v16 = vld [vmem:[%s11179_s28 + $0x30] ss:$8 sps:$4 sm:$0xff]  }
 0x3c6   : > { %9323 = vmatprep.subr.bf16.mxu1 %v10059_v40  ;;  %v5530_v1 = vrot.slane %v5528_v50, 5  ;;  %v11675_v50 = vld [vmem:[%s11439_s13 + $0x14] sm:$0x1] }
 0x3c7   : > { %9022 = vmatpush3.bf16.msra.mxu0 %v10058_v53  ;;  %v10074_v53 = vld [vmem:[#allocation9 + $0x1a8] sm:$0xff]   ;;  %v5527_v26 = vrot.slane %v5525_v20, 4  ;;  %v2828_v3 = vrot.slane %v2826_v29, 5  ;;  %v2839_v6 = vrot.slane %v2837_v46, 4  ;;  %v11681_v29 = vld [vmem:[%s11439_s13 + $0x24] sm:$0x1] }
 0x3c8   : > { %9023 = vmatprep.subr.bf16.mxu0 %v10060_v32 }
 0x3c9   : > { %9324 = vmatpush3.bf16.msra.mxu1 %v10059_v40  ;;  %v10076_v40 = vld [vmem:[#allocation9 + $0x4c0] sm:$0xff]   ;;  %v5531_v21 = vor.u32 %v5530_v1, %v5527_v26  ;;  %v2829_v62 = vor.u32 %v2828_v3, %v2825_v38 }
 0x3ca   : > { %9325 = vmatprep.subr.bf16.mxu1 %v10061_v41 }
 0x3cb   : > { %9024 = vmatpush3.bf16.msra.mxu0 %v10060_v32  ;;  %v2840_v32 = vshll.u32 %v7986_v57, 16  ;;  %v5532_v17 = vrot.slane %v5531_v21, 4  ;;  %v2830_v25 = vrot.slane %v2829_v62, 4  ;;  %v7988_v62 = vld [vmem:[%s11179_s28 + $0x20] sm:$0xf] }
 0x3cc   : > { %9318 = vmatmul.mubr.bf16.gmra.mrb[4].mxu1 %v8233_v24  ;;  %9033 = vmatprep.subr.bf16.mxu0 %v10062_v45  ;;  %v5522_v24 = vrot.slane %v5520_v36, 5  ;;  %v5572_v36 = vrot.slane %v5570_v30, 5 }
 0x3cd   : > { %9326 = vmatpush3.bf16.msra.mxu1 %v10061_v41  ;;  %9337 = vmatprep.mubr.bf16.mxu1 %v10063_v61  ;;  %v10078_v41 = vld [vmem:[%s11439_s13 + $0x20] ss:$8 sps:$4 sm:$0xff]   ;;  %v5542_v61 = vshll.u32 %v5498_v8, 16  ;;  %v5537_v28 = vsel %vm11217_vm14, %v5532_v17, %v5536_v11 }
 0x3ce   : > { %9026 = vmatmul.mubr.bf16.vlgmr.msra.gmra.mrb[8].mxu0 %v7952_v22  ;;  %9327 = vmatprep.subr.bf16.mxu1 %v10064_v27  ;;  %v10084_v22 = vld [vmem:[#allocation9 + $0x1c0] sm:$0xff]  }
 0x3cf   : > { %9029 = vmatprep.mubr.bf16.mxu0 %v7953_v44  ;;  %9034 = vmatpush3.bf16.msra.mxu0 %v10062_v45  ;;  %v2842_v45 = vrot.slane %v2840_v32, 5  ;;  %v10086_v44 = vld [vmem:[#allocation9 + $0x4d8] sm:$0xff]   ;;  %v5548_v32 = vshll.u32 %v11675_v50, 16 }
 0x3d0   : > { %9035 = vmatprep.subr.bf16.mxu0 %v10065_v48 }
 0x3d1   : > { %9328 = vmatpush3.bf16.msra.mxu1 %v10064_v27  ;;  %v5500_v27 = vld [vmem:[%s11439_s13 + $0x18] sm:$0xf]  ;;  %v2843_v37 = vor.u32 %v2842_v45, %v2839_v6 }
 0x3d2   : > { %9329 = vmatprep.subr.bf16.mxu1 %v10066_v14  ;;  %v5508_v6 = vld [vmem:[%s11439_s13 + $0x38] sm:$0xf] }
 0x3d3   : > { %9036 = vmatpush3.bf16.msra.mxu0 %v10065_v48  ;;  %v5523_v48 = vsel %vm11217_vm14, %v5518_v23, %v5522_v24  ;;  %v2844_v20 = vrot.slane %v2843_v37, 4  ;;  %v5576_v23 = vshll.u32 %v11681_v29, 16  ;;  %v10089_v24 = vld [vmem:[%s11179_s28 + $0x40] ss:$8 sps:$4 sm:$0xff]  }
 0x3d4   : > { %9037 = vmatprep.subr.bf16.mxu0 %v10067_v4  ;;  %v8258_v15 = vcombine.low %v5523_v48, %v5537_v28  ;;  %v5609_v28 = vshrl.u32 %v5508_v6, 16  ;;  %v7990_v37 = vld [vmem:[%s11179_s28 + $0x28] sm:$0xf] }
 0x3d5   : > { %9330 = vmatpush3.bf16.msra.mxu1 %v10066_v14  ;;  %v2832_v14 = vshll.u32 %v11657_v54, 16 }
 0x3d6   : > { %9030 = vmatmul.mubr.bf16.gmra.mrb[12].mxu0 %v7954_v10  ;;  %9331 = vmatprep.subr.bf16.mxu1 %v10069_v63  ;;  %v5553_v10 = vshrl.u32 %v5500_v27, 16 }
 0x3d7   : > { %9038 = vmatpush3.bf16.msra.mxu0 %v10067_v4  ;;  %9049 = vmatprep.mubr.bf16.mxu0 %v10068_v12  ;;  %v2846_v4 = vshll.u32 %v11660_v59, 16  ;;  %v5504_v12 = vld [vmem:[%s11439_s13 + $0x28] sm:$0xf]  ;;  %v2834_v1 = vrot.slane %v2832_v14, 5 }
 0x3d8   : > { %9039 = vmatprep.subr.bf16.mxu0 %v10070_v7  ;;  %v5581_v43 = vshrl.u32 %v5504_v12, 16  ;;  %v5584_v26 = vshll.u32 %v5504_v12, 16  ;;  %v5555_v57 = vrot.slane %v5553_v10, 4 }
 0x3d9   : > { %9332 = vmatpush3.bf16.msra.mxu1 %v10069_v63  ;;  %v10087_v63 = vld [vmem:[#allocation9 + $0x1c8] sm:$0xff]   ;;  %v2848_v31 = vrot.slane %v2846_v4, 5  ;;  %v2835_v21 = vsel %vm11217_vm14, %v2830_v25, %v2834_v1  ;;  %v2865_v25 = vshrl.u32 %v7990_v37, 16  ;;  %v10095_v1 = vld [vmem:[#allocation9 + $0x4f8] sm:$0xff]  }
 0x3da   : > { %9333 = vmatprep.subr.bf16.mxu1 %v10071_v18  ;;  %v5583_v39 = vrot.slane %v5581_v43, 4  ;;  %v5611_v43 = vrot.slane %v5609_v28, 4  ;;  %v5776_v28 = vld [vmem:[%s11439_s13] sm:$0xe] }
 0x3db   : > { %9040 = vmatpush3.bf16.msra.mxu0 %v10070_v7  ;;  %v5556_v7 = vshll.u32 %v5500_v27, 16  ;;  %v2849_v46 = vsel %vm11217_vm14, %v2844_v20, %v2848_v31  ;;  %v10092_v27 = vld [vmem:[#allocation9 + $0x1d8] sm:$0xff]   ;;  %v2868_v20 = vshll.u32 %v7990_v37, 16 }
 0x3dc   : > { %9041 = vmatprep.subr.bf16.mxu0 %v10072_v19  ;;  %v8000_v11 = vcombine.low %v2835_v21, %v2849_v46 }
 0x3dd   : > { %9334 = vmatpush3.bf16.msra.mxu1 %v10071_v18  ;;  %v5541_v18 = vrot.slane %v5539_v33, 4  ;;  %v10093_v33 = vld [vmem:[#allocation9 + $0x4f0] sm:$0xff]  }
 0x3de   : > { %9335 = vmatprep.subr.bf16.mxu1 %v10073_v51 }
 0x3df   : > { %9042 = vmatpush3.bf16.msra.mxu0 %v10072_v19  ;;  %v5544_v19 = vrot.slane %v5542_v61, 5  ;;  %v11699_v61 = vrot.slane %v5548_v32, 5 }
 0x3e0   : > { %9043 = vmatprep.subr.bf16.mxu0 %v10074_v53 }
 0x3e1   : > { %9336 = vmatpush3.bf16.msra.mxu1 %v10073_v51  ;;  %v11678_v51 = vld [vmem:[%s11439_s13 + $0x1c] sm:$0x1]  ;;  %v5545_v58 = vor.u32 %v5544_v19, %v5541_v18  ;;  %v2851_v19 = vshrl.u32 %v7988_v62, 16 }
 0x3e2   : > { %9345 = vmatprep.subr.bf16.mxu1 %v10076_v40  ;;  %v5562_v3 = vshll.u32 %v11678_v51, 16  ;;  %v11713_v18 = vld [vmem:[%s11439_s13 + $0x3c] sm:$0x1] }
 0x3e3   : > { %9044 = vmatpush3.bf16.msra.mxu0 %v10074_v53  ;;  %v5567_v53 = vshrl.u32 %v5502_v5, 16  ;;  %v11696_v45 = vrot.slane %v5545_v58, 4  ;;  %v5578_v5 = vrot.slane %v5576_v23, 5  ;;  %v5618_v32 = vshll.u32 %v11713_v18, 16 }
 0x3e4   : > { %9338 = vmatmul.mubr.bf16.vlgmr.msra.gmra.mrb[0].mxu1 %v10075_v35  ;;  %9045 = vmatprep.subr.bf16.mxu0 %v10077_v55  ;;  %v5506_v35 = vld [vmem:[%s11439_s13 + $0x30] sm:$0xf]  ;;  %v5564_v4 = vrot.slane %v5562_v3, 5 }
 0x3e5   : > { %9341 = vmatprep.mubr.bf16.mxu1 %v10078_v41  ;;  %9346 = vmatpush3.bf16.msra.mxu1 %v10076_v40  ;;  %v5558_v40 = vrot.slane %v5556_v7, 5  ;;  %v5586_v41 = vrot.slane %v5584_v26, 5  ;;  %v5595_v8 = vshrl.u32 %v5506_v35, 16  ;;  %v5551_v10 = vsel %vm11217_vm14, %v11696_v45, %v11699_v61  ;;  %v7996_v45 = vld [vmem:[%s11179_s28 + $0x40] sm:$0xf] }
 0x3e6   : > { %9347 = vmatprep.subr.bf16.mxu1 %v10079_v47 }
 0x3e7   : > { %9046 = vmatpush3.bf16.msra.mxu0 %v10077_v55  ;;  %v11684_v55 = vld [vmem:[%s11439_s13 + $0x2c] sm:$0x1]  ;;  %v5559_v38 = vor.u32 %v5558_v40, %v5555_v57  ;;  %v5587_v48 = vor.u32 %v5586_v41, %v5583_v39  ;;  %v5597_v7 = vrot.slane %v5595_v8, 4  ;;  %v2867_v41 = vrot.slane %v2865_v25, 4 }
 0x3e8   : > { %9047 = vmatprep.subr.bf16.mxu0 %v10080_v42  ;;  %v5590_v17 = vshll.u32 %v11684_v55, 16 }
 0x3e9   : > { %9348 = vmatpush3.bf16.msra.mxu1 %v10079_v47  ;;  %v5569_v47 = vrot.slane %v5567_v53, 4  ;;  %v5560_v14 = vrot.slane %v5559_v38, 4  ;;  %v5588_v30 = vrot.slane %v5587_v48, 4  ;;  %v11735_v48 = vrot.slane %v5618_v32, 5 }
 0x3ea   : > { %9349 = vmatprep.subr.bf16.mxu1 %v10082_v9 }
 0x3eb   : > { %9048 = vmatpush3.bf16.msra.mxu0 %v10080_v42  ;;  %v10091_v42 = vld [vmem:[#allocation9 + $0x4e8] sm:$0xff]  }
 0x3ec   : > { %9342 = vmatmul.mubr.bf16.gmra.mrb[4].mxu1 %v10081_v2  ;;  %9057 = vmatprep.subr.bf16.mxu0 %v10084_v22  ;;  %v10094_v2 = vld [vmem:[#allocation9 + $0x1e0] sm:$0xff]  }
 0x3ed   : > { %9350 = vmatpush3.bf16.msra.mxu1 %v10082_v9  ;;  %9361 = vmatprep.mubr.bf16.mxu1 %v8258_v15  ;;  %v5598_v9 = vshll.u32 %v5506_v35, 16  ;;  %v7992_v15 = vld [vmem:[%s11179_s28 + $0x30] sm:$0xf]  ;;  %v10096_v35 = vld [vmem:[#allocation9 + $0x1e8] sm:$0xff]  }
 0x3ee   : > { %9050 = vmatmul.mubr.bf16.vlgmr.msra.gmra.mrb[8].mxu0 %v10083_v0  ;;  %9351 = vmatprep.subr.bf16.mxu1 %v10086_v44  ;;  %v5592_v0 = vrot.slane %v5590_v17, 5  ;;  %v2879_v31 = vshrl.u32 %v7992_v15, 16  ;;  %v2882_v57 = vshll.u32 %v7992_v15, 16  ;;  %v11724_v17 = vld [vmem:[%s11179_s28 + $0x24] sm:$0x1] }
 0x3ef   : > { %9053 = vmatprep.mubr.bf16.mxu0 %v10085_v16  ;;  %9058 = vmatpush3.bf16.msra.mxu0 %v10084_v22  ;;  %v5573_v22 = vor.u32 %v5572_v36, %v5569_v47  ;;  %v5600_v12 = vrot.slane %v5598_v9, 5  ;;  %v7994_v16 = vld [vmem:[%s11179_s28 + $0x38] sm:$0xf]  ;;  %v10097_v47 = vld [vmem:[#allocation9 + $0x500] sm:$0xff]   ;;  %v2853_v36 = vrot.slane %v2851_v19, 4 }
 0x3f0   : > { %9059 = vmatprep.subr.bf16.mxu0 %v10087_v63  ;;  %v2893_v40 = vshrl.u32 %v7994_v16, 16  ;;  %v2896_v58 = vshll.u32 %v7994_v16, 16  ;;  %v5593_v3 = vsel %vm11217_vm14, %v5588_v30, %v5592_v0  ;;  %v2881_v8 = vrot.slane %v2879_v31, 4  ;;  %v11741_v0 = vld [vmem:[%s11179_s28 + $0x34] sm:$0x1]  ;;  %v10099_v16 = vld [vmem:[#allocation9 + $0x508] sm:$0xff]  }
 0x3f1   : > { %9352 = vmatpush3.bf16.msra.mxu1 %v10086_v44  ;;  %v5612_v44 = vshll.u32 %v5508_v6, 16  ;;  %v5574_v53 = vrot.slane %v5573_v22, 4  ;;  %v5601_v21 = vor.u32 %v5600_v12, %v5597_v7  ;;  %v11727_v6 = vld [vmem:[%s11179_s28 + $0x2c] sm:$0x1]  ;;  %v2884_v9 = vrot.slane %v2882_v57, 5 }
 0x3f2   : > { %9353 = vmatprep.subr.bf16.mxu1 %v10088_v49  ;;  %v2910_v7 = vshll.u32 %v7996_v45, 16  ;;  %v5802_v30 = vrot.slane %v11646_v60, 5  ;;  %v10101_v60 = vld [vmem:[#allocation9 + $0x510] sm:$0xff]  }
 0x3f3   : > { %9060 = vmatpush3.bf16.msra.mxu0 %v10087_v63  ;;  %v11704_v63 = vld [vmem:[%s11439_s13 + $0x34] sm:$0x1]  ;;  %v5614_v26 = vrot.slane %v5612_v44, 5  ;;  %v5579_v38 = vsel %vm11217_vm14, %v5574_v53, %v5578_v5  ;;  %v11731_v61 = vrot.slane %v5601_v21, 4  ;;  %v10098_v44 = vld [vmem:[#allocation9 + $0x1f0] sm:$0xff]   ;;  %v2885_v25 = vor.u32 %v2884_v9, %v2881_v8 }
 0x3f4   : > { %9061 = vmatprep.subr.bf16.mxu0 %v10090_v34  ;;  %v5604_v46 = vshll.u32 %v11704_v63, 16  ;;  %v5777_v5 = vld [vmem:[%s11439_s13 + $0x8] sm:$0xe]  ;;  %v8270_v53 = vrot.slane %v5776_v28, 9  ;;  %v2912_v21 = vrot.slane %v2910_v7, 5 }
 0x3f5   : > { %9354 = vmatpush3.bf16.msra.mxu1 %v10088_v49  ;;  %v2854_v49 = vshll.u32 %v7988_v62, 16  ;;  %v5615_v23 = vor.u32 %v5614_v26, %v5611_v43  ;;  %v8260_v62 = vcombine.low %v5579_v38, %v5593_v3  ;;  %v8271_v43 = vrot.slane %v5777_v5, 9  ;;  %v11763_v8 = vld [vmem:[%s11179_s28 + $0x44] sm:$0x1]  ;;  %v11766_v9 = vld [vmem:[%s11179_s28 + $0x4c] sm:$0x1] }
 0x3f6   : > { %9054 = vmatmul.mubr.bf16.gmra.mrb[12].mxu0 %v10089_v24  ;;  %9355 = vmatprep.subr.bf16.mxu1 %v10091_v42  ;;  %v2895_v24 = vrot.slane %v2893_v40, 4  ;;  %v11733_v22 = vrot.slane %v5604_v46, 5  ;;  %v5806_v26 = vrot.slane %v11649_v56, 5  ;;  %v2888_v40 = vshll.u32 %v11741_v0, 16  ;;  %v10103_v28 = vld [vmem:[#allocation9 + $0x518] sm:$0xff]  }
 0x3f7   : > { %9062 = vmatpush3.bf16.msra.mxu0 %v10090_v34  ;;  %9073 = vmatprep.mubr.bf16.mxu0 %v8000_v11  ;;  %v5565_v34 = vsel %vm11217_vm14, %v5560_v14, %v5564_v4  ;;  %v2856_v39 = vrot.slane %v2854_v49, 5  ;;  %v2898_v11 = vrot.slane %v2896_v58, 5  ;;  %v2860_v14 = vshll.u32 %v11724_v17, 16 }
 0x3f8   : > { %9063 = vmatprep.subr.bf16.mxu0 %v10092_v27  ;;  %v5616_v19 = vrot.slane %v5615_v23, 4  ;;  %v2874_v49 = vshll.u32 %v11727_v6, 16  ;;  %v2886_v56 = vrot.slane %v2885_v25, 4  ;;  %v5803_v38 = vsel %vm11341_vm1, %v8270_v53, %v5802_v30 }
 0x3f9   : > { %9356 = vmatpush3.bf16.msra.mxu1 %v10091_v42  ;;  %v2870_v42 = vrot.slane %v2868_v20, 5  ;;  %v2857_v37 = vor.u32 %v2856_v39, %v2853_v36  ;;  %v2899_v20 = vor.u32 %v2898_v11, %v2895_v24  ;;  %v5607_v36 = vsel %vm11217_vm14, %v11731_v61, %v11733_v22 }
 0x3fa   : > { %9357 = vmatprep.subr.bf16.mxu1 %v10093_v33  ;;  %v2862_v39 = vrot.slane %v2860_v14, 5  ;;  %v5807_v3 = vsel %vm11341_vm1, %v8271_v43, %v5806_v26  ;;  %v2890_v23 = vrot.slane %v2888_v40, 5  ;;  %v8012_v14 = vld [vmem:[%s11179_s28 + $0x10] sm:$0xe]  ;;  %v10106_v43 = vld [vmem:[#allocation9 + $0x210] sm:$0xff]   ;;  %v10108_v40 = vld [vmem:[#allocation9 + $0x218] sm:$0xff]  }
 0x3fb   : > { %9064 = vmatpush3.bf16.msra.mxu0 %v10092_v27  ;;  %v7998_v27 = vld [vmem:[%s11179_s28 + $0x48] sm:$0xf]  ;;  %v2871_v4 = vor.u32 %v2870_v42, %v2867_v41  ;;  %v2858_v31 = vrot.slane %v2857_v37, 4  ;;  %v2876_v41 = vrot.slane %v2874_v49, 5  ;;  %v10102_v42 = vld [vmem:[#allocation9 + $0x200] sm:$0xff]   ;;  %v2930_v37 = vshll.u32 %v11766_v9, 16 }
 0x3fc   : > { %9065 = vmatprep.subr.bf16.mxu0 %v10094_v2  ;;  %v2921_v12 = vshrl.u32 %v7998_v27, 16  ;;  %v2924_v15 = vshll.u32 %v7998_v27, 16  ;;  %v2891_v22 = vsel %vm11217_vm14, %v2886_v56, %v2890_v23  ;;  %v3114_v49 = vrot.slane %v11657_v54, 5  ;;  %v5781_v56 = vld [vmem:[%s11439_s13 + $0x28] sm:$0xe] }
 0x3fd   : > { %9358 = vmatpush3.bf16.msra.mxu1 %v10093_v33  ;;  %v8259_v33 = vcombine.low %v5551_v10, %v5565_v34  ;;  %v2907_v10 = vshrl.u32 %v7996_v45, 16  ;;  %v2872_v57 = vrot.slane %v2871_v4, 4  ;;  %v2863_v24 = vsel %vm11217_vm14, %v2858_v31, %v2862_v39  ;;  %v8013_v4 = vld [vmem:[%s11179_s28 + $0x18] sm:$0xe] }
 0x3fe   : > { %9359 = vmatprep.subr.bf16.mxu1 %v10095_v1  ;;  %v2923_v46 = vrot.slane %v2921_v12, 4  ;;  %v2926_v32 = vrot.slane %v2924_v15, 5  ;;  %v8021_v25 = vrot.slane %v8013_v4, 9  ;;  %v2932_v30 = vrot.slane %v2930_v37, 5  ;;  %v10107_v31 = vld [vmem:[#allocation9 + $0x528] sm:$0xff]  }
 0x3ff   : > { %9066 = vmatpush3.bf16.msra.mxu0 %v10094_v2  ;;  %v11744_v2 = vld [vmem:[%s11179_s28 + $0x3c] sm:$0x1]  ;;  %v2909_v34 = vrot.slane %v2907_v10, 4  ;;  %v2877_v11 = vsel %vm11217_vm14, %v2872_v57, %v2876_v41  ;;  %v5814_v41 = vrot.slane %v11678_v51, 5  ;;  %v8275_v23 = vrot.slane %v5781_v56, 9  ;;  %v10123_v56 = vld [vmem:[#allocation9 + $0x250] sm:$0xff]  }
 0x400   : > { %9067 = vmatprep.subr.bf16.mxu0 %v10096_v35  ;;  %v2902_v58 = vshll.u32 %v11744_v2, 16  ;;  %v8001_v5 = vcombine.low %v2863_v24, %v2877_v11  ;;  %v10104_v10 = vld [vmem:[#allocation9 + $0x208] sm:$0xff]   ;;  %v10113_v24 = vld [vmem:[#allocation9 + $0x540] sm:$0xff]  }
 0x401   : > { %9360 = vmatpush3.bf16.msra.mxu1 %v10095_v1  ;;  %v10100_v1 = vld [vmem:[#allocation9 + $0x1f8] sm:$0xff]   ;;  %v2913_v27 = vor.u32 %v2912_v21, %v2909_v34  ;;  %v10109_v34 = vld [vmem:[#allocation9 + $0x530] sm:$0xff]   ;;  %v10110_v21 = vld [vmem:[#allocation9 + $0x220] sm:$0xff]  }
 0x402   : > { %9369 = vmatprep.subr.bf16.mxu1 %v10097_v47  ;;  %v2904_v45 = vrot.slane %v2902_v58, 5  ;;  %v5782_v11 = vld [vmem:[%s11439_s13 + $0x30] sm:$0xe] }
 0x403   : > { %9068 = vmatpush3.bf16.msra.mxu0 %v10096_v35  ;;  %v2900_v35 = vrot.slane %v2899_v20, 4  ;;  %v2914_v12 = vrot.slane %v2913_v27, 4  ;;  %v3118_v20 = vrot.slane %v11660_v59, 5  ;;  %v10114_v27 = vld [vmem:[#allocation9 + $0x230] sm:$0xff]  }
 0x404   : > { %9362 = vmatmul.mubr.bf16.vlgmr.msra.gmra.mrb[0].mxu1 %v8259_v33  ;;  %9069 = vmatprep.subr.bf16.mxu0 %v10098_v44  ;;  %v2927_v33 = vor.u32 %v2926_v32, %v2923_v46  ;;  %v5778_v46 = vld [vmem:[%s11439_s13 + $0x10] sm:$0xe]  ;;  %v5779_v32 = vld [vmem:[%s11439_s13 + $0x18] sm:$0xe] }
 0x405   : > { %9365 = vmatprep.mubr.bf16.mxu1 %v8260_v62  ;;  %9370 = vmatpush3.bf16.msra.mxu1 %v10097_v47  ;;  %v5621_v47 = vsel %vm11217_vm14, %v5616_v19, %v11735_v48  ;;  %v2905_v48 = vsel %vm11217_vm14, %v2900_v35, %v2904_v45  ;;  %v2916_v62 = vshll.u32 %v11763_v8, 16  ;;  %v8020_v19 = vrot.slane %v8012_v14, 9  ;;  %v10111_v35 = vld [vmem:[#allocation9 + $0x538] sm:$0xff]  }
 0x406   : > { %9371 = vmatprep.subr.bf16.mxu1 %v10099_v16  ;;  %v8261_v61 = vcombine.low %v5607_v36, %v5621_v47  ;;  %v8002_v7 = vcombine.low %v2891_v22, %v2905_v48  ;;  %v2928_v15 = vrot.slane %v2927_v33, 4  ;;  %v3119_v59 = vsel %vm11341_vm1, %v8021_v25, %v3118_v20  ;;  %v5783_v33 = vld [vmem:[%s11439_s13 + $0x38] sm:$0xe] }
 0x407   : > { %9070 = vmatpush3.bf16.msra.mxu0 %v10098_v44  ;;  %v8278_v44 = vcombine.low %v5803_v38, %v5807_v3  ;;  %v2918_v53 = vrot.slane %v2916_v62, 5  ;;  %v3115_v54 = vsel %vm11341_vm1, %v8020_v19, %v3114_v49  ;;  %v8272_v36 = vrot.slane %v5778_v46, 9  ;;  %v10115_v48 = vld [vmem:[#allocation9 + $0x548] sm:$0xff]   ;;  %v8016_v62 = vld [vmem:[%s11179_s28 + $0x30] sm:$0xe]  ;;  %v10117_v49 = vld [vmem:[#allocation9 + $0x550] sm:$0xff]  }
 0x408   : > { %9071 = vmatprep.subr.bf16.mxu0 %v10100_v1  ;;  %v8028_v58 = vcombine.low %v3115_v54, %v3119_v59  ;;  %v5810_v47 = vrot.slane %v11675_v50, 5  ;;  %v8273_v39 = vrot.slane %v5779_v32, 9  ;;  %v5818_v3 = vrot.slane %v11681_v29, 5  ;;  %v10120_v54 = vld [vmem:[#allocation9 + $0x558] sm:$0xff]  }
 0x409   : > { %9372 = vmatpush3.bf16.msra.mxu1 %v10099_v16  ;;  %v10105_v16 = vld [vmem:[#allocation9 + $0x520] sm:$0xff]   ;;  %v2919_v26 = vsel %vm11217_vm14, %v2914_v12, %v2918_v53  ;;  %v5822_v45 = vrot.slane %v11684_v55, 5  ;;  %v5826_v14 = vrot.slane %v11704_v63, 5  ;;  %v8277_v4 = vrot.slane %v5783_v33, 9  ;;  %v8019_v59 = vld [vmem:[%s11179_s28 + $0x48] sm:$0xe] }
 0x40a   : > { %9373 = vmatprep.subr.bf16.mxu1 %v10101_v60  ;;  %v5811_v50 = vsel %vm11341_vm1, %v8272_v36, %v5810_v47  ;;  %v5815_v51 = vsel %vm11341_vm1, %v8273_v39, %v5814_v41  ;;  %v3126_v19 = vrot.slane %v11727_v6, 5  ;;  %v8024_v25 = vrot.slane %v8016_v62, 9  ;;  %v10125_v36 = vld [vmem:[#allocation9 + $0x568] sm:$0xff]   ;;  %v10126_v39 = vld [vmem:[#allocation9 + $0x258] sm:$0xff]   ;;  %v8313_v41 = vld [vmem:[%s11439_s13 + $0x10] sm:$0xf] }
 0x40b   : > { %9072 = vmatpush3.bf16.msra.mxu0 %v10100_v1  ;;  %v2933_v1 = vsel %vm11217_vm14, %v2928_v15, %v2932_v30  ;;  %v5823_v55 = vsel %vm11341_vm1, %v8275_v23, %v5822_v45  ;;  %v8279_v22 = vcombine.low %v5811_v50, %v5815_v51  ;;  %v3122_v15 = vrot.slane %v11724_v17, 5  ;;  %v10118_v30 = vld [vmem:[#allocation9 + $0x240] sm:$0xff]   ;;  %v10129_v51 = vld [vmem:[#allocation9 + $0x578] sm:$0xff]   ;;  %v10130_v33 = vld [vmem:[#allocation9 + $0x268] sm:$0xff]  }
 0x40c   : > { %9366 = vmatmul.mubr.bf16.gmra.mrb[4].mxu1 %v8261_v61  ;;  %9081 = vmatprep.subr.bf16.mxu0 %v10102_v42  ;;  %v8003_v57 = vcombine.low %v2919_v26, %v2933_v1  ;;  %v8014_v61 = vld [vmem:[%s11179_s28 + $0x20] sm:$0xe]  ;;  %v3130_v63 = vrot.slane %v11741_v0, 5  ;;  %v8027_v46 = vrot.slane %v8019_v59, 9  ;;  %v3142_v32 = vrot.slane %v11766_v9, 5  ;;  %v10128_v50 = vld [vmem:[#allocation9 + $0x260] sm:$0xff]  }
 0x40d   : > { %9374 = vmatpush3.bf16.msra.mxu1 %v10101_v60  ;;  %9385 = vmatprep.mubr.bf16.mxu1 %v8278_v44  ;;  %v5780_v60 = vld [vmem:[%s11439_s13 + $0x20] sm:$0xe]  ;;  %v8015_v44 = vld [vmem:[%s11179_s28 + $0x28] sm:$0xe]  ;;  %v8022_v12 = vrot.slane %v8014_v61, 9  ;;  %v6190_v45 = vshrl.u32 %v8313_v41, 16 }
 0x40e   : > { %9074 = vmatmul.mubr.bf16.vlgmr.msra.gmra.mrb[8].mxu0 %v8001_v5  ;;  %9375 = vmatprep.subr.bf16.mxu1 %v10103_v28  ;;  %v8274_v38 = vrot.slane %v5780_v60, 9  ;;  %v5830_v5 = vrot.slane %v11713_v18, 5  ;;  %v3134_v18 = vrot.slane %v11744_v2, 5  ;;  %v3131_v2 = vsel %vm11341_vm1, %v8024_v25, %v3130_v63  ;;  %v10122_v60 = vld [vmem:[#allocation9 + $0x560] sm:$0xff]   ;;  %v8311_v9 = vld [vmem:[%s11439_s13 + $0x8] sm:$0xf] }
 0x40f   : > { %9077 = vmatprep.mubr.bf16.mxu0 %v8002_v7  ;;  %9082 = vmatpush3.bf16.msra.mxu0 %v10102_v42  ;;  %v10112_v42 = vld [vmem:[#allocation9 + $0x228] sm:$0xff]   ;;  %v10116_v7 = vld [vmem:[#allocation9 + $0x238] sm:$0xff]   ;;  %v3123_v6 = vsel %vm11341_vm1, %v8022_v12, %v3122_v15  ;;  %v6179_v23 = vshll.u32 %v8311_v9, 16 }
 0x410   : > { %9083 = vmatprep.subr.bf16.mxu0 %v10104_v10  ;;  %v5819_v29 = vsel %vm11341_vm1, %v8274_v38, %v5818_v3  ;;  %v5831_v17 = vsel %vm11341_vm1, %v8277_v4, %v5830_v5  ;;  %v10127_v38 = vld [vmem:[#allocation9 + $0x570] sm:$0xff]   ;;  %v6176_v3 = vshrl.u32 %v8311_v9, 16  ;;  %v11843_v61 = vld [vmem:[%s11439_s13 + $0xc] sm:$0x1]  ;;  %v3487_v62 = vld [vmem:[%s11174_s0 + $0x8] sm:$0xf] }
 0x411   : > { %9376 = vmatpush3.bf16.msra.mxu1 %v10103_v28  ;;  %v8276_v28 = vrot.slane %v5782_v11, 9  ;;  %v8280_v37 = vcombine.low %v5819_v29, %v5823_v55  ;;  %v6192_v29 = vrot.slane %v6190_v45, 4  ;;  %v6185_v4 = vshll.u32 %v11843_v61, 16  ;;  %v10134_v25 = vld [vmem:[%s11439_s13 + $0x28] ss:$8 sps:$4 sm:$0xff]   ;;  %v10143_v45 = vld [vmem:[#allocation9 + $0x288] sm:$0xff]  }
 0x412   : > { %9377 = vmatprep.subr.bf16.mxu1 %v10105_v16  ;;  %v6178_v11 = vrot.slane %v6176_v3, 4  ;;  %v3516_v12 = vshrl.u32 %v3487_v62, 16  ;;  %v3519_v15 = vshll.u32 %v3487_v62, 16 }
 0x413   : > { %9084 = vmatpush3.bf16.msra.mxu0 %v10104_v10  ;;  %v8017_v10 = vld [vmem:[%s11179_s28 + $0x38] sm:$0xe]  ;;  %v5827_v53 = vsel %vm11341_vm1, %v8276_v28, %v5826_v14  ;;  %v11847_v28 = vld [vmem:[%s11439_s13 + $0x14] sm:$0x1]  ;;  %v10133_v14 = vld [vmem:[#allocation9 + $0x270] sm:$0xff]  }
 0x414   : > { %9085 = vmatprep.subr.bf16.mxu0 %v10106_v43  ;;  %v8025_v20 = vrot.slane %v8017_v10, 9  ;;  %v8281_v26 = vcombine.low %v5827_v53, %v5831_v17  ;;  %v6187_v53 = vrot.slane %v6185_v4, 5  ;;  %v11883_v4 = vld [vmem:[%s11439_s13 + $0x34] sm:$0x1] }
 0x415   : > { %9378 = vmatpush3.bf16.msra.mxu1 %v10105_v16  ;;  %v8023_v16 = vrot.slane %v8015_v44, 9 }
 0x416   : > { %9078 = vmatmul.mubr.bf16.gmra.mrb[12].mxu0 %v8003_v57  ;;  %9379 = vmatprep.subr.bf16.mxu1 %v10107_v31  ;;  %v3135_v1 = vsel %vm11341_vm1, %v8025_v20, %v3134_v18  ;;  %v8315_v20 = vld [vmem:[%s11439_s13 + $0x18] sm:$0xf]  ;;  %v10136_v18 = vld [vmem:[#allocation9 + $0x278] sm:$0xff]  }
 0x417   : > { %9086 = vmatpush3.bf16.msra.mxu0 %v10106_v43  ;;  %9097 = vmatprep.mubr.bf16.mxu0 %v8028_v58  ;;  %v3127_v0 = vsel %vm11341_vm1, %v8023_v16, %v3126_v19  ;;  %v8018_v43 = vld [vmem:[%s11179_s28 + $0x40] sm:$0xe]  ;;  %v10135_v19 = vld [vmem:[#allocation9 + $0x588] sm:$0xff]   ;;  %v6204_v59 = vshrl.u32 %v8315_v20, 16 }
 0x418   : > { %9087 = vmatprep.subr.bf16.mxu0 %v10108_v40  ;;  %v8029_v57 = vcombine.low %v3123_v6, %v3127_v0  ;;  %v8026_v58 = vrot.slane %v8018_v43, 9  ;;  %v10131_v16 = vld [vmem:[%s11439_s13 + $0x18] ss:$8 sps:$4 sm:$0xff]   ;;  %v3518_v43 = vrot.slane %v3516_v12, 4 }
 0x419   : > { %9380 = vmatpush3.bf16.msra.mxu1 %v10107_v31  ;;  %v10119_v31 = vld [vmem:[%s11439_s13 + $0x8] ss:$8 sps:$4 sm:$0xff]   ;;  %v8317_v6 = vld [vmem:[%s11439_s13 + $0x20] sm:$0xf] }
 0x41a   : > { %9381 = vmatprep.subr.bf16.mxu1 %v10109_v34 }
 0x41b   : > { %9088 = vmatpush3.bf16.msra.mxu0 %v10108_v40  ;;  %v10121_v40 = vld [vmem:[#allocation9 + $0x248] sm:$0xff]  }
 0x41c   : > { %9089 = vmatprep.subr.bf16.mxu0 %v10110_v21 }
 0x41d   : > { %9382 = vmatpush3.bf16.msra.mxu1 %v10109_v34  ;;  %v8030_v34 = vcombine.low %v3131_v2, %v3135_v1  ;;  %v10138_v2 = vld [vmem:[#allocation9 + $0x590] sm:$0xff]  }
 0x41e   : > { %9383 = vmatprep.subr.bf16.mxu1 %v10111_v35 }
 0x41f   : > { %9090 = vmatpush3.bf16.msra.mxu0 %v10110_v21  ;;  %v3138_v21 = vrot.slane %v11763_v8, 5  ;;  %v3143_v8 = vsel %vm11341_vm1, %v8027_v46, %v3142_v32  ;;  %v10137_v32 = vld [vmem:[%s11439_s13 + $0x38] ss:$8 sps:$4 sm:$0xff]  }
 0x420   : > { %9091 = vmatprep.subr.bf16.mxu0 %v10112_v42 }
 0x421   : > { %9384 = vmatpush3.bf16.msra.mxu1 %v10111_v35  ;;  %v3139_v35 = vsel %vm11341_vm1, %v8026_v58, %v3138_v21  ;;  %v6218_v58 = vshrl.u32 %v8317_v6, 16  ;;  %v10140_v21 = vld [vmem:[#allocation9 + $0x280] sm:$0xff]  }
 0x422   : > { %9393 = vmatprep.subr.bf16.mxu1 %v10113_v24  ;;  %v8031_v47 = vcombine.low %v3139_v35, %v3143_v8  ;;  %v10139_v35 = vld [vmem:[%s11174_s0 + $0x10] ss:$8 sps:$4 sm:$0xff]  }
 0x423   : > { %9092 = vmatpush3.bf16.msra.mxu0 %v10112_v42  ;;  %v10124_v42 = vld [vmem:[%s11174_s0] ss:$8 sps:$4 sm:$0xff]   ;;  %v6220_v3 = vrot.slane %v6218_v58, 4 }
 0x424   : > { %9386 = vmatmul.mubr.bf16.vlgmr.msra.gmra.mrb[0].mxu1 %v8279_v22  ;;  %9093 = vmatprep.subr.bf16.mxu0 %v10114_v27  ;;  %v3485_v22 = vld [vmem:[%s11174_s0] sm:$0xf] }
 0x425   : > { %9389 = vmatprep.mubr.bf16.mxu1 %v8280_v37  ;;  %9394 = vmatpush3.bf16.msra.mxu1 %v10113_v24  ;;  %v6193_v24 = vshll.u32 %v8313_v41, 16  ;;  %v3502_v5 = vshrl.u32 %v3485_v22, 16  ;;  %v3505_v10 = vshll.u32 %v3485_v22, 16  ;;  %v10141_v41 = vld [vmem:[%s11174_s0 + $0x20] ss:$8 sps:$4 sm:$0xff]   ;;  %v10144_v22 = vld [vmem:[#allocation9 + $0x5a0] sm:$0xff]  }
 0x426   : > { %9395 = vmatprep.subr.bf16.mxu1 %v10115_v48 }
 0x427   : > { %9094 = vmatpush3.bf16.msra.mxu0 %v10114_v27  ;;  %v6181_v27 = vrot.slane %v6179_v23, 5  ;;  %v6195_v55 = vrot.slane %v6193_v24, 5  ;;  %v3504_v17 = vrot.slane %v3502_v5, 4  ;;  %v10146_v5 = vld [vmem:[#allocation9 + $0x290] sm:$0xff]  }
 0x428   : > { %9095 = vmatprep.subr.bf16.mxu0 %v10116_v7 }
 0x429   : > { %9396 = vmatpush3.bf16.msra.mxu1 %v10115_v48  ;;  %v10132_v48 = vld [vmem:[#allocation9 + $0x580] sm:$0xff]   ;;  %v6182_v44 = vor.u32 %v6181_v27, %v6178_v11  ;;  %v6196_v37 = vor.u32 %v6195_v55, %v6192_v29  ;;  %v11877_v27 = vld [vmem:[%s11439_s13 + $0x24] sm:$0x1] }
 0x42a   : > { %9397 = vmatprep.subr.bf16.mxu1 %v10117_v49  ;;  %v6227_v12 = vshll.u32 %v11877_v27, 16 }
 0x42b   : > { %9096 = vmatpush3.bf16.msra.mxu0 %v10116_v7  ;;  %v6199_v7 = vshll.u32 %v11847_v28, 16  ;;  %v6197_v63 = vrot.slane %v6196_v37, 4 }
 0x42c   : > { %9390 = vmatmul.mubr.bf16.gmra.mrb[4].mxu1 %v8281_v26  ;;  %9105 = vmatprep.subr.bf16.mxu0 %v10118_v30  ;;  %v3521_v26 = vrot.slane %v3519_v15, 5 }
 0x42d   : > { %9398 = vmatpush3.bf16.msra.mxu1 %v10117_v49  ;;  %9409 = vmatprep.mubr.bf16.mxu1 %v10119_v31  ;;  %v6183_v49 = vrot.slane %v6182_v44, 4  ;;  %v6201_v0 = vrot.slane %v6199_v7, 5 }
 0x42e   : > { %9098 = vmatmul.mubr.bf16.vlgmr.msra.gmra.mrb[8].mxu0 %v8029_v57  ;;  %9399 = vmatprep.subr.bf16.mxu1 %v10120_v54  ;;  %v11864_v57 = vld [vmem:[%s11174_s0 + $0xc] sm:$0x1] }
 0x42f   : > { %9101 = vmatprep.mubr.bf16.mxu0 %v8030_v34  ;;  %9106 = vmatpush3.bf16.msra.mxu0 %v10118_v30  ;;  %v3507_v30 = vrot.slane %v3505_v10, 5  ;;  %v6188_v1 = vsel %vm11217_vm14, %v6183_v49, %v6187_v53  ;;  %v6202_v31 = vsel %vm11217_vm14, %v6197_v63, %v6201_v0  ;;  %v6221_v34 = vshll.u32 %v8317_v6, 16  ;;  %v10147_v63 = vld [vmem:[#allocation9 + $0x5a8] sm:$0xff]  }
 0x430   : > { %9107 = vmatprep.subr.bf16.mxu0 %v10121_v40  ;;  %v8327_v8 = vcombine.low %v6188_v1, %v6202_v31  ;;  %v8323_v53 = vld [vmem:[%s11439_s13 + $0x38] sm:$0xf]  ;;  %v8325_v1 = vld [vmem:[%s11439_s13 + $0x40] sm:$0xf] }
 0x431   : > { %9400 = vmatpush3.bf16.msra.mxu1 %v10120_v54  ;;  %v11859_v54 = vld [vmem:[%s11174_s0 + $0x4] sm:$0x1]  ;;  %v3508_v46 = vor.u32 %v3507_v30, %v3504_v17  ;;  %v6223_v23 = vrot.slane %v6221_v34, 5  ;;  %v10145_v17 = vld [vmem:[%s11174_s0 + $0x30] ss:$8 sps:$4 sm:$0xff]   ;;  %v6263_v58 = vshll.u32 %v8323_v53, 16 }
 0x432   : > { %9401 = vmatprep.subr.bf16.mxu1 %v10122_v60  ;;  %v3511_v9 = vshll.u32 %v11859_v54, 16  ;;  %v3489_v34 = vld [vmem:[%s11174_s0 + $0x10] sm:$0xf] }
 0x433   : > { %9108 = vmatpush3.bf16.msra.mxu0 %v10121_v40  ;;  %v6207_v40 = vshll.u32 %v8315_v20, 16  ;;  %v3509_v24 = vrot.slane %v3508_v46, 4  ;;  %v6224_v37 = vor.u32 %v6223_v23, %v6220_v3  ;;  %v10149_v46 = vld [vmem:[#allocation9 + $0x5b0] sm:$0xff]   ;;  %v3530_v3 = vshrl.u32 %v3489_v34, 16 }
 0x434   : > { %9109 = vmatprep.subr.bf16.mxu0 %v10123_v56  ;;  %v3533_v23 = vshll.u32 %v3489_v34, 16  ;;  %v10154_v34 = vld [vmem:[#allocation9 + $0x2b0] sm:$0xff]  }
 0x435   : > { %9402 = vmatpush3.bf16.msra.mxu1 %v10122_v60  ;;  %v3522_v60 = vor.u32 %v3521_v26, %v3518_v43  ;;  %v11897_v6 = vrot.slane %v6224_v37, 4  ;;  %v10148_v43 = vld [vmem:[#allocation9 + $0x298] sm:$0xff]  }
 0x436   : > { %9102 = vmatmul.mubr.bf16.gmra.mrb[12].mxu0 %v8031_v47  ;;  %9403 = vmatprep.subr.bf16.mxu1 %v10125_v36  ;;  %v3525_v47 = vshll.u32 %v11864_v57, 16 }
 0x437   : > { %9110 = vmatpush3.bf16.msra.mxu0 %v10123_v56  ;;  %9121 = vmatprep.mubr.bf16.mxu0 %v10124_v42  ;;  %v8319_v56 = vld [vmem:[%s11439_s13 + $0x28] sm:$0xf]  ;;  %v6206_v42 = vrot.slane %v6204_v59, 4  ;;  %v3523_v11 = vrot.slane %v3522_v60, 4 }
 0x438   : > { %9111 = vmatprep.subr.bf16.mxu0 %v10126_v39  ;;  %v6235_v29 = vshll.u32 %v8319_v56, 16  ;;  %v3527_v44 = vrot.slane %v3525_v47, 5  ;;  %v6274_v47 = vshrl.u32 %v8325_v1, 16 }
 0x439   : > { %9404 = vmatpush3.bf16.msra.mxu1 %v10125_v36  ;;  %v10142_v36 = vld [vmem:[#allocation9 + $0x598] sm:$0xff]  }
 0x43a   : > { %9405 = vmatprep.subr.bf16.mxu1 %v10127_v38 }
 0x43b   : > { %9112 = vmatpush3.bf16.msra.mxu0 %v10126_v39  ;;  %v8321_v39 = vld [vmem:[%s11439_s13 + $0x30] sm:$0xf] }
 0x43c   : > { %9113 = vmatprep.subr.bf16.mxu0 %v10128_v50  ;;  %v6246_v55 = vshrl.u32 %v8321_v39, 16 }
 0x43d   : > { %9406 = vmatpush3.bf16.msra.mxu1 %v10127_v38  ;;  %v6209_v38 = vrot.slane %v6207_v40, 5  ;;  %v6260_v40 = vshrl.u32 %v8323_v53, 16  ;;  %v3497_v53 = vld [vmem:[%s11174_s0 + $0x30] sm:$0xf] }
 0x43e   : > { %9407 = vmatprep.subr.bf16.mxu1 %v10129_v51  ;;  %v6248_v49 = vrot.slane %v6246_v55, 4  ;;  %v6265_v55 = vrot.slane %v6263_v58, 5  ;;  %v6471_v58 = vrot.slane %v11847_v28, 5 }
 0x43f   : > { %9114 = vmatpush3.bf16.msra.mxu0 %v10128_v50  ;;  %v11874_v50 = vld [vmem:[%s11439_s13 + $0x1c] sm:$0x1]  ;;  %v6210_v62 = vor.u32 %v6209_v38, %v6206_v42  ;;  %v3495_v42 = vld [vmem:[%s11174_s0 + $0x28] sm:$0xf]  ;;  %v10150_v38 = vld [vmem:[#allocation9 + $0x2a0] sm:$0xff]  }
 0x440   : > { %9115 = vmatprep.subr.bf16.mxu0 %v10130_v33  ;;  %v6213_v7 = vshll.u32 %v11874_v50, 16 }
 0x441   : > { %9408 = vmatpush3.bf16.msra.mxu1 %v10129_v51  ;;  %v6232_v51 = vshrl.u32 %v8319_v56, 16  ;;  %v11895_v30 = vrot.slane %v6210_v62, 4  ;;  %v11911_v56 = vld [vmem:[%s11439_s13 + $0x3c] sm:$0x1]  ;;  %v3575_v62 = vshll.u32 %v3495_v42, 16 }
 0x442   : > { %9417 = vmatprep.subr.bf16.mxu1 %v10132_v48  ;;  %v11899_v26 = vrot.slane %v6213_v7, 5  ;;  %v6269_v37 = vshll.u32 %v11911_v56, 16 }
 0x443   : > { %9116 = vmatpush3.bf16.msra.mxu0 %v10130_v33  ;;  %v6249_v33 = vshll.u32 %v8321_v39, 16  ;;  %v6234_v15 = vrot.slane %v6232_v51, 4  ;;  %v6277_v39 = vshll.u32 %v8325_v1, 16 }
 0x444   : > { %9410 = vmatmul.mubr.bf16.vlgmr.msra.gmra.mrb[0].mxu1 %v10131_v16  ;;  %9117 = vmatprep.subr.bf16.mxu0 %v10133_v14  ;;  %v3528_v16 = vsel %vm11217_vm14, %v3523_v11, %v3527_v44  ;;  %v3572_v44 = vshrl.u32 %v3495_v42, 16  ;;  %v11940_v1 = vrot.slane %v6269_v37, 5 }
 0x445   : > { %9413 = vmatprep.mubr.bf16.mxu1 %v10134_v25  ;;  %9418 = vmatpush3.bf16.msra.mxu1 %v10132_v48  ;;  %v3513_v48 = vrot.slane %v3511_v9, 5  ;;  %v6251_v25 = vrot.slane %v6249_v33, 5  ;;  %v10151_v33 = vld [vmem:[#allocation9 + $0x5b8] sm:$0xff]  }
 0x446   : > { %9419 = vmatprep.subr.bf16.mxu1 %v10135_v19 }
 0x447   : > { %9118 = vmatpush3.bf16.msra.mxu0 %v10133_v14  ;;  %v11880_v14 = vld [vmem:[%s11439_s13 + $0x2c] sm:$0x1]  ;;  %v3514_v10 = vsel %vm11217_vm14, %v3509_v24, %v3513_v48  ;;  %v6252_v31 = vor.u32 %v6251_v25, %v6248_v49 }
 0x448   : > { %9119 = vmatprep.subr.bf16.mxu0 %v10136_v18  ;;  %v6241_v20 = vshll.u32 %v11880_v14, 16  ;;  %v8056_v0 = vcombine.low %v3514_v10, %v3528_v16  ;;  %v6279_v10 = vrot.slane %v6277_v39, 5  ;;  %v3535_v16 = vrot.slane %v3533_v23, 5  ;;  %v11949_v39 = vld [vmem:[%s11174_s0 + $0x24] sm:$0x1] }
 0x449   : > { %9420 = vmatpush3.bf16.msra.mxu1 %v10135_v19  ;;  %v6237_v19 = vrot.slane %v6235_v29, 5  ;;  %v6253_v11 = vrot.slane %v6252_v31, 4  ;;  %v6262_v29 = vrot.slane %v6260_v40, 4  ;;  %v11943_v31 = vld [vmem:[%s11174_s0 + $0x1c] sm:$0x1] }
 0x44a   : > { %9421 = vmatprep.subr.bf16.mxu1 %v10138_v2  ;;  %v8339_v40 = vld [vmem:[%s11439_s13 + $0x8] sm:$0xe] }
 0x44b   : > { %9120 = vmatpush3.bf16.msra.mxu0 %v10136_v18  ;;  %v6255_v18 = vshll.u32 %v11883_v4, 16  ;;  %v6238_v59 = vor.u32 %v6237_v19, %v6234_v15  ;;  %v3532_v15 = vrot.slane %v3530_v3, 4  ;;  %v10155_v3 = vld [vmem:[#allocation9 + $0x5c8] sm:$0xff]  }
 0x44c   : > { %9414 = vmatmul.mubr.bf16.gmra.mrb[4].mxu1 %v10137_v32  ;;  %9129 = vmatprep.subr.bf16.mxu0 %v10140_v21  ;;  %v11906_v32 = vrot.slane %v6241_v20, 5  ;;  %v6266_v20 = vor.u32 %v6265_v55, %v6262_v29  ;;  %v8347_v29 = vrot.slane %v8339_v40, 9 }
 0x44d   : > { %9422 = vmatpush3.bf16.msra.mxu1 %v10138_v2  ;;  %9433 = vmatprep.mubr.bf16.mxu1 %v8327_v8  ;;  %v11901_v2 = vrot.slane %v6227_v12, 5  ;;  %v11908_v60 = vrot.slane %v6255_v18, 5  ;;  %v6467_v8 = vrot.slane %v11843_v61, 5  ;;  %v6239_v51 = vrot.slane %v6238_v59, 4  ;;  %v10152_v12 = vld [vmem:[#allocation9 + $0x2a8] sm:$0xff]  }
 0x44e   : > { %9122 = vmatmul.mubr.bf16.vlgmr.msra.gmra.mrb[8].mxu0 %v10139_v35  ;;  %9423 = vmatprep.subr.bf16.mxu1 %v10142_v36  ;;  %v11914_v35 = vld [vmem:[%s11439_s13 + $0x44] sm:$0x1]  ;;  %v11936_v18 = vld [vmem:[%s11174_s0 + $0x14] sm:$0x1]  ;;  %v6267_v23 = vrot.slane %v6266_v20, 4 }
 0x44f   : > { %9125 = vmatprep.mubr.bf16.mxu0 %v10141_v41  ;;  %9130 = vmatpush3.bf16.msra.mxu0 %v10140_v21  ;;  %v3491_v21 = vld [vmem:[%s11174_s0 + $0x18] sm:$0xf]  ;;  %v6230_v9 = vsel %vm11217_vm14, %v11897_v6, %v11901_v2  ;;  %v3493_v41 = vld [vmem:[%s11174_s0 + $0x20] sm:$0xf]  ;;  %v6283_v7 = vshll.u32 %v11914_v35, 16  ;;  %v6244_v25 = vsel %vm11217_vm14, %v6239_v51, %v11906_v32  ;;  %v3536_v32 = vor.u32 %v3535_v16, %v3532_v15 }
 0x450   : > { %9131 = vmatprep.subr.bf16.mxu0 %v10143_v45  ;;  %v3547_v24 = vshll.u32 %v3491_v21, 16  ;;  %v3561_v48 = vshll.u32 %v3493_v41, 16  ;;  %v3539_v28 = vshll.u32 %v11936_v18, 16  ;;  %v11964_v20 = vld [vmem:[%s11174_s0 + $0x34] sm:$0x1] }
 0x451   : > { %9424 = vmatpush3.bf16.msra.mxu1 %v10142_v36  ;;  %v6216_v36 = vsel %vm11217_vm14, %v11895_v30, %v11899_v26  ;;  %v10153_v30 = vld [vmem:[#allocation9 + $0x5c0] sm:$0xff]   ;;  %v3577_v26 = vrot.slane %v3575_v62, 5 }
 0x452   : > { %9425 = vmatprep.subr.bf16.mxu1 %v10144_v22  ;;  %v3549_v49 = vrot.slane %v3547_v24, 5  ;;  %v8328_v2 = vcombine.low %v6216_v36, %v6230_v9  ;;  %v3586_v36 = vshrl.u32 %v3497_v53, 16  ;;  %v3589_v9 = vshll.u32 %v3497_v53, 16  ;;  %v10158_v53 = vld [vmem:[#allocation9 + $0x2c0] sm:$0xff]  }
 0x453   : > { %9132 = vmatpush3.bf16.msra.mxu0 %v10143_v45  ;;  %v3544_v45 = vshrl.u32 %v3491_v21, 16 }
 0x454   : > { %9133 = vmatprep.subr.bf16.mxu0 %v10146_v5  ;;  %v3588_v37 = vrot.slane %v3586_v36, 4  ;;  %v10160_v36 = vld [vmem:[#allocation9 + $0x2c8] sm:$0xff]  }
 0x455   : > { %9426 = vmatpush3.bf16.msra.mxu1 %v10144_v22  ;;  %v3558_v22 = vshrl.u32 %v3493_v41, 16  ;;  %v3546_v19 = vrot.slane %v3544_v45, 4  ;;  %v11952_v41 = vld [vmem:[%s11174_s0 + $0x2c] sm:$0x1] }
 0x456   : > { %9126 = vmatmul.mubr.bf16.gmra.mrb[12].mxu0 %v10145_v17  ;;  %9427 = vmatprep.subr.bf16.mxu1 %v10147_v63  ;;  %v3499_v17 = vld [vmem:[%s11174_s0 + $0x38] sm:$0xf]  ;;  %v3581_v62 = vshll.u32 %v11952_v41, 16 }
 0x457   : > { %9134 = vmatpush3.bf16.msra.mxu0 %v10146_v5  ;;  %9145 = vmatprep.mubr.bf16.mxu0 %v8056_v0  ;;  %v6276_v5 = vrot.slane %v6274_v47, 4  ;;  %v3560_v6 = vrot.slane %v3558_v22, 4  ;;  %v3563_v0 = vrot.slane %v3561_v48, 5  ;;  %v8340_v47 = vld [vmem:[%s11439_s13 + $0x10] sm:$0xe]  ;;  %v3600_v42 = vshrl.u32 %v3499_v17, 16 }
 0x458   : > { %9135 = vmatprep.subr.bf16.mxu0 %v10148_v43  ;;  %v8348_v55 = vrot.slane %v8340_v47, 9  ;;  %v3537_v22 = vrot.slane %v3536_v32, 4  ;;  %v3767_v32 = vld [vmem:[%s11174_s0] sm:$0xe] }
 0x459   : > { %9428 = vmatpush3.bf16.msra.mxu1 %v10147_v63  ;;  %v6258_v63 = vsel %vm11217_vm14, %v6253_v11, %v11908_v60  ;;  %v6280_v59 = vor.u32 %v6279_v10, %v6276_v5  ;;  %v3550_v60 = vor.u32 %v3549_v49, %v3546_v19  ;;  %v3564_v45 = vor.u32 %v3563_v0, %v3560_v6 }
 0x45a   : > { %9429 = vmatprep.subr.bf16.mxu1 %v10149_v46  ;;  %v8329_v21 = vcombine.low %v6244_v25, %v6258_v63  ;;  %v3553_v11 = vshll.u32 %v11943_v31, 16  ;;  %v3591_v5 = vrot.slane %v3589_v9, 5  ;;  %v3602_v10 = vrot.slane %v3600_v42, 4 }
 0x45b   : > { %9136 = vmatpush3.bf16.msra.mxu0 %v10148_v43  ;;  %v3574_v43 = vrot.slane %v3572_v44, 4  ;;  %v6281_v51 = vrot.slane %v6280_v59, 4  ;;  %v3551_v48 = vrot.slane %v3550_v60, 4  ;;  %v3567_v44 = vshll.u32 %v11949_v39, 16  ;;  %v3768_v60 = vld [vmem:[%s11174_s0 + $0x8] sm:$0xe] }
 0x45c   : > { %9137 = vmatprep.subr.bf16.mxu0 %v10150_v38  ;;  %v3565_v15 = vrot.slane %v3564_v45, 4  ;;  %v6272_v19 = vsel %vm11217_vm14, %v6267_v23, %v11940_v1  ;;  %v3541_v25 = vrot.slane %v3539_v28, 5  ;;  %v3555_v63 = vrot.slane %v3553_v11, 5 }
 0x45d   : > { %9430 = vmatpush3.bf16.msra.mxu1 %v10149_v46  ;;  %v6285_v46 = vrot.slane %v6283_v7, 5  ;;  %v3578_v24 = vor.u32 %v3577_v26, %v3574_v43  ;;  %v3569_v6 = vrot.slane %v3567_v44, 5  ;;  %v3583_v0 = vrot.slane %v3581_v62, 5  ;;  %v11973_v43 = vld [vmem:[%s11174_s0 + $0x3c] sm:$0x1]  ;;  %v10164_v44 = vld [vmem:[#allocation9 + $0x2d8] sm:$0xff]  }
 0x45e   : > { %9431 = vmatprep.subr.bf16.mxu1 %v10151_v33  ;;  %v3542_v26 = vsel %vm11217_vm14, %v3537_v22, %v3541_v25  ;;  %v3592_v61 = vor.u32 %v3591_v5, %v3588_v37  ;;  %v8068_v23 = vrot.slane %v3767_v32, 9  ;;  %v3793_v28 = vrot.slane %v11859_v54, 5  ;;  %v10163_v22 = vld [vmem:[#allocation9 + $0x5e8] sm:$0xff]   ;;  %v10165_v37 = vld [vmem:[#allocation9 + $0x5f0] sm:$0xff]   ;;  %v10166_v5 = vld [vmem:[#allocation9 + $0x2e0] sm:$0xff]  }
 0x45f   : > { %9138 = vmatpush3.bf16.msra.mxu0 %v10150_v38  ;;  %v3603_v38 = vshll.u32 %v3499_v17, 16  ;;  %v3579_v16 = vrot.slane %v3578_v24, 4  ;;  %v6286_v49 = vsel %vm11217_vm14, %v6281_v51, %v6285_v46  ;;  %v6468_v17 = vsel %vm11341_vm1, %v8347_v29, %v6467_v8  ;;  %v10162_v29 = vld [vmem:[#allocation9 + $0x2d0] sm:$0xff]  }
 0x460   : > { %9139 = vmatprep.subr.bf16.mxu0 %v10152_v12  ;;  %v8330_v59 = vcombine.low %v6272_v19, %v6286_v49  ;;  %v3570_v8 = vsel %vm11217_vm14, %v3565_v15, %v3569_v6  ;;  %v3609_v46 = vshll.u32 %v11973_v43, 16  ;;  %v3593_v42 = vrot.slane %v3592_v61, 4  ;;  %v8344_v15 = vld [vmem:[%s11439_s13 + $0x30] sm:$0xe]  ;;  %v10170_v61 = vld [vmem:[#allocation9 + $0x2f0] sm:$0xff]  }
 0x461   : > { %9432 = vmatpush3.bf16.msra.mxu1 %v10151_v33  ;;  %v10156_v33 = vld [vmem:[#allocation9 + $0x2b8] sm:$0xff]   ;;  %v3605_v7 = vrot.slane %v3603_v38, 5  ;;  %v3584_v40 = vsel %vm11217_vm14, %v3579_v16, %v3583_v0  ;;  %v8069_v45 = vrot.slane %v3768_v60, 9  ;;  %v3797_v24 = vrot.slane %v11864_v57, 5 }
 0x462   : > { %9441 = vmatprep.subr.bf16.mxu1 %v10153_v30  ;;  %v8058_v9 = vcombine.low %v3570_v8, %v3584_v40  ;;  %v3611_v11 = vrot.slane %v3609_v46, 5  ;;  %v3794_v54 = vsel %vm11341_vm1, %v8068_v23, %v3793_v28  ;;  %v10167_v16 = vld [vmem:[#allocation9 + $0x5f8] sm:$0xff]   ;;  %v6475_v49 = vrot.slane %v11874_v50, 5  ;;  %v10171_v40 = vld [vmem:[#allocation9 + $0x608] sm:$0xff]   ;;  %v10173_v28 = vld [vmem:[#allocation9 + $0x610] sm:$0xff]  }
 0x463   : > { %9140 = vmatpush3.bf16.msra.mxu0 %v10152_v12  ;;  %v10157_v12 = vld [vmem:[#allocation9 + $0x5d0] sm:$0xff]   ;;  %v3606_v1 = vor.u32 %v3605_v7, %v3602_v10  ;;  %v3798_v57 = vsel %vm11341_vm1, %v8069_v45, %v3797_v24  ;;  %v8341_v10 = vld [vmem:[%s11439_s13 + $0x18] sm:$0xe]  ;;  %v8352_v6 = vrot.slane %v8344_v15, 9  ;;  %v6487_v0 = vrot.slane %v11883_v4, 5 }
 0x464   : > { %9434 = vmatmul.mubr.bf16.vlgmr.msra.gmra.mrb[0].mxu1 %v8328_v2  ;;  %9141 = vmatprep.subr.bf16.mxu0 %v10154_v34  ;;  %v3556_v2 = vsel %vm11217_vm14, %v3551_v48, %v3555_v63  ;;  %v8076_v62 = vcombine.low %v3794_v54, %v3798_v57  ;;  %v8342_v7 = vld [vmem:[%s11439_s13 + $0x20] sm:$0xe]  ;;  %v8349_v19 = vrot.slane %v8341_v10, 9  ;;  %v6479_v63 = vrot.slane %v11877_v27, 5  ;;  %v3774_v54 = vld [vmem:[%s11174_s0 + $0x38] sm:$0xe] }
 0x465   : > { %9437 = vmatprep.mubr.bf16.mxu1 %v8329_v21  ;;  %9442 = vmatpush3.bf16.msra.mxu1 %v10153_v30  ;;  %v6472_v30 = vsel %vm11341_vm1, %v8348_v55, %v6471_v58  ;;  %v10159_v58 = vld [vmem:[#allocation9 + $0x5d8] sm:$0xff]   ;;  %v3595_v21 = vshll.u32 %v11964_v20, 16  ;;  %v8057_v47 = vcombine.low %v3542_v26, %v3556_v2  ;;  %v3607_v38 = vrot.slane %v3606_v1, 4  ;;  %v10169_v26 = vld [vmem:[#allocation9 + $0x600] sm:$0xff]   ;;  %v8345_v2 = vld [vmem:[%s11439_s13 + $0x38] sm:$0xe] }
 0x466   : > { %9443 = vmatprep.subr.bf16.mxu1 %v10155_v3  ;;  %v8350_v25 = vrot.slane %v8342_v7, 9  ;;  %v6476_v50 = vsel %vm11341_vm1, %v8349_v19, %v6475_v49  ;;  %v6488_v4 = vsel %vm11341_vm1, %v8352_v6, %v6487_v0  ;;  %v8346_v1 = vld [vmem:[%s11439_s13 + $0x40] sm:$0xe]  ;;  %v6491_v32 = vrot.slane %v11911_v56, 5  ;;  %v10174_v57 = vld [vmem:[%s11439_s13 + $0x10] ss:$8 sps:$4 sm:$0xff]  }
 0x467   : > { %9142 = vmatpush3.bf16.msra.mxu0 %v10154_v34  ;;  %v8355_v34 = vcombine.low %v6468_v17, %v6472_v30  ;;  %v3597_v51 = vrot.slane %v3595_v21, 5  ;;  %v6483_v30 = vrot.slane %v11880_v14, 5  ;;  %v3771_v21 = vld [vmem:[%s11174_s0 + $0x20] sm:$0xe]  ;;  %v8354_v60 = vrot.slane %v8346_v1, 9  ;;  %v10176_v10 = vld [vmem:[#allocation9 + $0x620] sm:$0xff]  }
 0x468   : > { %9143 = vmatprep.subr.bf16.mxu0 %v10156_v33  ;;  %v6480_v27 = vsel %vm11341_vm1, %v8350_v25, %v6479_v63  ;;  %v3805_v23 = vrot.slane %v11943_v31, 5  ;;  %v8072_v45 = vrot.slane %v3771_v21, 9  ;;  %v3809_v56 = vrot.slane %v11949_v39, 5  ;;  %v10177_v15 = vld [vmem:[#allocation9 + $0x628] sm:$0xff]   ;;  %v8388_v19 = vld [vmem:[%s11439_s13 + $0x10] sm:$0xf] }
 0x469   : > { %9444 = vmatpush3.bf16.msra.mxu1 %v10155_v3  ;;  %v10161_v3 = vld [vmem:[#allocation9 + $0x5e0] sm:$0xff]   ;;  %v3598_v55 = vsel %vm11217_vm14, %v3593_v42, %v3597_v51  ;;  %v8356_v8 = vcombine.low %v6476_v50, %v6480_v27  ;;  %v3813_v24 = vrot.slane %v11952_v41, 5  ;;  %v6841_v49 = vshrl.u32 %v8388_v19, 16  ;;  %v10183_v1 = vld [vmem:[#allocation9 + $0x648] sm:$0xff]   ;;  %v10185_v21 = vld [vmem:[#allocation9 + $0x650] sm:$0xff]  }
 0x46a   : > { %9445 = vmatprep.subr.bf16.mxu1 %v10157_v12  ;;  %v3810_v41 = vsel %vm11341_vm1, %v8072_v45, %v3809_v56  ;;  %v6844_v25 = vshll.u32 %v8388_v19, 16  ;;  %v10181_v50 = vld [vmem:[#allocation9 + $0x640] sm:$0xff]   ;;  %v12079_v19 = vld [vmem:[%s11439_s13 + $0x3c] sm:$0x1] }
 0x46b   : > { %9144 = vmatpush3.bf16.msra.mxu0 %v10156_v33  ;;  %v3612_v33 = vsel %vm11217_vm14, %v3607_v38, %v3611_v11  ;;  %v3801_v38 = vrot.slane %v11936_v18, 5  ;;  %v3773_v11 = vld [vmem:[%s11174_s0 + $0x30] sm:$0xe]  ;;  %v12049_v27 = vld [vmem:[%s11439_s13 + $0x14] sm:$0x1] }
 0x46c   : > { %9438 = vmatmul.mubr.bf16.gmra.mrb[4].mxu1 %v8330_v59  ;;  %9153 = vmatprep.subr.bf16.mxu0 %v10158_v53  ;;  %v8059_v48 = vcombine.low %v3598_v55, %v3612_v33  ;;  %v3769_v59 = vld [vmem:[%s11174_s0 + $0x10] sm:$0xe]  ;;  %v10175_v33 = vld [vmem:[#allocation9 + $0x618] sm:$0xff]   ;;  %v6846_v6 = vrot.slane %v6844_v25, 5 }
 0x46d   : > { %9446 = vmatpush3.bf16.msra.mxu1 %v10157_v12  ;;  %9457 = vmatprep.mubr.bf16.mxu1 %v8355_v34  ;;  %v8343_v12 = vld [vmem:[%s11439_s13 + $0x28] sm:$0xe]  ;;  %v3770_v34 = vld [vmem:[%s11174_s0 + $0x18] sm:$0xe]  ;;  %v8070_v42 = vrot.slane %v3769_v59, 9  ;;  %v6850_v59 = vshll.u32 %v12049_v27, 16 }
 0x46e   : > { %9146 = vmatmul.mubr.bf16.vlgmr.msra.gmra.mrb[8].mxu0 %v8057_v47  ;;  %9447 = vmatprep.subr.bf16.mxu1 %v10159_v58  ;;  %v8351_v17 = vrot.slane %v8343_v12, 9  ;;  %v6495_v47 = vrot.slane %v11914_v35, 5  ;;  %v10187_v45 = vld [vmem:[#allocation9 + $0x660] sm:$0xff]  }
 0x46f   : > { %9149 = vmatprep.mubr.bf16.mxu0 %v8058_v9  ;;  %9154 = vmatpush3.bf16.msra.mxu0 %v10158_v53  ;;  %v10168_v53 = vld [vmem:[#allocation9 + $0x2e8] sm:$0xff]   ;;  %v10172_v9 = vld [vmem:[#allocation9 + $0x2f8] sm:$0xff]   ;;  %v3802_v31 = vsel %vm11341_vm1, %v8070_v42, %v3801_v38  ;;  %v8392_v38 = vld [vmem:[%s11439_s13 + $0x20] sm:$0xf] }
 0x470   : > { %9155 = vmatprep.subr.bf16.mxu0 %v10160_v36  ;;  %v6484_v14 = vsel %vm11341_vm1, %v8351_v17, %v6483_v30  ;;  %v6496_v18 = vsel %vm11341_vm1, %v8354_v60, %v6495_v47  ;;  %v10179_v17 = vld [vmem:[#allocation9 + $0x638] sm:$0xff]   ;;  %v6843_v30 = vrot.slane %v6841_v49, 4  ;;  %v6869_v56 = vshrl.u32 %v8392_v38, 16 }
 0x471   : > { %9448 = vmatpush3.bf16.msra.mxu1 %v10159_v58  ;;  %v8353_v58 = vrot.slane %v8345_v2, 9  ;;  %v8357_v46 = vcombine.low %v6484_v14, %v6488_v4  ;;  %v12052_v2 = vld [vmem:[%s11439_s13 + $0x1c] sm:$0x1]  ;;  %v10180_v4 = vld [vmem:[%s11439_s13 + $0x20] ss:$8 sps:$4 sm:$0xff]  }
 0x472   : > { %9449 = vmatprep.subr.bf16.mxu1 %v10161_v3 }
 0x473   : > { %9156 = vmatpush3.bf16.msra.mxu0 %v10160_v36  ;;  %v3772_v36 = vld [vmem:[%s11174_s0 + $0x28] sm:$0xe]  ;;  %v6492_v51 = vsel %vm11341_vm1, %v8353_v58, %v6491_v32  ;;  %s12324_s0 = sld [smem:[#allocation32_spill]] }
 0x474   : > { %9157 = vmatprep.subr.bf16.mxu0 %v10162_v29  ;;  %v8073_v35 = vrot.slane %v3772_v36, 9  ;;  %v10184_v36 = vld [vmem:[%s11439_s13 + $0x40] ss:$8 sps:$4 sm:$0xff]  }
 0x475   : > { %9450 = vmatpush3.bf16.msra.mxu1 %v10161_v3  ;;  %v8071_v3 = vrot.slane %v3770_v34, 9 }
 0x476   : > { %9150 = vmatmul.mubr.bf16.gmra.mrb[12].mxu0 %v8059_v48  ;;  %9451 = vmatprep.subr.bf16.mxu1 %v10163_v22  ;;  %v3814_v55 = vsel %vm11341_vm1, %v8073_v35, %v3813_v24  ;;  %v8074_v48 = vrot.slane %v3773_v11, 9  ;;  %v6872_v35 = vshll.u32 %v8392_v38, 16 }
 0x477   : > { %9158 = vmatpush3.bf16.msra.mxu0 %v10162_v29  ;;  %9169 = vmatprep.mubr.bf16.mxu0 %v8076_v62  ;;  %v3806_v39 = vsel %vm11341_vm1, %v8071_v3, %v3805_v23  ;;  %v8358_v29 = vcombine.low %v6492_v51, %v6496_v18  ;;  %v3817_v62 = vrot.slane %v11964_v20, 5  ;;  %v8390_v20 = vld [vmem:[%s11439_s13 + $0x18] sm:$0xf]  ;;  %v8394_v3 = vld [vmem:[%s11439_s13 + $0x28] sm:$0xf] }
 0x478   : > { %9159 = vmatprep.subr.bf16.mxu0 %v10164_v44  ;;  %v6855_v63 = vshrl.u32 %v8390_v20, 16  ;;  %v8396_v23 = vld [vmem:[%s11439_s13 + $0x30] sm:$0xf]  ;;  %v6883_v24 = vshrl.u32 %v8394_v3, 16  ;;  %v6886_v51 = vshll.u32 %v8394_v3, 16 }
 0x479   : > { %9452 = vmatpush3.bf16.msra.mxu1 %v10163_v22  ;;  %v8077_v22 = vcombine.low %v3802_v31, %v3806_v39  ;;  %v3818_v7 = vsel %vm11341_vm1, %v8074_v48, %v3817_v62  ;;  %v6897_v18 = vshrl.u32 %v8396_v23, 16  ;;  %v6900_v31 = vshll.u32 %v8396_v23, 16 }
 0x47a   : > { %9453 = vmatprep.subr.bf16.mxu1 %v10165_v37  ;;  %v6857_v0 = vrot.slane %v6855_v63, 4 }
 0x47b   : > { %9160 = vmatpush3.bf16.msra.mxu0 %v10164_v44  ;;  %v8078_v44 = vcombine.low %v3810_v41, %v3814_v55  ;;  %v6871_v41 = vrot.slane %v6869_v56, 4  ;;  %v6874_v55 = vrot.slane %v6872_v35, 5  ;;  %v6902_v48 = vrot.slane %v6900_v31, 5  ;;  %v8416_v56 = vld [vmem:[%s11439_s13 + $0x10] sm:$0xe] }
 0x47c   : > { %9161 = vmatprep.subr.bf16.mxu0 %v10166_v5  ;;  %v8417_v35 = vld [vmem:[%s11439_s13 + $0x18] sm:$0xe] }
 0x47d   : > { %9454 = vmatpush3.bf16.msra.mxu1 %v10165_v37  ;;  %v8075_v37 = vrot.slane %v3774_v54, 9  ;;  %v6888_v54 = vrot.slane %v6886_v51, 5  ;;  %v10192_v51 = vld [vmem:[#allocation9 + $0x688] sm:$0xff]  }
 0x47e   : > { %9455 = vmatprep.subr.bf16.mxu1 %v10167_v16 }
 0x47f   : > { %9162 = vmatpush3.bf16.msra.mxu0 %v10166_v5  ;;  %v3821_v5 = vrot.slane %v11973_v43, 5  ;;  %v10178_v43 = vld [vmem:[#allocation9 + $0x630] sm:$0xff]  }
 0x480   : > { %9163 = vmatprep.subr.bf16.mxu0 %v10168_v53 }
 0x481   : > { %9456 = vmatpush3.bf16.msra.mxu1 %v10167_v16  ;;  %v3822_v12 = vsel %vm11341_vm1, %v8075_v37, %v3821_v5  ;;  %v8402_v37 = vld [vmem:[%s11439_s13 + $0x48] sm:$0xf]  ;;  %v12070_v5 = vld [vmem:[%s11439_s13 + $0x24] sm:$0x1] }
 0x482   : > { %9465 = vmatprep.subr.bf16.mxu1 %v10169_v26  ;;  %v8079_v16 = vcombine.low %v3818_v7, %v3822_v12  ;;  %v12073_v7 = vld [vmem:[%s11439_s13 + $0x2c] sm:$0x1]  ;;  %v6875_v12 = vor.u32 %v6874_v55, %v6871_v41  ;;  %v6939_v49 = vshrl.u32 %v8402_v37, 16  ;;  %v6942_v25 = vshll.u32 %v8402_v37, 16 }
 0x483   : > { %9164 = vmatpush3.bf16.msra.mxu0 %v10168_v53  ;;  %v6858_v53 = vshll.u32 %v8390_v20, 16  ;;  %v8425_v41 = vrot.slane %v8417_v35, 9  ;;  %v7136_v55 = vrot.slane %v12052_v2, 5 }
 0x484   : > { %9458 = vmatmul.mubr.bf16.vlgmr.msra.gmra.mrb[0].mxu1 %v8356_v8  ;;  %9165 = vmatprep.subr.bf16.mxu0 %v10170_v61  ;;  %v6864_v8 = vshll.u32 %v12052_v2, 16 }
 0x485   : > { %9461 = vmatprep.mubr.bf16.mxu1 %v8357_v46  ;;  %9466 = vmatpush3.bf16.msra.mxu1 %v10169_v26  ;;  %v6860_v26 = vrot.slane %v6858_v53, 5  ;;  %v6852_v46 = vrot.slane %v6850_v59, 5  ;;  %v6944_v59 = vrot.slane %v6942_v25, 5  ;;  %v10198_v25 = vld [vmem:[#allocation9 + $0x6b8] sm:$0xff]  }
 0x486   : > { %9467 = vmatprep.subr.bf16.mxu1 %v10171_v40  ;;  %v6866_v32 = vrot.slane %v6864_v8, 5 }
 0x487   : > { %9166 = vmatpush3.bf16.msra.mxu0 %v10170_v61  ;;  %v6847_v61 = vor.u32 %v6846_v6, %v6843_v30  ;;  %v6861_v14 = vor.u32 %v6860_v26, %v6857_v0  ;;  %v6892_v30 = vshll.u32 %v12073_v7, 16  ;;  %v10190_v6 = vld [vmem:[#allocation9 + $0x678] sm:$0xff]   ;;  %v6876_v0 = vrot.slane %v6875_v12, 4  ;;  %v10197_v12 = vld [vmem:[#allocation9 + $0x6b0] sm:$0xff]  }
 0x488   : > { %9167 = vmatprep.subr.bf16.mxu0 %v10172_v9 }
 0x489   : > { %9468 = vmatpush3.bf16.msra.mxu1 %v10171_v40  ;;  %v10182_v40 = vld [vmem:[%s11439_s13 + $0x30] ss:$8 sps:$4 sm:$0xff]   ;;  %v6848_v58 = vrot.slane %v6847_v61, 4  ;;  %v6862_v34 = vrot.slane %v6861_v14, 4  ;;  %v6920_v61 = vshll.u32 %v12079_v19, 16 }
 0x48a   : > { %9469 = vmatprep.subr.bf16.mxu1 %v10173_v28 }
 0x48b   : > { %9168 = vmatpush3.bf16.msra.mxu0 %v10172_v9  ;;  %v6853_v60 = vsel %vm11217_vm14, %v6848_v58, %v6852_v46  ;;  %v6867_v47 = vsel %vm11217_vm14, %v6862_v34, %v6866_v32  ;;  %v10186_v9 = vld [vmem:[#allocation9 + $0x658] sm:$0xff]   ;;  %v6894_v34 = vrot.slane %v6892_v30, 5  ;;  %v10191_v46 = vld [vmem:[#allocation9 + $0x680] sm:$0xff]   ;;  %v7144_v30 = vrot.slane %v12073_v7, 5 }
 0x48c   : > { %9462 = vmatmul.mubr.bf16.gmra.mrb[4].mxu1 %v8358_v29  ;;  %v8404_v42 = vcombine.low %v6853_v60, %v6867_v47  ;;  %v10188_v29 = vld [vmem:[#allocation9 + $0x668] sm:$0xff]   ;;  %v6922_v60 = vrot.slane %v6920_v61, 5  ;;  %v12089_v47 = vld [vmem:[%s11439_s13 + $0x4c] sm:$0x1] }
 0x48d   : > { %9470 = vmatpush3.bf16.msra.mxu1 %v10173_v28  ;;  %9481 = vmatprep.mubr.bf16.mxu1 %v10174_v57  ;;  %v8398_v28 = vld [vmem:[%s11439_s13 + $0x38] sm:$0xf]  ;;  %v8400_v57 = vld [vmem:[%s11439_s13 + $0x40] sm:$0xf] }
 0x48e   : > { %9170 = vmatmul.mubr.bf16.vlgmr.msra.gmra.mrb[8].mxu0 %v8077_v22  ;;  %9471 = vmatprep.subr.bf16.mxu1 %v10175_v33  ;;  %v6911_v39 = vshrl.u32 %v8398_v28, 16  ;;  %v6914_v11 = vshll.u32 %v8398_v28, 16  ;;  %v6899_v22 = vrot.slane %v6897_v18, 4  ;;  %v6925_v20 = vshrl.u32 %v8400_v57, 16 }
 0x48f   : > { %9173 = vmatprep.mubr.bf16.mxu0 %v8078_v44 }
 0x490   : > { %v6913_v44 = vrot.slane %v6911_v39, 4  ;;  %v6916_v62 = vrot.slane %v6914_v11, 5  ;;  %v6903_v63 = vor.u32 %v6902_v48, %v6899_v22  ;;  %v6927_v14 = vrot.slane %v6925_v20, 4  ;;  %v8419_v20 = vld [vmem:[%s11439_s13 + $0x28] sm:$0xe] }
 0x491   : > { %9472 = vmatpush3.bf16.msra.mxu1 %v10175_v33  ;;  %v6885_v33 = vrot.slane %v6883_v24, 4  ;;  %v8424_v11 = vrot.slane %v8416_v56, 9 }
 0x492   : > { %9473 = vmatprep.subr.bf16.mxu1 %v10176_v10  ;;  %v6917_v53 = vor.u32 %v6916_v62, %v6913_v44  ;;  %v6904_v8 = vrot.slane %v6903_v63, 4  ;;  %v10194_v62 = vld [vmem:[#allocation9 + $0x698] sm:$0xff]  }
 0x495   : > { %9474 = vmatpush3.bf16.msra.mxu1 %v10176_v10  ;;  %v10189_v10 = vld [vmem:[#allocation9 + $0x670] sm:$0xff]  }
 0x496   : > { %9174 = vmatmul.mubr.bf16.gmra.mrb[12].mxu0 %v8079_v16  ;;  %9475 = vmatprep.subr.bf16.mxu1 %v10177_v15  ;;  %v12076_v16 = vld [vmem:[%s11439_s13 + $0x34] sm:$0x1] }
 0x499   : > { %9476 = vmatpush3.bf16.msra.mxu1 %v10177_v15  ;;  %v6889_v15 = vor.u32 %v6888_v54, %v6885_v33 }
 0x49a   : > { %9477 = vmatprep.subr.bf16.mxu1 %v10178_v43 }
 0x49b   : > { %v6890_v26 = vrot.slane %v6889_v15, 4  ;;  %v8418_v15 = vld [vmem:[%s11439_s13 + $0x20] sm:$0xe] }
 0x49c   : > { %v8426_v63 = vrot.slane %v8418_v15, 9 }
 0x49d   : > { %9478 = vmatpush3.bf16.msra.mxu1 %v10178_v43  ;;  %v6928_v43 = vshll.u32 %v8400_v57, 16  ;;  %v10193_v57 = vld [vmem:[#allocation9 + $0x690] sm:$0xff]  }
 0x49e   : > { %9479 = vmatprep.subr.bf16.mxu1 %v10179_v17 }
 0x4a1   : > { %9480 = vmatpush3.bf16.msra.mxu1 %v10179_v17  ;;  %v6878_v17 = vshll.u32 %v12070_v5, 16 }
 0x4a2   : > { %9489 = vmatprep.subr.bf16.mxu1 %v10181_v50 }
 0x4a3   : > { %v6880_v58 = vrot.slane %v6878_v17, 5  ;;  %v8427_v17 = vrot.slane %v8419_v20, 9 }
 0x4a4   : > { %9482 = vmatmul.mubr.bf16.vlgmr.msra.gmra.mrb[0].mxu1 %v10180_v4  ;;  %v6930_v4 = vrot.slane %v6928_v43, 5  ;;  %v8420_v43 = vld [vmem:[%s11439_s13 + $0x30] sm:$0xe] }
 0x4a5   : > { %9485 = vmatprep.mubr.bf16.mxu1 %v10182_v40  ;;  %9490 = vmatpush3.bf16.msra.mxu1 %v10181_v50  ;;  %v6906_v50 = vshll.u32 %v12076_v16, 16  ;;  %v6918_v40 = vrot.slane %v6917_v53, 4  ;;  %v7140_v53 = vrot.slane %v12070_v5, 5 }
 0x4a6   : > { %9491 = vmatprep.subr.bf16.mxu1 %v10183_v1 }
 0x4a7   : > { %v6908_v32 = vrot.slane %v6906_v50, 5  ;;  %v6923_v23 = vsel %vm11217_vm14, %v6918_v40, %v6922_v60  ;;  %v7152_v50 = vrot.slane %v12079_v19, 5  ;;  %v7141_v61 = vsel %vm11341_vm1, %v8426_v63, %v7140_v53  ;;  %v10199_v60 = vld [vmem:[#allocation11] sm:$0xff]  }
 0x4a8   : > { %9537 = vmatprep.subr.bf16.mxu0 %v10199_v60 }
 0x4a9   : > { %9492 = vmatpush3.bf16.msra.mxu1 %v10183_v1  ;;  %v6941_v1 = vrot.slane %v6939_v49, 4  ;;  %v6909_v3 = vsel %vm11217_vm14, %v6904_v8, %v6908_v32  ;;  %v8421_v49 = vld [vmem:[%s11439_s13 + $0x38] sm:$0xe]  ;;  %9538 = vmatpush3.bf16.msra.mxu0 %v10199_v60  ;;  %v8455_v60 = vld [vmem:[%s12325_s10] ss:$0 sm:$0xff] }
 0x4aa   : > { %9493 = vmatprep.subr.bf16.mxu1 %v10185_v21  ;;  %v8406_v18 = vcombine.low %v6909_v3, %v6923_v23 }
 0x4ab   : > { %v6945_v38 = vor.u32 %v6944_v59, %v6941_v1  ;;  %v8423_v1 = vld [vmem:[%s11439_s13 + $0x48] sm:$0xe] }
 0x4ac   : > { %9486 = vmatmul.mubr.bf16.gmra.mrb[4].mxu1 %v10184_v36  ;;  %v6881_v36 = vsel %vm11217_vm14, %v6876_v0, %v6880_v58  ;;  %v7148_v0 = vrot.slane %v12076_v16, 5  ;;  %v8431_v40 = vrot.slane %v8423_v1, 9  ;;  %v7160_v58 = vrot.slane %v12089_v47, 5 }
 0x4ad   : > { %9494 = vmatpush3.bf16.msra.mxu1 %v10185_v21  ;;  %9505 = vmatprep.mubr.bf16.mxu1 %v8404_v42  ;;  %v12086_v21 = vld [vmem:[%s11439_s13 + $0x44] sm:$0x1]  ;;  %v6931_v42 = vor.u32 %v6930_v4, %v6927_v14  ;;  %v6946_v39 = vrot.slane %v6945_v38, 4  ;;  %v7145_v14 = vsel %vm11341_vm1, %v8427_v17, %v7144_v30  ;;  %v8422_v4 = vld [vmem:[%s11439_s13 + $0x40] sm:$0xe]  ;;  %v10206_v38 = vld [vmem:[#allocation11 + $0x38] sm:$0xff]  }
 0x4ae   : > { %9495 = vmatprep.subr.bf16.mxu1 %v10186_v9  ;;  %v6934_v28 = vshll.u32 %v12086_v21, 16  ;;  %v8433_v16 = vcombine.low %v7141_v61, %v7145_v14  ;;  %v8430_v59 = vrot.slane %v8422_v4, 9  ;;  %v7156_v8 = vrot.slane %v12086_v21, 5  ;;  %v10202_v21 = vld [vmem:[#allocation11 + $0x18] sm:$0xff]   ;;  %s8458_s13 = sshll.u32 %s12326_s20, 5 }
 0x4af   : > { %v6932_v31 = vrot.slane %v6931_v42, 4  ;;  %v10204_v42 = vld [vmem:[#allocation11 + $0x28] sm:$0xff]   ;;  %s7562_s16 = sadd.s32 %s8458_s13, %s8457_s2 }
 0x4b0   : > { %v6936_v33 = vrot.slane %v6934_v28, 5  ;;  %s8459_s7 = sshll.u32 %s7562_s16, 7 }
 0x4b1   : > { %9496 = vmatpush3.bf16.msra.mxu1 %v10186_v9  ;;  %v6895_v9 = vsel %vm11217_vm14, %v6890_v26, %v6894_v34  ;;  %v8429_v26 = vrot.slane %v8421_v49, 9  ;;  %v7157_v34 = vsel %vm11341_vm1, %v8430_v59, %v7156_v8  ;;  %s12171_s14 = scalar_lea.hbm %s12327_s4, %s8459_s7 }
 0x4b2   : > { %9497 = vmatprep.subr.bf16.mxu1 %v10187_v45  ;;  %v8405_v24 = vcombine.low %v6881_v36, %v6895_v9  ;;  %v6937_v22 = vsel %vm11217_vm14, %v6932_v31, %v6936_v33  ;;  %v10200_v36 = vld [vmem:[#allocation11 + $0x8] sm:$0xff]   ;;  %v10201_v9 = vld [vmem:[#allocation11 + $0x10] sm:$0xff]  }
 0x4b3   : > { %v7153_v7 = vsel %vm11341_vm1, %v8429_v26, %v7152_v50  ;;  %9539 = vmatprep.subr.bf16.mxu0 %v10200_v36  ;;  %v8444_v31 = vld [vmem:[%s12322_s24] ss:$0 sm:$0xff] }
 0x4b4   : > { %9540 = vmatpush3.bf16.msra.mxu0 %v10200_v36 }
 0x4b5   : > { %9498 = vmatpush3.bf16.msra.mxu1 %v10187_v45  ;;  %v6948_v45 = vshll.u32 %v12089_v47, 16  ;;  %9541 = vmatprep.subr.bf16.mxu0 %v10201_v9  ;;  %v10203_v47 = vld [vmem:[#allocation11 + $0x20] sm:$0xff]  }
 0x4b6   : > { %9499 = vmatprep.subr.bf16.mxu1 %v10188_v29 }
 0x4b7   : > { %v6950_v54 = vrot.slane %v6948_v45, 5 }
 0x4b8   : > { %9542 = vmatpush3.bf16.msra.mxu0 %v10201_v9 }
 0x4b9   : > { %9500 = vmatpush3.bf16.msra.mxu1 %v10188_v29  ;;  %v7132_v29 = vrot.slane %v12049_v27, 5  ;;  %v6951_v48 = vsel %vm11217_vm14, %v6946_v39, %v6950_v54  ;;  %v7137_v27 = vsel %vm11341_vm1, %v8425_v41, %v7136_v55  ;;  %9543 = vmatprep.subr.bf16.mxu0 %v10202_v21 }
 0x4ba   : > { %9501 = vmatprep.subr.bf16.mxu1 %v10189_v10  ;;  %v8407_v2 = vcombine.low %v6937_v22, %v6951_v48 }
 0x4bb   : > { %v7133_v44 = vsel %vm11341_vm1, %v8424_v11, %v7132_v29  ;;  %v8445_v29 = vld [vmem:[%s12323_s5] ss:$0 sm:$0xff]  ;;  %s7550_s5 = scalar_lea.sflag [#allocation5], %s10903_s17 }
 0x4bc   : > { %v8432_v37 = vcombine.low %v7133_v44, %v7137_v27  ;;  %9544 = vmatpush3.bf16.msra.mxu0 %v10202_v21  ;;  %v7489_v21 = vld [vmem:[%s10907_s9 + $0x10] sm:$0xff] }
 0x4bd   : > { %9502 = vmatpush3.bf16.msra.mxu1 %v10189_v10  ;;  %v10196_v10 = vld [vmem:[#allocation9 + $0x6a8] sm:$0xff]   ;;  %9545 = vmatprep.subr.bf16.mxu0 %v10203_v47 }
 0x4be   : > { %9503 = vmatprep.subr.bf16.mxu1 %v10190_v6 }
 0x4c0   : > { %9546 = vmatpush3.bf16.msra.mxu0 %v10203_v47 }
 0x4c1   : > { %9504 = vmatpush3.bf16.msra.mxu1 %v10190_v6  ;;  %v8428_v6 = vrot.slane %v8420_v43, 9  ;;  %9547 = vmatprep.subr.bf16.mxu0 %v10204_v42 }
 0x4c2   : > { %9513 = vmatprep.subr.bf16.mxu1 %v10191_v46 }
 0x4c3   : > { %v7149_v5 = vsel %vm11341_vm1, %v8428_v6, %v7148_v0 }
 0x4c4   : > { %9506 = vmatmul.mubr.bf16.vlgmr.msra.gmra.mrb[0].mxu1 %v8405_v24  ;;  %v8434_v19 = vcombine.low %v7149_v5, %v7153_v7  ;;  %9548 = vmatpush3.bf16.msra.mxu0 %v10204_v42 }
 0x4c5   : > { %9509 = vmatprep.mubr.bf16.mxu1 %v8406_v18  ;;  %9514 = vmatpush3.bf16.msra.mxu1 %v10191_v46  ;;  %v7161_v46 = vsel %vm11341_vm1, %v8431_v40, %v7160_v58 }
 0x4c6   : > { %9515 = vmatprep.subr.bf16.mxu1 %v10192_v51  ;;  %v8435_v32 = vcombine.low %v7157_v34, %v7161_v46  ;;  %9549 = vmatprep.subr.bf16.mxu0 %v10205_v52  ;;  %v8454_v46 = vld [vmem:[%s12324_s0] ss:$0 sm:$0xff]  ;;  %s10363_s0 = sshll.u32 %s10505_s12, 4  ;;  %s10364_s0 = int_to_ptr.vmem [resolvable:$false] %s10363_s0 }
 0x4c7   : > { %s10365_s28 = scalar_lea.vmem %s10364_s0, 2048  ;;  %p10366_p1 = scmp.lt.s32.totalorder %s12165_s3, %s10364_s0 }
 0x4c8   : > { %9550 = vmatpush3.bf16.msra.mxu0 %v10205_v52  ;;  %p10367_p7 = scmp.lt.s32.totalorder %s10365_s28, %s10359_s6 }
 0x4c9   : > { %9516 = vmatpush3.bf16.msra.mxu1 %v10192_v51  ;;  %9551 = vmatprep.subr.bf16.mxu0 %v10206_v38 }
 0x4ca   : > { %9517 = vmatprep.subr.bf16.mxu1 %v10193_v57  ;;  %p10368_p3 = por %p10367_p7, %p10366_p1 }
 0x4cc   : > { %9510 = vmatmul.mubr.bf16.gmra.mrb[4].mxu1 %v8407_v2  ;;  %9552 = vmatpush3.bf16.msra.mxu0 %v10206_v38  ;;  %v7487_v38 = vld [vmem:[%s10907_s9] sm:$0xff]  ;;  %p10369_p6 = pnand %p10368_p3, %p10362_p4 }
 0x4cd   : > { %9518 = vmatpush3.bf16.msra.mxu1 %v10193_v57  ;;  %9529 = vmatprep.mubr.bf16.mxu1 %v8432_v37 }
 0x4ce   : > { %9519 = vmatprep.subr.bf16.mxu1 %v10194_v62 }
 0x4d1   : > { %9520 = vmatpush3.bf16.msra.mxu1 %v10194_v62 }
 0x4d2   : > { %9521 = vmatprep.subr.bf16.mxu1 %v10195_v13 }
 0x4d5   : > { %9522 = vmatpush3.bf16.msra.mxu1 %v10195_v13 }
 0x4d6   : > { %9523 = vmatprep.subr.bf16.mxu1 %v10196_v10 }
 0x4d9   : > { %9524 = vmatpush3.bf16.msra.mxu1 %v10196_v10 }
 0x4da   : > { %9525 = vmatprep.subr.bf16.mxu1 %v10197_v12 }
 0x4dd   : > { %9526 = vmatpush3.bf16.msra.mxu1 %v10197_v12 }
 0x4de   : > { %9527 = vmatprep.subr.bf16.mxu1 %v10198_v25 }
 0x4e1   : > { %9528 = vmatpush3.bf16.msra.mxu1 %v10198_v25 }
 0x4e4   : > { %9530 = vmatmul.mubr.bf16.vlgmr.msra.gmra.mrb[0].mxu1 %v8433_v16 }
 0x4e5   : > { %9533 = vmatprep.mubr.bf16.mxu1 %v8434_v19 }
 0x4ec   : > { %9534 = vmatmul.mubr.bf16.gmra.mrb[4].mxu1 %v8435_v32 }
 0x561   : > { %v9171_v3 = vpop.f32.mrb[8].mxu0 }
 0x562   : > { %v3938_v23 = vpop.f32.mrb[9].mxu0 }
 0x563   : > { %v9172_v28 = vpop.f32.mrb[10].mxu0 }
 0x564   : > { %v3941_v45 = vpop.f32.mrb[11].mxu0 }
 0x569   : > { %v9175_v56 = vpop.f32.mrb[12].mxu0 }
 0x56a   : > { %v3954_v35 = vpop.f32.mrb[13].mxu0 }
 0x56b   : > { %v9176_v24 = vpop.f32.mrb[14].mxu0 }
 0x56c   : > { %v3957_v51 = vpop.f32.mrb[15].mxu0 }
 0x5b7   : > { %v9531_v18 = vpop.f32.mrb[0].mxu1 }
 0x5b8   : > { %v9577_v39 = vadd.f32 %v9531_v18, %v9171_v3  ;;  %v7277_v11 = vpop.f32.mrb[1].mxu1 }
 0x5b9   : > { %v9578_v41 = vadd.f32 %v7277_v11, %v3938_v23  ;;  %v9532_v55 = vpop.f32.mrb[2].mxu1 }
 0x5ba   : > { %v7325_v33 = vmul.f32 %v9577_v39, %v8444_v31  ;;  %v9579_v54 = vadd.f32 %v9532_v55, %v9172_v28  ;;  %v7280_v57 = vpop.f32.mrb[3].mxu1 }
 0x5bb   : > { %v7323_v22 = vmul.f32 %v9578_v41, %v8444_v31  ;;  %v9580_v48 = vadd.f32 %v7280_v57, %v3941_v45  ;;  %v7490_v45 = vld [vmem:[%s10907_s9 + $0x18] sm:$0xff] }
 0x5bc   : > { %v7340_v44 = vadd.f32 %v8445_v29, %v7325_v33  ;;  %v7326_v27 = vmul.f32 %v9579_v54, %v8444_v31 }
 0x5bd   : > { %v7338_v2 = vadd.f32 %v8445_v29, %v7323_v22  ;;  %v7324_v62 = vmul.f32 %v9580_v48, %v8444_v31  ;;  %v7493_v48 = vld [vmem:[%s10907_s9 + $0x30] sm:$0xff] }
 0x5be   : > { %v7341_v37 = vadd.f32 %v8445_v29, %v7326_v27  ;;  %v7348_v12 = vmax.f32 %v7340_v44, 0.0 }
 0x5bf   : > { %v7339_v13 = vadd.f32 %v8445_v29, %v7324_v62  ;;  %v9535_v10 = vpop.f32.mrb[4].mxu1  ;;  %v7346_v49 = vmax.f32 %v7338_v2, 0.0  ;;  %v7491_v62 = vld [vmem:[%s10907_s9 + $0x20] sm:$0xff] }
 0x5c0   : > { %v7349_v15 = vmax.f32 %v7341_v37, 0.0  ;;  %v9581_v20 = vadd.f32 %v9535_v10, %v9175_v56  ;;  %v7293_v43 = vpop.f32.mrb[5].mxu1 }
 0x5c1   : > { %v7347_v25 = vmax.f32 %v7339_v13, 0.0  ;;  %v9582_v63 = vadd.f32 %v7293_v43, %v3954_v35  ;;  %v9536_v53 = vpop.f32.mrb[6].mxu1 }
 0x5c2   : > { %v7355_v17 = vpack.c.bf16 %v7349_v15, %v7348_v12  ;;  %v7329_v30 = vmul.f32 %v9581_v20, %v8444_v31  ;;  %v9583_v6 = vadd.f32 %v9536_v53, %v9176_v24  ;;  %v7296_v0 = vpop.f32.mrb[7].mxu1  ;;  %v7494_v12 = vld [vmem:[%s10907_s9 + $0x38] sm:$0xff] }
 0x5c3   : > { %v7327_v26 = vmul.f32 %v9582_v63, %v8444_v31  ;;  %v9584_v50 = vadd.f32 %v7296_v0, %v3957_v51  ;;  %v7354_v61 = vpack.c.bf16 %v7347_v25, %v7346_v49  ;;  %v7488_v51 = vld [vmem:[%s10907_s9 + $0x8] sm:$0xff] }
 0x5c4   : > { %v7344_v14 = vadd.f32 %v8445_v29, %v7329_v30  ;;  %v7330_v4 = vmul.f32 %v9583_v6, %v8444_v31  ;;  %v7492_v49 = vld [vmem:[%s10907_s9 + $0x28] sm:$0xff] }
 0x5c5   : > { %v7342_v5 = vadd.f32 %v8445_v29, %v7327_v26  ;;  %v7328_v7 = vmul.f32 %v9584_v50, %v8444_v31  ;;  %9553 = vmatprep.mubr.bf16.mxu0 %v7354_v61 }
 0x5c6   : > { %v7345_v1 = vadd.f32 %v8445_v29, %v7330_v4  ;;  %9554 = vmatmul.mubr.bf16.vlgmr.msra.gmra.mrb[16].mxu0 %v7355_v17  ;;  %v7352_v59 = vmax.f32 %v7344_v14, 0.0 }
 0x5c7   : > { %v7343_v16 = vadd.f32 %v8445_v29, %v7328_v7  ;;  %v7350_v8 = vmax.f32 %v7342_v5, 0.0 }
 0x5c8   : > { %v7353_v19 = vmax.f32 %v7345_v1, 0.0 }
 0x5c9   : > { %v7351_v40 = vmax.f32 %v7343_v16, 0.0 }
 0x5ca   : > { %v7357_v58 = vpack.c.bf16 %v7353_v19, %v7352_v59 }
 0x5cb   : > { %v7356_v34 = vpack.c.bf16 %v7351_v40, %v7350_v8 }
 0x5cd   : > { %9557 = vmatprep.mubr.bf16.mxu0 %v7356_v34 }
 0x5ce   : > { %9558 = vmatmul.mubr.bf16.gmra.mrb[20].mxu0 %v7357_v58 }
 0x699   : > { %v9555_v32 = vpop.f32.mrb[16].mxu0 }
 0x69a   : > { %v7504_v36 = vmul.f32 %v9555_v32, %v8454_v46  ;;  %v7456_v9 = vpop.f32.mrb[17].mxu0 }
 0x69b   : > { %v7502_v47 = vmul.f32 %v8454_v46, %v7456_v9  ;;  %v9556_v42 = vpop.f32.mrb[18].mxu0 }
 0x69c   : > { %v7519_v52 = vadd.f32 %v8455_v60, %v7504_v36  ;;  %v7505_v3 = vmul.f32 %v9556_v42, %v8454_v46  ;;  %v7459_v23 = vpop.f32.mrb[19].mxu0 }
 0x69d   : > { %v7517_v28 = vadd.f32 %v8455_v60, %v7502_v47  ;;  %v7503_v56 = vmul.f32 %v8454_v46, %v7459_v23 }
 0x69e   : > { %v7527_v35 = vadd.f32 %v7519_v52, %v7489_v21  ;;  %v7520_v24 = vadd.f32 %v8455_v60, %v7505_v3 }
 0x69f   : > { %v7525_v18 = vadd.f32 %v7517_v28, %v7487_v38  ;;  %v7518_v31 = vadd.f32 %v8455_v60, %v7503_v56 }
 0x6a0   : > { %v7535_v39 = vmax.f32 %v7527_v35, 0.0  ;;  %v7528_v11 = vadd.f32 %v7520_v24, %v7490_v45 }
 0x6a1   : > { %v7533_v29 = vmax.f32 %v7525_v18, 0.0  ;;  %v7526_v41 = vadd.f32 %v7518_v31, %v7488_v51  ;;  %v9559_v55 = vpop.f32.mrb[20].mxu0 }
 0x6a2   : > { %7543 = vst [vmem:[%s10929_s30 + $0x10] sm:$0xff] %v7535_v39  ;;  %v7536_v33 = vmax.f32 %v7528_v11, 0.0  ;;  %v7508_v54 = vmul.f32 %v9559_v55, %v8454_v46  ;;  %v7472_v57 = vpop.f32.mrb[21].mxu0 }
 0x6a3   : > { %7541 = vst [vmem:[%s10929_s30] sm:$0xff] %v7533_v29  ;;  %v7534_v22 = vmax.f32 %v7526_v41, 0.0  ;;  %v7506_v44 = vmul.f32 %v8454_v46, %v7472_v57  ;;  %v9560_v27 = vpop.f32.mrb[22].mxu0 }
 0x6a4   : > { %7544 = vst [vmem:[%s10929_s30 + $0x18] sm:$0xff] %v7536_v33  ;;  %v7523_v2 = vadd.f32 %v8455_v60, %v7508_v54  ;;  %v7509_v37 = vmul.f32 %v9560_v27, %v8454_v46  ;;  %v7475_v13 = vpop.f32.mrb[23].mxu0 }
 0x6a5   : > { %7542 = vst [vmem:[%s10929_s30 + $0x8] sm:$0xff] %v7534_v22  ;;  %v7521_v10 = vadd.f32 %v8455_v60, %v7506_v44  ;;  %v7507_v15 = vmul.f32 %v8454_v46, %v7475_v13 }
 0x6a6   : > { %v7531_v20 = vadd.f32 %v7523_v2, %v7493_v48  ;;  %v7524_v43 = vadd.f32 %v8455_v60, %v7509_v37 }
 0x6a7   : > { %v7529_v25 = vadd.f32 %v7521_v10, %v7491_v62  ;;  %v7522_v63 = vadd.f32 %v8455_v60, %v7507_v15 }
 0x6a8   : > { %v7539_v53 = vmax.f32 %v7531_v20, 0.0  ;;  %v7532_v17 = vadd.f32 %v7524_v43, %v7494_v12 }
 0x6a9   : > { %v7537_v30 = vmax.f32 %v7529_v25, 0.0  ;;  %v7530_v6 = vadd.f32 %v7522_v63, %v7492_v49 }
 0x6aa   : > { %7547 = vst [vmem:[%s10929_s30 + $0x30] sm:$0xff] %v7539_v53  ;;  %v7540_v0 = vmax.f32 %v7532_v17, 0.0 }
 0x6ab   : > { %7545 = vst [vmem:[%s10929_s30 + $0x20] sm:$0xff] %v7537_v30  ;;  %v7538_v26 = vmax.f32 %v7530_v6, 0.0 }
 0x6ac   : > { %7548 = vst [vmem:[%s10929_s30 + $0x38] sm:$0xff] %v7540_v0 }
 0x6ad   : > { %7546 = vst [vmem:[%s10929_s30 + $0x28] sm:$0xff] %v7538_v26 }
 0x6ae   : > { %10372 = shalt.err (!%p10369_p6)
}
 0x6af   : > { %s10373_s30 = scalar_lea.hbm %s12171_s14, 1024  ;;  %s10377_s20 = scalar_lea.hbm %s12327_s4, 8192 }
 0x6b0   : > { %p10374_p8 = scmp.ne.s32.totalorder %s12171_s14, %s10373_s30  ;;  %p10378_p10 = scmp.lt.u32.totalorder %s12171_s14, %s12327_s4 }
 0x6b1   : > { %p10379_p12 = scmp.lt.u32.totalorder %s10377_s20, %s10373_s30  ;;  %p10381_p13 = scmp.lt.u32.totalorder %s10373_s30, %s12171_s14 }
 0x6b2   : > { %p10375_p5 = pnand %p10374_p8, %p10778_p9 }
 0x6b3   : > { %p10380_p0 = por %p10379_p12, %p10378_p10 }
 0x6b4   : > { %p10376_p11 = pneg %p10375_p5 }
 0x6b5   : > { %p10382_p2 = por %p10381_p13, %p10380_p0 }
 0x6b7   : > { %p10383_p4 = pnand %p10382_p2, %p10376_p11 }
 0x6b9   : > { %10386 = shalt.err (!%p10383_p4)
}
 0x6ba   : > { %s10506_s16 = smov 128   ;;  %s10507_s7 = smov 8  }
 0x6bb   : > { %9801 = dma.vmem_to_hbm [thread:$0]  (%p10778_p9), %s12165_s3, 1024, %s12171_s14, %s7550_s5, %s10506_s16, %s10506_s16, %s10507_s7  }
 0x6bc PF: > { %s12328_s9 = sld [smem:[#allocation18_spill]]  ;;  %s12329_s24 = sld [smem:[#allocation22_spill]] }
 0x6bd   : > { %p9831_p1 = scmp.ge.s32.totalorder %s10493_s27, 2 }
 0x6c2   : > { %s7580_s6 = sand.u32 1, %s12328_s9   ;;  %p12330_p7 = scmp.ne.s32.totalorder %s12329_s24, 0 }
 0x6c3   : > { %s7581_s12 = scalar_lea.sflag [#allocation5], %s7580_s6 }
 0x6c4   : > { %p9821_p3 = pnand %p9831_p1, %p12330_p7 }
 0x6c6   : > { %10448 = dma.done.wait (!%p9821_p3), %s7581_s12, 1024  }
 0x6c7   : > { %10450 = vsyncadd (!%p9821_p3), %s7581_s12, 4294966272  ;;  %s31_s27 = sadd.s32 1, %s10493_s27   ;;  %s12331_s15 = smov %s10751_s23 }
 0x6c8   : > { %p28_p6 = scmp.ge.s32.totalorder %s31_s27, 10   ;;  %s12332_s3 = sld [smem:[#allocation23_spill]] }
 0x6c9   : > { %s12333_s17 = smov %s10457_s18  ;;  %s12334_s18 = smov %s10461_s19 }
 0x6ca   : > { %s12335_s19 = smov %s10850_s11  ;;  %s12336_s20 = smov %s10469_s21 }
 0x6cb   : > { %s12337_s21 = smov %s10473_s22  ;;  %s12338_s22 = smov %s10784_s29 }
 0x6cc   : > { %s12339_s23 = smov %s10485_s25  ;;  %s12340_s24 = smov %s10489_s26 }
 0x6cd   : > { %s12341_s25 = smov %s12331_s15  ;;  %30 = sbr.rel (!%p28_p6) target bundleno = 24 (0x18), region = 175 }
 0x6ce   : > { %s12342_s26 = smov %s12332_s3 }
 0x6d4   :  { %7586 = vsyncpa [#allocation4], 1 }
 0x6d5   :  { %7588 = vsyncpa [#allocation4 + $0x1], 1 }
 0x6d6   :  { %7589 = vsyncpa [#allocation7], 1 }
 0x6d7   :  { %7591 = vsyncpa [#allocation7 + $0x1], 1 }
 0x6d8   :  { %7592 = vsyncpa [#allocation10], 1 }
 0x6d9   :  { %7593 = vsyncpa [#allocation5], 1 }
 0x6da   :  { %7595 = vsyncpa [#allocation5 + $0x1], 1 }

</bundles_post_ra>
